<compile_context>
chip_gen: v7x
topology: tpu7x:2x2x1
jax: 0.10.0
libtpu: 0.0.40
codegen_flags: <defaults>
</compile_context>

<pallas_src>
import math
import jax
import jax.numpy as jnp
from jax.experimental import pallas as pl
from jax.experimental.pallas import tpu as pltpu

# ----------------------- model dims (small, synthetic) -----------------------
D_MODEL = 32
N_HEADS = 4
D_K = D_MODEL // N_HEADS          # 8
D_FF = 64
B = 2
S_TGT = 8                          # decoder (target) sequence length
S_SRC = 8                          # encoder (memory) sequence length
EPS = 1e-6

# ------------------- packed parameter slab layout (one DMA) -------------------
# rows [0, D_MODEL)                      : lane-concatenated D_MODEL-row matrices
#   lanes [0, 3D)      sa_wqkv   (fused self-attn QKV; 1/sqrt(dk) folded into Q cols)
#   lanes [3D, 4D)     sa_wo
#   lanes [4D, 5D)     ca_wq     (scale folded)
#   lanes [5D, 7D)     ca_wkv    (fused cross-attn KV)
#   lanes [7D, 8D)     ca_wo
#   lanes [8D, 8D+FF)  ff_w1
# rows [D_MODEL, D_MODEL+D_FF), lanes [0, D_MODEL) : ff_w2
# rows [R_VEC, R_VEC+13)                 : bias / LayerNorm vectors, one per row:
#   +0 sa_bqkv(3D) +1 sa_bo(D) +2 ca_bq(D) +3 ca_bkv(2D) +4 ca_bo(D)
#   +5 ff_b1(FF)   +6 ff_b2(D) +7..9 ln_g[0..2](D)       +10..12 ln_b[0..2](D)
R_W2 = D_MODEL
R_VEC = D_MODEL + D_FF
PACK_ROWS = R_VEC + 13
PACK_LANES = 8 * D_MODEL + D_FF

VMEM_SPEC = pl.BlockSpec(memory_space=pltpu.MemorySpace.VMEM)


# -------------------------- in-kernel helper functions -----------------------
def _layer_norm(x, gamma, beta):
    # Annotated-Transformer LayerNorm: g * (x - mean) / (std + eps) + b,
    # with unbiased std (n-1 denominator, matching torch.Tensor.std default).
    mean = jnp.mean(x, axis=-1, keepdims=True)
    c = x - mean
    var = jnp.sum(c * c, axis=-1, keepdims=True) * (1.0 / (D_MODEL - 1))
    return c / (jnp.sqrt(var) + EPS) * gamma + beta


def _mha_proj(q, k, v, mask, wo, sq, sk):
    """Multi-head attention with the output projection folded in.

    q: [B*sq, D], k/v: [B*sk, D], mask: [B, sq, sk] raw 0/1, wo: [D, D].
    Returns sum_h softmax(q_h k_h^T + bias) v_h @ Wo_h  ->  [B*sq, D].
    Heads/batches are statically unrolled on VMEM-resident data; no concats,
    no transposes — per-head Wo products accumulate into one [sq, D] tile.
    The 1/sqrt(d_k) scale is already folded into the Q projection weights.
    """
    neg = jnp.float32(-1e9)
    outs = []
    for b in range(B):
        q_b = q[b * sq:(b + 1) * sq, :]
        k_b = k[b * sk:(b + 1) * sk, :]
        v_b = v[b * sk:(b + 1) * sk, :]
        # additive bias built in-kernel on the VPU (0 keep / -1e9 masked)
        bias_b = jnp.where(mask[b] == 0, neg, jnp.float32(0.0))        # [sq, sk]
        acc = jnp.zeros((sq, D_MODEL), jnp.float32)
        for h in range(N_HEADS):
            sl = slice(h * D_K, (h + 1) * D_K)
            # scores: contract on the shared dk axis (no explicit k.T)
            s = jax.lax.dot_general(
                q_b[:, sl], k_b[:, sl], (((1,), (1,)), ((), ())),
                preferred_element_type=jnp.float32) + bias_b
            m = jnp.max(s, axis=-1, keepdims=True)
            e = jnp.exp(s - m)
            p = e * pl.reciprocal(jnp.sum(e, axis=-1, keepdims=True), approx=True)
            ctx = jnp.dot(p, v_b[:, sl], preferred_element_type=jnp.float32)   # [sq, dk]
            # fold the head concat into the output projection: accumulate ctx @ Wo_h
            acc = acc + jnp.dot(ctx, wo[sl, :], preferred_element_type=jnp.float32)
        outs.append(acc)
    return jnp.concatenate(outs, axis=0)                               # [B*sq, D]


# ------------------------------ fused decoder kernel --------------------------
def decoder_layer_kernel(x_ref, mem_ref, tgt_mask_ref, src_mask_ref, w_ref, o_ref):
    D, FF = D_MODEL, D_FF
    x = x_ref[...]                      # [B*S_TGT, D]
    mem = mem_ref[...]                  # [B*S_SRC, D]

    # --- unpack the single parameter slab with static (free) slices ---
    w32 = w_ref[0:D, :]                         # [D, 8D+FF]
    sa_wqkv = w32[:, 0:3 * D]
    sa_wo = w32[:, 3 * D:4 * D]
    ca_wq = w32[:, 4 * D:5 * D]
    ca_wkv = w32[:, 5 * D:7 * D]
    ca_wo = w32[:, 7 * D:8 * D]
    ff_w1 = w32[:, 8 * D:8 * D + FF]
    ff_w2 = w_ref[R_W2:R_W2 + FF, 0:D]          # [FF, D]
    vecs = w_ref[R_VEC:R_VEC + 13, :]           # [13, 8D+FF]
    sa_bqkv = vecs[0:1, 0:3 * D]
    sa_bo = vecs[1:2, 0:D]
    ca_bq = vecs[2:3, 0:D]
    ca_bkv = vecs[3:4, 0:2 * D]
    ca_bo = vecs[4:5, 0:D]
    ff_b1 = vecs[5:6, 0:FF]
    ff_b2 = vecs[6:7, 0:D]
    ln_g = vecs[7:10, 0:D]
    ln_b = vecs[10:13, 0:D]

    # ---- sublayer[0]: self-attention (pre-norm residual) ----
    xn = _layer_norm(x, ln_g[0:1, :], ln_b[0:1, :])
    qkv = jnp.dot(xn, sa_wqkv, preferred_element_type=jnp.float32) + sa_bqkv
    attn = _mha_proj(qkv[:, 0:D], qkv[:, D:2 * D], qkv[:, 2 * D:3 * D],
                     tgt_mask_ref[...], sa_wo, S_TGT, S_TGT) + sa_bo
    x = x + attn

    # ---- sublayer[1]: source (cross) attention ----
    xn = _layer_norm(x, ln_g[1:2, :], ln_b[1:2, :])
    q = jnp.dot(xn, ca_wq, preferred_element_type=jnp.float32) + ca_bq
    kv = jnp.dot(mem, ca_wkv, preferred_element_type=jnp.float32) + ca_bkv
    attn = _mha_proj(q, kv[:, 0:D], kv[:, D:2 * D],
                     src_mask_ref[...], ca_wo, S_TGT, S_SRC) + ca_bo
    x = x + attn

    # ---- sublayer[2]: position-wise feed-forward ----
    xn = _layer_norm(x, ln_g[2:3, :], ln_b[2:3, :])
    h = jnp.maximum(jnp.dot(xn, ff_w1, preferred_element_type=jnp.float32) + ff_b1, 0.0)
    y = jnp.dot(h, ff_w2, preferred_element_type=jnp.float32) + ff_b2

    # TODO(synk): for D_MODEL < 128 this is a masked (vst.msk) store; at real sizes
    # reshape to a lane-dense [*, 128] slab before writing.
    o_ref[...] = x + y                  # single dense [B*S, D] store


# ---------------------------------- wrapper -----------------------------------
def decoder_layer(x, memory, src_mask, tgt_mask, w_slab):
    """DecoderLayer.forward: one fused pallas_call, everything resident in VMEM.

    Masks are the raw 0/1 (B, 1, Sq, Sk) tensors; the 0/-1e9 bias is built inside
    the kernel (assumes the broadcast head dim is 1).
    """
    Bx, Sx, D = x.shape
    Sm = memory.shape[1]
    assert (Bx, Sx, Sm, D) == (B, S_TGT, S_SRC, D_MODEL)
    tgt_m = tgt_mask.reshape(Bx, Sx, Sx).astype(jnp.float32)   # metadata-only reshape
    src_m = src_mask.reshape(Bx, Sx, Sm).astype(jnp.float32)

    out2d = pl.pallas_call(
        decoder_layer_kernel,
        out_shape=jax.ShapeDtypeStruct((Bx * Sx, D), jnp.float32),
        in_specs=[VMEM_SPEC] * 5,
        out_specs=VMEM_SPEC,
    )(x.reshape(Bx * Sx, D), memory.reshape(Bx * Sm, D), tgt_m, src_m, w_slab)
    return out2d.reshape(Bx, Sx, D)


# ------------------------------ parameter setup ------------------------------
def init_params(key):
    """Raw per-matrix parameters, mirroring the torch module's Linears/LayerNorms."""
    def lin(k, fan_in, fan_out):
        kw, kb = jax.random.split(k)
        return (0.1 * jax.random.normal(kw, (fan_in, fan_out), jnp.float32),
                0.02 * jax.random.normal(kb, (fan_out,), jnp.float32))

    ks = jax.random.split(key, 10)
    p = {}
    for i, name in enumerate(["sa_q", "sa_k", "sa_v", "sa_o",
                              "ca_q", "ca_k", "ca_v", "ca_o"]):
        p[f"{name}_w"], p[f"{name}_b"] = lin(ks[i], D_MODEL, D_MODEL)
    p["ff_w1"], p["ff_b1"] = lin(ks[8], D_MODEL, D_FF)
    p["ff_w2"], p["ff_b2"] = lin(ks[9], D_FF, D_MODEL)
    for i in range(3):
        p[f"ln_g{i}"] = jnp.ones((D_MODEL,), jnp.float32)
        p[f"ln_b{i}"] = jnp.zeros((D_MODEL,), jnp.float32)
    return p


def pack_params(p):
    """One-time layout transform (outside jit): fuse QKV / KV projections, fold the
    1/sqrt(d_k) attention scale into the Q projections, and pack every weight, bias
    and LayerNorm vector into ONE [PACK_ROWS, PACK_LANES] f32 slab (one DMA ~ 22)."""
    scale = 1.0 / math.sqrt(D_K)
    sa_wqkv = jnp.concatenate([p["sa_q_w"] * scale, p["sa_k_w"], p["sa_v_w"]], axis=1)
    sa_bqkv = jnp.concatenate([p["sa_q_b"] * scale, p["sa_k_b"], p["sa_v_b"]], axis=0)
    ca_wkv = jnp.concatenate([p["ca_k_w"], p["ca_v_w"]], axis=1)
    ca_bkv = jnp.concatenate([p["ca_k_b"], p["ca_v_b"]], axis=0)

    wband = jnp.concatenate(
        [sa_wqkv, p["sa_o_w"], p["ca_q_w"] * scale, ca_wkv, p["ca_o_w"], p["ff_w1"]],
        axis=1)                                                   # [D, 8D+FF]

    slab = jnp.zeros((PACK_ROWS, PACK_LANES), jnp.float32)
    slab = slab.at[0:D_MODEL, :].set(wband)
    slab = slab.at[R_W2:R_W2 + D_FF, 0:D_MODEL].set(p["ff_w2"])
    vec_rows = [sa_bqkv, p["sa_o_b"], p["ca_q_b"] * scale, ca_bkv, p["ca_o_b"],
                p["ff_b1"], p["ff_b2"],
                p["ln_g0"], p["ln_g1"], p["ln_g2"],
                p["ln_b0"], p["ln_b1"], p["ln_b2"]]
    for i, v in enumerate(vec_rows):
        slab = slab.at[R_VEC + i, 0:v.shape[0]].set(v)
    return slab


# --------------------------- pure-JAX reference model --------------------------
def decoder_layer_ref(x, memory, src_mask, tgt_mask, p):
    def ln(v, g, b):
        mean = jnp.mean(v, -1, keepdims=True)
        var = jnp.sum((v - mean) ** 2, -1, keepdims=True) / (v.shape[-1] - 1)
        return g * (v - mean) / (jnp.sqrt(var) + EPS) + b

    def mha(q_in, k_in, v_in, mask, pre):
        q = q_in @ p[f"{pre}_q_w"] + p[f"{pre}_q_b"]
        k = k_in @ p[f"{pre}_k_w"] + p[f"{pre}_k_b"]
        v = v_in @ p[f"{pre}_v_w"] + p[f"{pre}_v_b"]
        def split(t):
            bt, st, _ = t.shape
            return t.reshape(bt, st, N_HEADS, D_K).transpose(0, 2, 1, 3)
        qh, kh, vh = split(q), split(k), split(v)
        s = jnp.einsum("bhqd,bhkd->bhqk", qh, kh) / math.sqrt(D_K)
        s = jnp.where(mask == 0, -1e9, s)        # mask (B,1,Sq,Sk) broadcasts over heads
        a = jax.nn.softmax(s, axis=-1)
        ctx = jnp.einsum("bhqk,bhkd->bhqd", a, vh).transpose(0, 2, 1, 3).reshape(q.shape)
        return ctx @ p[f"{pre}_o_w"] + p[f"{pre}_o_b"]

    xn = ln(x, p["ln_g0"], p["ln_b0"])
    x = x + mha(xn, xn, xn, tgt_mask, "sa")
    xn = ln(x, p["ln_g1"], p["ln_b1"])
    x = x + mha(xn, memory, memory, src_mask, "ca")
    xn = ln(x, p["ln_g2"], p["ln_b2"])
    h = jax.nn.relu(xn @ p["ff_w1"] + p["ff_b1"])
    return x + h @ p["ff_w2"] + p["ff_b2"]


# ------------------------------------ main ------------------------------------
if __name__ == "__main__":
    jax.config.update("jax_default_matmul_precision", "highest")

    key = jax.random.PRNGKey(0)
    k_x, k_m, k_p = jax.random.split(key, 3)

    x = jax.random.normal(k_x, (B, S_TGT, D_MODEL), jnp.float32)          # decoder input
    memory = jax.random.normal(k_m, (B, S_SRC, D_MODEL), jnp.float32)      # encoder states
    params = init_params(k_p)
    w_slab = pack_params(params)        # one-time packing, outside jit

    # tgt_mask: causal (subsequent) mask; src_mask: all visible. 1.0 = keep, 0.0 = masked.
    tgt_mask = jnp.broadcast_to(
        jnp.tril(jnp.ones((S_TGT, S_TGT), jnp.float32))[None, None], (B, 1, S_TGT, S_TGT))
    src_mask = jnp.ones((B, 1, S_TGT, S_SRC), jnp.float32)

    fwd = jax.jit(decoder_layer)
    out = fwd(x, memory, src_mask, tgt_mask, w_slab)
    jax.block_until_ready(out)
    assert out.shape == (B, S_TGT, D_MODEL)

    ref = decoder_layer_ref(x, memory, src_mask, tgt_mask, params)
    max_err = float(jnp.max(jnp.abs(out - ref)))
    assert jnp.allclose(out, ref, atol=2e-2, rtol=2e-2), f"max_err={max_err}"
    print("KERNEL_OK")
</pallas_src>

<mosaic_0001>
module attributes {stable_mosaic.version = 11 : i64} {
  func.func @decoder_layer_kernel(%arg0: memref<16x32xf32, #tpu.memory_space<vmem>>, %arg1: memref<16x32xf32, #tpu.memory_space<vmem>>, %arg2: memref<2x8x8xf32, #tpu.memory_space<vmem>>, %arg3: memref<2x8x8xf32, #tpu.memory_space<vmem>>, %arg4: memref<109x320xf32, #tpu.memory_space<vmem>>, %arg5: memref<16x32xf32, #tpu.memory_space<vmem>>) attributes {dimension_semantics = [], scalar_prefetch = 0 : i64, scratch_operands = 0 : i64, tpu.core_type = #tpu.core_type<tc>} {
    %c0 = arith.constant 0 : index
    %c0_0 = arith.constant 0 : index
    %0 = vector.load %arg0[%c0, %c0_0] : memref<16x32xf32, #tpu.memory_space<vmem>>, vector<16x32xf32>
    %c0_1 = arith.constant 0 : index
    %c0_2 = arith.constant 0 : index
    %1 = vector.load %arg1[%c0_1, %c0_2] : memref<16x32xf32, #tpu.memory_space<vmem>>, vector<16x32xf32>
    %c0_3 = arith.constant 0 : index
    %c0_4 = arith.constant 0 : index
    %2 = vector.load %arg4[%c0_3, %c0_4] : memref<109x320xf32, #tpu.memory_space<vmem>>, vector<32x320xf32>
    %3 = vector.extract_strided_slice %2 {offsets = [0, 0], sizes = [32, 96], strides = [1, 1]} : vector<32x320xf32> to vector<32x96xf32>
    %4 = vector.extract_strided_slice %2 {offsets = [0, 96], sizes = [32, 32], strides = [1, 1]} : vector<32x320xf32> to vector<32x32xf32>
    %5 = vector.extract_strided_slice %2 {offsets = [0, 128], sizes = [32, 32], strides = [1, 1]} : vector<32x320xf32> to vector<32x32xf32>
    %6 = vector.extract_strided_slice %2 {offsets = [0, 160], sizes = [32, 64], strides = [1, 1]} : vector<32x320xf32> to vector<32x64xf32>
    %7 = vector.extract_strided_slice %2 {offsets = [0, 224], sizes = [32, 32], strides = [1, 1]} : vector<32x320xf32> to vector<32x32xf32>
    %8 = vector.extract_strided_slice %2 {offsets = [0, 256], sizes = [32, 64], strides = [1, 1]} : vector<32x320xf32> to vector<32x64xf32>
    %c32 = arith.constant 32 : index
    %c0_5 = arith.constant 0 : index
    %9 = vector.load %arg4[%c32, %c0_5] : memref<109x320xf32, #tpu.memory_space<vmem>>, vector<64x32xf32>
    %c96 = arith.constant 96 : index
    %c0_6 = arith.constant 0 : index
    %10 = vector.load %arg4[%c96, %c0_6] : memref<109x320xf32, #tpu.memory_space<vmem>>, vector<13x320xf32>
    %11 = vector.extract_strided_slice %10 {offsets = [0, 0], sizes = [1, 96], strides = [1, 1]} : vector<13x320xf32> to vector<1x96xf32>
    %12 = vector.extract_strided_slice %10 {offsets = [1, 0], sizes = [1, 32], strides = [1, 1]} : vector<13x320xf32> to vector<1x32xf32>
    %13 = vector.extract_strided_slice %10 {offsets = [2, 0], sizes = [1, 32], strides = [1, 1]} : vector<13x320xf32> to vector<1x32xf32>
    %14 = vector.extract_strided_slice %10 {offsets = [3, 0], sizes = [1, 64], strides = [1, 1]} : vector<13x320xf32> to vector<1x64xf32>
    %15 = vector.extract_strided_slice %10 {offsets = [4, 0], sizes = [1, 32], strides = [1, 1]} : vector<13x320xf32> to vector<1x32xf32>
    %16 = vector.extract_strided_slice %10 {offsets = [5, 0], sizes = [1, 64], strides = [1, 1]} : vector<13x320xf32> to vector<1x64xf32>
    %17 = vector.extract_strided_slice %10 {offsets = [6, 0], sizes = [1, 32], strides = [1, 1]} : vector<13x320xf32> to vector<1x32xf32>
    %18 = vector.extract_strided_slice %10 {offsets = [7, 0], sizes = [3, 32], strides = [1, 1]} : vector<13x320xf32> to vector<3x32xf32>
    %19 = vector.extract_strided_slice %10 {offsets = [10, 0], sizes = [3, 32], strides = [1, 1]} : vector<13x320xf32> to vector<3x32xf32>
    %20 = vector.extract_strided_slice %18 {offsets = [0, 0], sizes = [1, 32], strides = [1, 1]} : vector<3x32xf32> to vector<1x32xf32>
    %21 = vector.extract_strided_slice %19 {offsets = [0, 0], sizes = [1, 32], strides = [1, 1]} : vector<3x32xf32> to vector<1x32xf32>
    %cst = arith.constant dense<0.000000e+00> : vector<16xf32>
    %22 = vector.multi_reduction <add>, %0, %cst [1] : vector<16x32xf32> to vector<16xf32>
    %23 = vector.shape_cast %22 : vector<16xf32> to vector<16x1xf32>
    %cst_7 = arith.constant 3.200000e+01 : f32
    %24 = vector.broadcast %cst_7 : f32 to vector<16x1xf32>
    %25 = arith.divf %23, %24 : vector<16x1xf32>
    %26 = vector.broadcast %25 : vector<16x1xf32> to vector<16x32xf32>
    %27 = arith.subf %0, %26 : vector<16x32xf32>
    %28 = arith.mulf %27, %27 : vector<16x32xf32>
    %cst_8 = arith.constant dense<0.000000e+00> : vector<16xf32>
    %29 = vector.multi_reduction <add>, %28, %cst_8 [1] : vector<16x32xf32> to vector<16xf32>
    %30 = vector.shape_cast %29 : vector<16xf32> to vector<16x1xf32>
    %cst_9 = arith.constant 0.0322580636 : f32
    %31 = vector.broadcast %cst_9 : f32 to vector<16x1xf32>
    %32 = arith.mulf %30, %31 : vector<16x1xf32>
    %33 = math.sqrt %32 : vector<16x1xf32>
    %cst_10 = arith.constant 9.99999997E-7 : f32
    %34 = vector.broadcast %cst_10 : f32 to vector<16x1xf32>
    %35 = arith.addf %33, %34 : vector<16x1xf32>
    %36 = vector.broadcast %35 : vector<16x1xf32> to vector<16x32xf32>
    %37 = arith.divf %27, %36 : vector<16x32xf32>
    %38 = vector.broadcast %20 : vector<1x32xf32> to vector<16x32xf32>
    %39 = arith.mulf %37, %38 : vector<16x32xf32>
    %40 = vector.broadcast %21 : vector<1x32xf32> to vector<16x32xf32>
    %41 = arith.addf %39, %40 : vector<16x32xf32>
    %cst_11 = arith.constant dense<0.000000e+00> : vector<16x96xf32>
    %42 = tpu.matmul %41, %3, %cst_11 {dimension_numbers = #tpu.dot_dimension_numbers<[1], [0], [0], [1], [0, 0, 1, 1], [], []>, precision = #tpu.contract_precision<fp32>} : vector<16x32xf32>, vector<32x96xf32>, vector<16x96xf32> -> vector<16x96xf32>
    %43 = vector.broadcast %11 : vector<1x96xf32> to vector<16x96xf32>
    %44 = arith.addf %42, %43 : vector<16x96xf32>
    %45 = vector.extract_strided_slice %44 {offsets = [0, 0], sizes = [16, 32], strides = [1, 1]} : vector<16x96xf32> to vector<16x32xf32>
    %46 = vector.extract_strided_slice %44 {offsets = [0, 32], sizes = [16, 32], strides = [1, 1]} : vector<16x96xf32> to vector<16x32xf32>
    %47 = vector.extract_strided_slice %44 {offsets = [0, 64], sizes = [16, 32], strides = [1, 1]} : vector<16x96xf32> to vector<16x32xf32>
    %c0_12 = arith.constant 0 : index
    %c0_13 = arith.constant 0 : index
    %c0_14 = arith.constant 0 : index
    %48 = vector.load %arg2[%c0_12, %c0_13, %c0_14] : memref<2x8x8xf32, #tpu.memory_space<vmem>>, vector<2x8x8xf32>
    %49 = vector.extract_strided_slice %45 {offsets = [0, 0], sizes = [8, 32], strides = [1, 1]} : vector<16x32xf32> to vector<8x32xf32>
    %50 = vector.extract_strided_slice %46 {offsets = [0, 0], sizes = [8, 32], strides = [1, 1]} : vector<16x32xf32> to vector<8x32xf32>
    %51 = vector.extract_strided_slice %47 {offsets = [0, 0], sizes = [8, 32], strides = [1, 1]} : vector<16x32xf32> to vector<8x32xf32>
    %52 = vector.extract_strided_slice %48 {offsets = [0, 0, 0], sizes = [1, 8, 8], strides = [1, 1, 1]} : vector<2x8x8xf32> to vector<1x8x8xf32>
    %53 = vector.shape_cast %52 : vector<1x8x8xf32> to vector<8x8xf32>
    %cst_15 = arith.constant 0.000000e+00 : f32
    %54 = vector.broadcast %cst_15 : f32 to vector<8x8xf32>
    %55 = arith.cmpf oeq, %53, %54 : vector<8x8xf32>
    %cst_16 = arith.constant -1.000000e+09 : f32
    %cst_17 = arith.constant 0.000000e+00 : f32
    %56 = vector.broadcast %cst_16 : f32 to vector<8x8xf32>
    %57 = vector.broadcast %cst_17 : f32 to vector<8x8xf32>
    %58 = arith.select %55, %56, %57 : vector<8x8xi1>, vector<8x8xf32>
    %cst_18 = arith.constant 0.000000e+00 : f32
    %59 = vector.broadcast %cst_18 : f32 to vector<8x32xf32>
    %60 = vector.extract_strided_slice %49 {offsets = [0, 0], sizes = [8, 8], strides = [1, 1]} : vector<8x32xf32> to vector<8x8xf32>
    %61 = vector.extract_strided_slice %50 {offsets = [0, 0], sizes = [8, 8], strides = [1, 1]} : vector<8x32xf32> to vector<8x8xf32>
    %cst_19 = arith.constant dense<0.000000e+00> : vector<8x8xf32>
    %62 = tpu.matmul %60, %61, %cst_19 {dimension_numbers = #tpu.dot_dimension_numbers<[1], [1], [0], [0], [0, 0, 1, 0], [], []>, precision = #tpu.contract_precision<fp32>} : vector<8x8xf32>, vector<8x8xf32>, vector<8x8xf32> -> vector<8x8xf32>
    %63 = arith.addf %62, %58 : vector<8x8xf32>
    %cst_20 = arith.constant dense<0xFF800000> : vector<8xf32>
    %64 = vector.multi_reduction <maximumf>, %63, %cst_20 [1] : vector<8x8xf32> to vector<8xf32>
    %65 = vector.shape_cast %64 : vector<8xf32> to vector<8x1xf32>
    %66 = vector.broadcast %65 : vector<8x1xf32> to vector<8x8xf32>
    %67 = arith.subf %63, %66 : vector<8x8xf32>
    %68 = math.exp %67 : vector<8x8xf32>
    %cst_21 = arith.constant dense<0.000000e+00> : vector<8xf32>
    %69 = vector.multi_reduction <add>, %68, %cst_21 [1] : vector<8x8xf32> to vector<8xf32>
    %70 = vector.shape_cast %69 : vector<8xf32> to vector<8x1xf32>
    %71 = tpu.reciprocal %70 {approx = true} : vector<8x1xf32> -> vector<8x1xf32>
    %72 = vector.broadcast %71 : vector<8x1xf32> to vector<8x8xf32>
    %73 = arith.mulf %68, %72 : vector<8x8xf32>
    %74 = vector.extract_strided_slice %51 {offsets = [0, 0], sizes = [8, 8], strides = [1, 1]} : vector<8x32xf32> to vector<8x8xf32>
    %cst_22 = arith.constant dense<0.000000e+00> : vector<8x8xf32>
    %75 = tpu.matmul %73, %74, %cst_22 {dimension_numbers = #tpu.dot_dimension_numbers<[1], [0], [0], [1], [0, 0, 1, 1], [], []>, precision = #tpu.contract_precision<fp32>} : vector<8x8xf32>, vector<8x8xf32>, vector<8x8xf32> -> vector<8x8xf32>
    %76 = vector.extract_strided_slice %4 {offsets = [0, 0], sizes = [8, 32], strides = [1, 1]} : vector<32x32xf32> to vector<8x32xf32>
    %cst_23 = arith.constant dense<0.000000e+00> : vector<8x32xf32>
    %77 = tpu.matmul %75, %76, %cst_23 {dimension_numbers = #tpu.dot_dimension_numbers<[1], [0], [0], [1], [0, 0, 1, 1], [], []>, precision = #tpu.contract_precision<fp32>} : vector<8x8xf32>, vector<8x32xf32>, vector<8x32xf32> -> vector<8x32xf32>
    %78 = arith.addf %59, %77 : vector<8x32xf32>
    %79 = vector.extract_strided_slice %49 {offsets = [0, 8], sizes = [8, 8], strides = [1, 1]} : vector<8x32xf32> to vector<8x8xf32>
    %80 = vector.extract_strided_slice %50 {offsets = [0, 8], sizes = [8, 8], strides = [1, 1]} : vector<8x32xf32> to vector<8x8xf32>
    %cst_24 = arith.constant dense<0.000000e+00> : vector<8x8xf32>
    %81 = tpu.matmul %79, %80, %cst_24 {dimension_numbers = #tpu.dot_dimension_numbers<[1], [1], [0], [0], [0, 0, 1, 0], [], []>, precision = #tpu.contract_precision<fp32>} : vector<8x8xf32>, vector<8x8xf32>, vector<8x8xf32> -> vector<8x8xf32>
    %82 = arith.addf %81, %58 : vector<8x8xf32>
    %cst_25 = arith.constant dense<0xFF800000> : vector<8xf32>
    %83 = vector.multi_reduction <maximumf>, %82, %cst_25 [1] : vector<8x8xf32> to vector<8xf32>
    %84 = vector.shape_cast %83 : vector<8xf32> to vector<8x1xf32>
    %85 = vector.broadcast %84 : vector<8x1xf32> to vector<8x8xf32>
    %86 = arith.subf %82, %85 : vector<8x8xf32>
    %87 = math.exp %86 : vector<8x8xf32>
    %cst_26 = arith.constant dense<0.000000e+00> : vector<8xf32>
    %88 = vector.multi_reduction <add>, %87, %cst_26 [1] : vector<8x8xf32> to vector<8xf32>
    %89 = vector.shape_cast %88 : vector<8xf32> to vector<8x1xf32>
    %90 = tpu.reciprocal %89 {approx = true} : vector<8x1xf32> -> vector<8x1xf32>
    %91 = vector.broadcast %90 : vector<8x1xf32> to vector<8x8xf32>
    %92 = arith.mulf %87, %91 : vector<8x8xf32>
    %93 = vector.extract_strided_slice %51 {offsets = [0, 8], sizes = [8, 8], strides = [1, 1]} : vector<8x32xf32> to vector<8x8xf32>
    %cst_27 = arith.constant dense<0.000000e+00> : vector<8x8xf32>
    %94 = tpu.matmul %92, %93, %cst_27 {dimension_numbers = #tpu.dot_dimension_numbers<[1], [0], [0], [1], [0, 0, 1, 1], [], []>, precision = #tpu.contract_precision<fp32>} : vector<8x8xf32>, vector<8x8xf32>, vector<8x8xf32> -> vector<8x8xf32>
    %95 = vector.extract_strided_slice %4 {offsets = [8, 0], sizes = [8, 32], strides = [1, 1]} : vector<32x32xf32> to vector<8x32xf32>
    %cst_28 = arith.constant dense<0.000000e+00> : vector<8x32xf32>
    %96 = tpu.matmul %94, %95, %cst_28 {dimension_numbers = #tpu.dot_dimension_numbers<[1], [0], [0], [1], [0, 0, 1, 1], [], []>, precision = #tpu.contract_precision<fp32>} : vector<8x8xf32>, vector<8x32xf32>, vector<8x32xf32> -> vector<8x32xf32>
    %97 = arith.addf %78, %96 : vector<8x32xf32>
    %98 = vector.extract_strided_slice %49 {offsets = [0, 16], sizes = [8, 8], strides = [1, 1]} : vector<8x32xf32> to vector<8x8xf32>
    %99 = vector.extract_strided_slice %50 {offsets = [0, 16], sizes = [8, 8], strides = [1, 1]} : vector<8x32xf32> to vector<8x8xf32>
    %cst_29 = arith.constant dense<0.000000e+00> : vector<8x8xf32>
    %100 = tpu.matmul %98, %99, %cst_29 {dimension_numbers = #tpu.dot_dimension_numbers<[1], [1], [0], [0], [0, 0, 1, 0], [], []>, precision = #tpu.contract_precision<fp32>} : vector<8x8xf32>, vector<8x8xf32>, vector<8x8xf32> -> vector<8x8xf32>
    %101 = arith.addf %100, %58 : vector<8x8xf32>
    %cst_30 = arith.constant dense<0xFF800000> : vector<8xf32>
    %102 = vector.multi_reduction <maximumf>, %101, %cst_30 [1] : vector<8x8xf32> to vector<8xf32>
    %103 = vector.shape_cast %102 : vector<8xf32> to vector<8x1xf32>
    %104 = vector.broadcast %103 : vector<8x1xf32> to vector<8x8xf32>
    %105 = arith.subf %101, %104 : vector<8x8xf32>
    %106 = math.exp %105 : vector<8x8xf32>
    %cst_31 = arith.constant dense<0.000000e+00> : vector<8xf32>
    %107 = vector.multi_reduction <add>, %106, %cst_31 [1] : vector<8x8xf32> to vector<8xf32>
    %108 = vector.shape_cast %107 : vector<8xf32> to vector<8x1xf32>
    %109 = tpu.reciprocal %108 {approx = true} : vector<8x1xf32> -> vector<8x1xf32>
    %110 = vector.broadcast %109 : vector<8x1xf32> to vector<8x8xf32>
    %111 = arith.mulf %106, %110 : vector<8x8xf32>
    %112 = vector.extract_strided_slice %51 {offsets = [0, 16], sizes = [8, 8], strides = [1, 1]} : vector<8x32xf32> to vector<8x8xf32>
    %cst_32 = arith.constant dense<0.000000e+00> : vector<8x8xf32>
    %113 = tpu.matmul %111, %112, %cst_32 {dimension_numbers = #tpu.dot_dimension_numbers<[1], [0], [0], [1], [0, 0, 1, 1], [], []>, precision = #tpu.contract_precision<fp32>} : vector<8x8xf32>, vector<8x8xf32>, vector<8x8xf32> -> vector<8x8xf32>
    %114 = vector.extract_strided_slice %4 {offsets = [16, 0], sizes = [8, 32], strides = [1, 1]} : vector<32x32xf32> to vector<8x32xf32>
    %cst_33 = arith.constant dense<0.000000e+00> : vector<8x32xf32>
    %115 = tpu.matmul %113, %114, %cst_33 {dimension_numbers = #tpu.dot_dimension_numbers<[1], [0], [0], [1], [0, 0, 1, 1], [], []>, precision = #tpu.contract_precision<fp32>} : vector<8x8xf32>, vector<8x32xf32>, vector<8x32xf32> -> vector<8x32xf32>
    %116 = arith.addf %97, %115 : vector<8x32xf32>
    %117 = vector.extract_strided_slice %49 {offsets = [0, 24], sizes = [8, 8], strides = [1, 1]} : vector<8x32xf32> to vector<8x8xf32>
    %118 = vector.extract_strided_slice %50 {offsets = [0, 24], sizes = [8, 8], strides = [1, 1]} : vector<8x32xf32> to vector<8x8xf32>
    %cst_34 = arith.constant dense<0.000000e+00> : vector<8x8xf32>
    %119 = tpu.matmul %117, %118, %cst_34 {dimension_numbers = #tpu.dot_dimension_numbers<[1], [1], [0], [0], [0, 0, 1, 0], [], []>, precision = #tpu.contract_precision<fp32>} : vector<8x8xf32>, vector<8x8xf32>, vector<8x8xf32> -> vector<8x8xf32>
    %120 = arith.addf %119, %58 : vector<8x8xf32>
    %cst_35 = arith.constant dense<0xFF800000> : vector<8xf32>
    %121 = vector.multi_reduction <maximumf>, %120, %cst_35 [1] : vector<8x8xf32> to vector<8xf32>
    %122 = vector.shape_cast %121 : vector<8xf32> to vector<8x1xf32>
    %123 = vector.broadcast %122 : vector<8x1xf32> to vector<8x8xf32>
    %124 = arith.subf %120, %123 : vector<8x8xf32>
    %125 = math.exp %124 : vector<8x8xf32>
    %cst_36 = arith.constant dense<0.000000e+00> : vector<8xf32>
    %126 = vector.multi_reduction <add>, %125, %cst_36 [1] : vector<8x8xf32> to vector<8xf32>
    %127 = vector.shape_cast %126 : vector<8xf32> to vector<8x1xf32>
    %128 = tpu.reciprocal %127 {approx = true} : vector<8x1xf32> -> vector<8x1xf32>
    %129 = vector.broadcast %128 : vector<8x1xf32> to vector<8x8xf32>
    %130 = arith.mulf %125, %129 : vector<8x8xf32>
    %131 = vector.extract_strided_slice %51 {offsets = [0, 24], sizes = [8, 8], strides = [1, 1]} : vector<8x32xf32> to vector<8x8xf32>
    %cst_37 = arith.constant dense<0.000000e+00> : vector<8x8xf32>
    %132 = tpu.matmul %130, %131, %cst_37 {dimension_numbers = #tpu.dot_dimension_numbers<[1], [0], [0], [1], [0, 0, 1, 1], [], []>, precision = #tpu.contract_precision<fp32>} : vector<8x8xf32>, vector<8x8xf32>, vector<8x8xf32> -> vector<8x8xf32>
    %133 = vector.extract_strided_slice %4 {offsets = [24, 0], sizes = [8, 32], strides = [1, 1]} : vector<32x32xf32> to vector<8x32xf32>
    %cst_38 = arith.constant dense<0.000000e+00> : vector<8x32xf32>
    %134 = tpu.matmul %132, %133, %cst_38 {dimension_numbers = #tpu.dot_dimension_numbers<[1], [0], [0], [1], [0, 0, 1, 1], [], []>, precision = #tpu.contract_precision<fp32>} : vector<8x8xf32>, vector<8x32xf32>, vector<8x32xf32> -> vector<8x32xf32>
    %135 = arith.addf %116, %134 : vector<8x32xf32>
    %136 = vector.extract_strided_slice %45 {offsets = [8, 0], sizes = [8, 32], strides = [1, 1]} : vector<16x32xf32> to vector<8x32xf32>
    %137 = vector.extract_strided_slice %46 {offsets = [8, 0], sizes = [8, 32], strides = [1, 1]} : vector<16x32xf32> to vector<8x32xf32>
    %138 = vector.extract_strided_slice %47 {offsets = [8, 0], sizes = [8, 32], strides = [1, 1]} : vector<16x32xf32> to vector<8x32xf32>
    %139 = vector.extract_strided_slice %48 {offsets = [1, 0, 0], sizes = [1, 8, 8], strides = [1, 1, 1]} : vector<2x8x8xf32> to vector<1x8x8xf32>
    %140 = vector.shape_cast %139 : vector<1x8x8xf32> to vector<8x8xf32>
    %cst_39 = arith.constant 0.000000e+00 : f32
    %141 = vector.broadcast %cst_39 : f32 to vector<8x8xf32>
    %142 = arith.cmpf oeq, %140, %141 : vector<8x8xf32>
    %cst_40 = arith.constant -1.000000e+09 : f32
    %cst_41 = arith.constant 0.000000e+00 : f32
    %143 = vector.broadcast %cst_40 : f32 to vector<8x8xf32>
    %144 = vector.broadcast %cst_41 : f32 to vector<8x8xf32>
    %145 = arith.select %142, %143, %144 : vector<8x8xi1>, vector<8x8xf32>
    %cst_42 = arith.constant 0.000000e+00 : f32
    %146 = vector.broadcast %cst_42 : f32 to vector<8x32xf32>
    %147 = vector.extract_strided_slice %136 {offsets = [0, 0], sizes = [8, 8], strides = [1, 1]} : vector<8x32xf32> to vector<8x8xf32>
    %148 = vector.extract_strided_slice %137 {offsets = [0, 0], sizes = [8, 8], strides = [1, 1]} : vector<8x32xf32> to vector<8x8xf32>
    %cst_43 = arith.constant dense<0.000000e+00> : vector<8x8xf32>
    %149 = tpu.matmul %147, %148, %cst_43 {dimension_numbers = #tpu.dot_dimension_numbers<[1], [1], [0], [0], [0, 0, 1, 0], [], []>, precision = #tpu.contract_precision<fp32>} : vector<8x8xf32>, vector<8x8xf32>, vector<8x8xf32> -> vector<8x8xf32>
    %150 = arith.addf %149, %145 : vector<8x8xf32>
    %cst_44 = arith.constant dense<0xFF800000> : vector<8xf32>
    %151 = vector.multi_reduction <maximumf>, %150, %cst_44 [1] : vector<8x8xf32> to vector<8xf32>
    %152 = vector.shape_cast %151 : vector<8xf32> to vector<8x1xf32>
    %153 = vector.broadcast %152 : vector<8x1xf32> to vector<8x8xf32>
    %154 = arith.subf %150, %153 : vector<8x8xf32>
    %155 = math.exp %154 : vector<8x8xf32>
    %cst_45 = arith.constant dense<0.000000e+00> : vector<8xf32>
    %156 = vector.multi_reduction <add>, %155, %cst_45 [1] : vector<8x8xf32> to vector<8xf32>
    %157 = vector.shape_cast %156 : vector<8xf32> to vector<8x1xf32>
    %158 = tpu.reciprocal %157 {approx = true} : vector<8x1xf32> -> vector<8x1xf32>
    %159 = vector.broadcast %158 : vector<8x1xf32> to vector<8x8xf32>
    %160 = arith.mulf %155, %159 : vector<8x8xf32>
    %161 = vector.extract_strided_slice %138 {offsets = [0, 0], sizes = [8, 8], strides = [1, 1]} : vector<8x32xf32> to vector<8x8xf32>
    %cst_46 = arith.constant dense<0.000000e+00> : vector<8x8xf32>
    %162 = tpu.matmul %160, %161, %cst_46 {dimension_numbers = #tpu.dot_dimension_numbers<[1], [0], [0], [1], [0, 0, 1, 1], [], []>, precision = #tpu.contract_precision<fp32>} : vector<8x8xf32>, vector<8x8xf32>, vector<8x8xf32> -> vector<8x8xf32>
    %163 = vector.extract_strided_slice %4 {offsets = [0, 0], sizes = [8, 32], strides = [1, 1]} : vector<32x32xf32> to vector<8x32xf32>
    %cst_47 = arith.constant dense<0.000000e+00> : vector<8x32xf32>
    %164 = tpu.matmul %162, %163, %cst_47 {dimension_numbers = #tpu.dot_dimension_numbers<[1], [0], [0], [1], [0, 0, 1, 1], [], []>, precision = #tpu.contract_precision<fp32>} : vector<8x8xf32>, vector<8x32xf32>, vector<8x32xf32> -> vector<8x32xf32>
    %165 = arith.addf %146, %164 : vector<8x32xf32>
    %166 = vector.extract_strided_slice %136 {offsets = [0, 8], sizes = [8, 8], strides = [1, 1]} : vector<8x32xf32> to vector<8x8xf32>
    %167 = vector.extract_strided_slice %137 {offsets = [0, 8], sizes = [8, 8], strides = [1, 1]} : vector<8x32xf32> to vector<8x8xf32>
    %cst_48 = arith.constant dense<0.000000e+00> : vector<8x8xf32>
    %168 = tpu.matmul %166, %167, %cst_48 {dimension_numbers = #tpu.dot_dimension_numbers<[1], [1], [0], [0], [0, 0, 1, 0], [], []>, precision = #tpu.contract_precision<fp32>} : vector<8x8xf32>, vector<8x8xf32>, vector<8x8xf32> -> vector<8x8xf32>
    %169 = arith.addf %168, %145 : vector<8x8xf32>
    %cst_49 = arith.constant dense<0xFF800000> : vector<8xf32>
    %170 = vector.multi_reduction <maximumf>, %169, %cst_49 [1] : vector<8x8xf32> to vector<8xf32>
    %171 = vector.shape_cast %170 : vector<8xf32> to vector<8x1xf32>
    %172 = vector.broadcast %171 : vector<8x1xf32> to vector<8x8xf32>
    %173 = arith.subf %169, %172 : vector<8x8xf32>
    %174 = math.exp %173 : vector<8x8xf32>
    %cst_50 = arith.constant dense<0.000000e+00> : vector<8xf32>
    %175 = vector.multi_reduction <add>, %174, %cst_50 [1] : vector<8x8xf32> to vector<8xf32>
    %176 = vector.shape_cast %175 : vector<8xf32> to vector<8x1xf32>
    %177 = tpu.reciprocal %176 {approx = true} : vector<8x1xf32> -> vector<8x1xf32>
    %178 = vector.broadcast %177 : vector<8x1xf32> to vector<8x8xf32>
    %179 = arith.mulf %174, %178 : vector<8x8xf32>
    %180 = vector.extract_strided_slice %138 {offsets = [0, 8], sizes = [8, 8], strides = [1, 1]} : vector<8x32xf32> to vector<8x8xf32>
    %cst_51 = arith.constant dense<0.000000e+00> : vector<8x8xf32>
    %181 = tpu.matmul %179, %180, %cst_51 {dimension_numbers = #tpu.dot_dimension_numbers<[1], [0], [0], [1], [0, 0, 1, 1], [], []>, precision = #tpu.contract_precision<fp32>} : vector<8x8xf32>, vector<8x8xf32>, vector<8x8xf32> -> vector<8x8xf32>
    %182 = vector.extract_strided_slice %4 {offsets = [8, 0], sizes = [8, 32], strides = [1, 1]} : vector<32x32xf32> to vector<8x32xf32>
    %cst_52 = arith.constant dense<0.000000e+00> : vector<8x32xf32>
    %183 = tpu.matmul %181, %182, %cst_52 {dimension_numbers = #tpu.dot_dimension_numbers<[1], [0], [0], [1], [0, 0, 1, 1], [], []>, precision = #tpu.contract_precision<fp32>} : vector<8x8xf32>, vector<8x32xf32>, vector<8x32xf32> -> vector<8x32xf32>
    %184 = arith.addf %165, %183 : vector<8x32xf32>
    %185 = vector.extract_strided_slice %136 {offsets = [0, 16], sizes = [8, 8], strides = [1, 1]} : vector<8x32xf32> to vector<8x8xf32>
    %186 = vector.extract_strided_slice %137 {offsets = [0, 16], sizes = [8, 8], strides = [1, 1]} : vector<8x32xf32> to vector<8x8xf32>
    %cst_53 = arith.constant dense<0.000000e+00> : vector<8x8xf32>
    %187 = tpu.matmul %185, %186, %cst_53 {dimension_numbers = #tpu.dot_dimension_numbers<[1], [1], [0], [0], [0, 0, 1, 0], [], []>, precision = #tpu.contract_precision<fp32>} : vector<8x8xf32>, vector<8x8xf32>, vector<8x8xf32> -> vector<8x8xf32>
    %188 = arith.addf %187, %145 : vector<8x8xf32>
    %cst_54 = arith.constant dense<0xFF800000> : vector<8xf32>
    %189 = vector.multi_reduction <maximumf>, %188, %cst_54 [1] : vector<8x8xf32> to vector<8xf32>
    %190 = vector.shape_cast %189 : vector<8xf32> to vector<8x1xf32>
    %191 = vector.broadcast %190 : vector<8x1xf32> to vector<8x8xf32>
    %192 = arith.subf %188, %191 : vector<8x8xf32>
    %193 = math.exp %192 : vector<8x8xf32>
    %cst_55 = arith.constant dense<0.000000e+00> : vector<8xf32>
    %194 = vector.multi_reduction <add>, %193, %cst_55 [1] : vector<8x8xf32> to vector<8xf32>
    %195 = vector.shape_cast %194 : vector<8xf32> to vector<8x1xf32>
    %196 = tpu.reciprocal %195 {approx = true} : vector<8x1xf32> -> vector<8x1xf32>
    %197 = vector.broadcast %196 : vector<8x1xf32> to vector<8x8xf32>
    %198 = arith.mulf %193, %197 : vector<8x8xf32>
    %199 = vector.extract_strided_slice %138 {offsets = [0, 16], sizes = [8, 8], strides = [1, 1]} : vector<8x32xf32> to vector<8x8xf32>
    %cst_56 = arith.constant dense<0.000000e+00> : vector<8x8xf32>
    %200 = tpu.matmul %198, %199, %cst_56 {dimension_numbers = #tpu.dot_dimension_numbers<[1], [0], [0], [1], [0, 0, 1, 1], [], []>, precision = #tpu.contract_precision<fp32>} : vector<8x8xf32>, vector<8x8xf32>, vector<8x8xf32> -> vector<8x8xf32>
    %201 = vector.extract_strided_slice %4 {offsets = [16, 0], sizes = [8, 32], strides = [1, 1]} : vector<32x32xf32> to vector<8x32xf32>
    %cst_57 = arith.constant dense<0.000000e+00> : vector<8x32xf32>
    %202 = tpu.matmul %200, %201, %cst_57 {dimension_numbers = #tpu.dot_dimension_numbers<[1], [0], [0], [1], [0, 0, 1, 1], [], []>, precision = #tpu.contract_precision<fp32>} : vector<8x8xf32>, vector<8x32xf32>, vector<8x32xf32> -> vector<8x32xf32>
    %203 = arith.addf %184, %202 : vector<8x32xf32>
    %204 = vector.extract_strided_slice %136 {offsets = [0, 24], sizes = [8, 8], strides = [1, 1]} : vector<8x32xf32> to vector<8x8xf32>
    %205 = vector.extract_strided_slice %137 {offsets = [0, 24], sizes = [8, 8], strides = [1, 1]} : vector<8x32xf32> to vector<8x8xf32>
    %cst_58 = arith.constant dense<0.000000e+00> : vector<8x8xf32>
    %206 = tpu.matmul %204, %205, %cst_58 {dimension_numbers = #tpu.dot_dimension_numbers<[1], [1], [0], [0], [0, 0, 1, 0], [], []>, precision = #tpu.contract_precision<fp32>} : vector<8x8xf32>, vector<8x8xf32>, vector<8x8xf32> -> vector<8x8xf32>
    %207 = arith.addf %206, %145 : vector<8x8xf32>
    %cst_59 = arith.constant dense<0xFF800000> : vector<8xf32>
    %208 = vector.multi_reduction <maximumf>, %207, %cst_59 [1] : vector<8x8xf32> to vector<8xf32>
    %209 = vector.shape_cast %208 : vector<8xf32> to vector<8x1xf32>
    %210 = vector.broadcast %209 : vector<8x1xf32> to vector<8x8xf32>
    %211 = arith.subf %207, %210 : vector<8x8xf32>
    %212 = math.exp %211 : vector<8x8xf32>
    %cst_60 = arith.constant dense<0.000000e+00> : vector<8xf32>
    %213 = vector.multi_reduction <add>, %212, %cst_60 [1] : vector<8x8xf32> to vector<8xf32>
    %214 = vector.shape_cast %213 : vector<8xf32> to vector<8x1xf32>
    %215 = tpu.reciprocal %214 {approx = true} : vector<8x1xf32> -> vector<8x1xf32>
    %216 = vector.broadcast %215 : vector<8x1xf32> to vector<8x8xf32>
    %217 = arith.mulf %212, %216 : vector<8x8xf32>
    %218 = vector.extract_strided_slice %138 {offsets = [0, 24], sizes = [8, 8], strides = [1, 1]} : vector<8x32xf32> to vector<8x8xf32>
    %cst_61 = arith.constant dense<0.000000e+00> : vector<8x8xf32>
    %219 = tpu.matmul %217, %218, %cst_61 {dimension_numbers = #tpu.dot_dimension_numbers<[1], [0], [0], [1], [0, 0, 1, 1], [], []>, precision = #tpu.contract_precision<fp32>} : vector<8x8xf32>, vector<8x8xf32>, vector<8x8xf32> -> vector<8x8xf32>
    %220 = vector.extract_strided_slice %4 {offsets = [24, 0], sizes = [8, 32], strides = [1, 1]} : vector<32x32xf32> to vector<8x32xf32>
    %cst_62 = arith.constant dense<0.000000e+00> : vector<8x32xf32>
    %221 = tpu.matmul %219, %220, %cst_62 {dimension_numbers = #tpu.dot_dimension_numbers<[1], [0], [0], [1], [0, 0, 1, 1], [], []>, precision = #tpu.contract_precision<fp32>} : vector<8x8xf32>, vector<8x32xf32>, vector<8x32xf32> -> vector<8x32xf32>
    %222 = arith.addf %203, %221 : vector<8x32xf32>
    %223 = tpu.concatenate %135, %222 in 0 : vector<8x32xf32>, vector<8x32xf32> -> vector<16x32xf32>
    %224 = vector.broadcast %12 : vector<1x32xf32> to vector<16x32xf32>
    %225 = arith.addf %223, %224 : vector<16x32xf32>
    %226 = arith.addf %0, %225 : vector<16x32xf32>
    %227 = vector.extract_strided_slice %18 {offsets = [1, 0], sizes = [1, 32], strides = [1, 1]} : vector<3x32xf32> to vector<1x32xf32>
    %228 = vector.extract_strided_slice %19 {offsets = [1, 0], sizes = [1, 32], strides = [1, 1]} : vector<3x32xf32> to vector<1x32xf32>
    %cst_63 = arith.constant dense<0.000000e+00> : vector<16xf32>
    %229 = vector.multi_reduction <add>, %226, %cst_63 [1] : vector<16x32xf32> to vector<16xf32>
    %230 = vector.shape_cast %229 : vector<16xf32> to vector<16x1xf32>
    %cst_64 = arith.constant 3.200000e+01 : f32
    %231 = vector.broadcast %cst_64 : f32 to vector<16x1xf32>
    %232 = arith.divf %230, %231 : vector<16x1xf32>
    %233 = vector.broadcast %232 : vector<16x1xf32> to vector<16x32xf32>
    %234 = arith.subf %226, %233 : vector<16x32xf32>
    %235 = arith.mulf %234, %234 : vector<16x32xf32>
    %cst_65 = arith.constant dense<0.000000e+00> : vector<16xf32>
    %236 = vector.multi_reduction <add>, %235, %cst_65 [1] : vector<16x32xf32> to vector<16xf32>
    %237 = vector.shape_cast %236 : vector<16xf32> to vector<16x1xf32>
    %cst_66 = arith.constant 0.0322580636 : f32
    %238 = vector.broadcast %cst_66 : f32 to vector<16x1xf32>
    %239 = arith.mulf %237, %238 : vector<16x1xf32>
    %240 = math.sqrt %239 : vector<16x1xf32>
    %cst_67 = arith.constant 9.99999997E-7 : f32
    %241 = vector.broadcast %cst_67 : f32 to vector<16x1xf32>
    %242 = arith.addf %240, %241 : vector<16x1xf32>
    %243 = vector.broadcast %242 : vector<16x1xf32> to vector<16x32xf32>
    %244 = arith.divf %234, %243 : vector<16x32xf32>
    %245 = vector.broadcast %227 : vector<1x32xf32> to vector<16x32xf32>
    %246 = arith.mulf %244, %245 : vector<16x32xf32>
    %247 = vector.broadcast %228 : vector<1x32xf32> to vector<16x32xf32>
    %248 = arith.addf %246, %247 : vector<16x32xf32>
    %cst_68 = arith.constant dense<0.000000e+00> : vector<16x32xf32>
    %249 = tpu.matmul %248, %5, %cst_68 {dimension_numbers = #tpu.dot_dimension_numbers<[1], [0], [0], [1], [0, 0, 1, 1], [], []>, precision = #tpu.contract_precision<fp32>} : vector<16x32xf32>, vector<32x32xf32>, vector<16x32xf32> -> vector<16x32xf32>
    %250 = vector.broadcast %13 : vector<1x32xf32> to vector<16x32xf32>
    %251 = arith.addf %249, %250 : vector<16x32xf32>
    %cst_69 = arith.constant dense<0.000000e+00> : vector<16x64xf32>
    %252 = tpu.matmul %1, %6, %cst_69 {dimension_numbers = #tpu.dot_dimension_numbers<[1], [0], [0], [1], [0, 0, 1, 1], [], []>, precision = #tpu.contract_precision<fp32>} : vector<16x32xf32>, vector<32x64xf32>, vector<16x64xf32> -> vector<16x64xf32>
    %253 = vector.broadcast %14 : vector<1x64xf32> to vector<16x64xf32>
    %254 = arith.addf %252, %253 : vector<16x64xf32>
    %255 = vector.extract_strided_slice %254 {offsets = [0, 0], sizes = [16, 32], strides = [1, 1]} : vector<16x64xf32> to vector<16x32xf32>
    %256 = vector.extract_strided_slice %254 {offsets = [0, 32], sizes = [16, 32], strides = [1, 1]} : vector<16x64xf32> to vector<16x32xf32>
    %c0_70 = arith.constant 0 : index
    %c0_71 = arith.constant 0 : index
    %c0_72 = arith.constant 0 : index
    %257 = vector.load %arg3[%c0_70, %c0_71, %c0_72] : memref<2x8x8xf32, #tpu.memory_space<vmem>>, vector<2x8x8xf32>
    %258 = vector.extract_strided_slice %251 {offsets = [0, 0], sizes = [8, 32], strides = [1, 1]} : vector<16x32xf32> to vector<8x32xf32>
    %259 = vector.extract_strided_slice %255 {offsets = [0, 0], sizes = [8, 32], strides = [1, 1]} : vector<16x32xf32> to vector<8x32xf32>
    %260 = vector.extract_strided_slice %256 {offsets = [0, 0], sizes = [8, 32], strides = [1, 1]} : vector<16x32xf32> to vector<8x32xf32>
    %261 = vector.extract_strided_slice %257 {offsets = [0, 0, 0], sizes = [1, 8, 8], strides = [1, 1, 1]} : vector<2x8x8xf32> to vector<1x8x8xf32>
    %262 = vector.shape_cast %261 : vector<1x8x8xf32> to vector<8x8xf32>
    %cst_73 = arith.constant 0.000000e+00 : f32
    %263 = vector.broadcast %cst_73 : f32 to vector<8x8xf32>
    %264 = arith.cmpf oeq, %262, %263 : vector<8x8xf32>
    %cst_74 = arith.constant -1.000000e+09 : f32
    %cst_75 = arith.constant 0.000000e+00 : f32
    %265 = vector.broadcast %cst_74 : f32 to vector<8x8xf32>
    %266 = vector.broadcast %cst_75 : f32 to vector<8x8xf32>
    %267 = arith.select %264, %265, %266 : vector<8x8xi1>, vector<8x8xf32>
    %cst_76 = arith.constant 0.000000e+00 : f32
    %268 = vector.broadcast %cst_76 : f32 to vector<8x32xf32>
    %269 = vector.extract_strided_slice %258 {offsets = [0, 0], sizes = [8, 8], strides = [1, 1]} : vector<8x32xf32> to vector<8x8xf32>
    %270 = vector.extract_strided_slice %259 {offsets = [0, 0], sizes = [8, 8], strides = [1, 1]} : vector<8x32xf32> to vector<8x8xf32>
    %cst_77 = arith.constant dense<0.000000e+00> : vector<8x8xf32>
    %271 = tpu.matmul %269, %270, %cst_77 {dimension_numbers = #tpu.dot_dimension_numbers<[1], [1], [0], [0], [0, 0, 1, 0], [], []>, precision = #tpu.contract_precision<fp32>} : vector<8x8xf32>, vector<8x8xf32>, vector<8x8xf32> -> vector<8x8xf32>
    %272 = arith.addf %271, %267 : vector<8x8xf32>
    %cst_78 = arith.constant dense<0xFF800000> : vector<8xf32>
    %273 = vector.multi_reduction <maximumf>, %272, %cst_78 [1] : vector<8x8xf32> to vector<8xf32>
    %274 = vector.shape_cast %273 : vector<8xf32> to vector<8x1xf32>
    %275 = vector.broadcast %274 : vector<8x1xf32> to vector<8x8xf32>
    %276 = arith.subf %272, %275 : vector<8x8xf32>
    %277 = math.exp %276 : vector<8x8xf32>
    %cst_79 = arith.constant dense<0.000000e+00> : vector<8xf32>
    %278 = vector.multi_reduction <add>, %277, %cst_79 [1] : vector<8x8xf32> to vector<8xf32>
    %279 = vector.shape_cast %278 : vector<8xf32> to vector<8x1xf32>
    %280 = tpu.reciprocal %279 {approx = true} : vector<8x1xf32> -> vector<8x1xf32>
    %281 = vector.broadcast %280 : vector<8x1xf32> to vector<8x8xf32>
    %282 = arith.mulf %277, %281 : vector<8x8xf32>
    %283 = vector.extract_strided_slice %260 {offsets = [0, 0], sizes = [8, 8], strides = [1, 1]} : vector<8x32xf32> to vector<8x8xf32>
    %cst_80 = arith.constant dense<0.000000e+00> : vector<8x8xf32>
    %284 = tpu.matmul %282, %283, %cst_80 {dimension_numbers = #tpu.dot_dimension_numbers<[1], [0], [0], [1], [0, 0, 1, 1], [], []>, precision = #tpu.contract_precision<fp32>} : vector<8x8xf32>, vector<8x8xf32>, vector<8x8xf32> -> vector<8x8xf32>
    %285 = vector.extract_strided_slice %7 {offsets = [0, 0], sizes = [8, 32], strides = [1, 1]} : vector<32x32xf32> to vector<8x32xf32>
    %cst_81 = arith.constant dense<0.000000e+00> : vector<8x32xf32>
    %286 = tpu.matmul %284, %285, %cst_81 {dimension_numbers = #tpu.dot_dimension_numbers<[1], [0], [0], [1], [0, 0, 1, 1], [], []>, precision = #tpu.contract_precision<fp32>} : vector<8x8xf32>, vector<8x32xf32>, vector<8x32xf32> -> vector<8x32xf32>
    %287 = arith.addf %268, %286 : vector<8x32xf32>
    %288 = vector.extract_strided_slice %258 {offsets = [0, 8], sizes = [8, 8], strides = [1, 1]} : vector<8x32xf32> to vector<8x8xf32>
    %289 = vector.extract_strided_slice %259 {offsets = [0, 8], sizes = [8, 8], strides = [1, 1]} : vector<8x32xf32> to vector<8x8xf32>
    %cst_82 = arith.constant dense<0.000000e+00> : vector<8x8xf32>
    %290 = tpu.matmul %288, %289, %cst_82 {dimension_numbers = #tpu.dot_dimension_numbers<[1], [1], [0], [0], [0, 0, 1, 0], [], []>, precision = #tpu.contract_precision<fp32>} : vector<8x8xf32>, vector<8x8xf32>, vector<8x8xf32> -> vector<8x8xf32>
    %291 = arith.addf %290, %267 : vector<8x8xf32>
    %cst_83 = arith.constant dense<0xFF800000> : vector<8xf32>
    %292 = vector.multi_reduction <maximumf>, %291, %cst_83 [1] : vector<8x8xf32> to vector<8xf32>
    %293 = vector.shape_cast %292 : vector<8xf32> to vector<8x1xf32>
    %294 = vector.broadcast %293 : vector<8x1xf32> to vector<8x8xf32>
    %295 = arith.subf %291, %294 : vector<8x8xf32>
    %296 = math.exp %295 : vector<8x8xf32>
    %cst_84 = arith.constant dense<0.000000e+00> : vector<8xf32>
    %297 = vector.multi_reduction <add>, %296, %cst_84 [1] : vector<8x8xf32> to vector<8xf32>
    %298 = vector.shape_cast %297 : vector<8xf32> to vector<8x1xf32>
    %299 = tpu.reciprocal %298 {approx = true} : vector<8x1xf32> -> vector<8x1xf32>
    %300 = vector.broadcast %299 : vector<8x1xf32> to vector<8x8xf32>
    %301 = arith.mulf %296, %300 : vector<8x8xf32>
    %302 = vector.extract_strided_slice %260 {offsets = [0, 8], sizes = [8, 8], strides = [1, 1]} : vector<8x32xf32> to vector<8x8xf32>
    %cst_85 = arith.constant dense<0.000000e+00> : vector<8x8xf32>
    %303 = tpu.matmul %301, %302, %cst_85 {dimension_numbers = #tpu.dot_dimension_numbers<[1], [0], [0], [1], [0, 0, 1, 1], [], []>, precision = #tpu.contract_precision<fp32>} : vector<8x8xf32>, vector<8x8xf32>, vector<8x8xf32> -> vector<8x8xf32>
    %304 = vector.extract_strided_slice %7 {offsets = [8, 0], sizes = [8, 32], strides = [1, 1]} : vector<32x32xf32> to vector<8x32xf32>
    %cst_86 = arith.constant dense<0.000000e+00> : vector<8x32xf32>
    %305 = tpu.matmul %303, %304, %cst_86 {dimension_numbers = #tpu.dot_dimension_numbers<[1], [0], [0], [1], [0, 0, 1, 1], [], []>, precision = #tpu.contract_precision<fp32>} : vector<8x8xf32>, vector<8x32xf32>, vector<8x32xf32> -> vector<8x32xf32>
    %306 = arith.addf %287, %305 : vector<8x32xf32>
    %307 = vector.extract_strided_slice %258 {offsets = [0, 16], sizes = [8, 8], strides = [1, 1]} : vector<8x32xf32> to vector<8x8xf32>
    %308 = vector.extract_strided_slice %259 {offsets = [0, 16], sizes = [8, 8], strides = [1, 1]} : vector<8x32xf32> to vector<8x8xf32>
    %cst_87 = arith.constant dense<0.000000e+00> : vector<8x8xf32>
    %309 = tpu.matmul %307, %308, %cst_87 {dimension_numbers = #tpu.dot_dimension_numbers<[1], [1], [0], [0], [0, 0, 1, 0], [], []>, precision = #tpu.contract_precision<fp32>} : vector<8x8xf32>, vector<8x8xf32>, vector<8x8xf32> -> vector<8x8xf32>
    %310 = arith.addf %309, %267 : vector<8x8xf32>
    %cst_88 = arith.constant dense<0xFF800000> : vector<8xf32>
    %311 = vector.multi_reduction <maximumf>, %310, %cst_88 [1] : vector<8x8xf32> to vector<8xf32>
    %312 = vector.shape_cast %311 : vector<8xf32> to vector<8x1xf32>
    %313 = vector.broadcast %312 : vector<8x1xf32> to vector<8x8xf32>
    %314 = arith.subf %310, %313 : vector<8x8xf32>
    %315 = math.exp %314 : vector<8x8xf32>
    %cst_89 = arith.constant dense<0.000000e+00> : vector<8xf32>
    %316 = vector.multi_reduction <add>, %315, %cst_89 [1] : vector<8x8xf32> to vector<8xf32>
    %317 = vector.shape_cast %316 : vector<8xf32> to vector<8x1xf32>
    %318 = tpu.reciprocal %317 {approx = true} : vector<8x1xf32> -> vector<8x1xf32>
    %319 = vector.broadcast %318 : vector<8x1xf32> to vector<8x8xf32>
    %320 = arith.mulf %315, %319 : vector<8x8xf32>
    %321 = vector.extract_strided_slice %260 {offsets = [0, 16], sizes = [8, 8], strides = [1, 1]} : vector<8x32xf32> to vector<8x8xf32>
    %cst_90 = arith.constant dense<0.000000e+00> : vector<8x8xf32>
    %322 = tpu.matmul %320, %321, %cst_90 {dimension_numbers = #tpu.dot_dimension_numbers<[1], [0], [0], [1], [0, 0, 1, 1], [], []>, precision = #tpu.contract_precision<fp32>} : vector<8x8xf32>, vector<8x8xf32>, vector<8x8xf32> -> vector<8x8xf32>
    %323 = vector.extract_strided_slice %7 {offsets = [16, 0], sizes = [8, 32], strides = [1, 1]} : vector<32x32xf32> to vector<8x32xf32>
    %cst_91 = arith.constant dense<0.000000e+00> : vector<8x32xf32>
    %324 = tpu.matmul %322, %323, %cst_91 {dimension_numbers = #tpu.dot_dimension_numbers<[1], [0], [0], [1], [0, 0, 1, 1], [], []>, precision = #tpu.contract_precision<fp32>} : vector<8x8xf32>, vector<8x32xf32>, vector<8x32xf32> -> vector<8x32xf32>
    %325 = arith.addf %306, %324 : vector<8x32xf32>
    %326 = vector.extract_strided_slice %258 {offsets = [0, 24], sizes = [8, 8], strides = [1, 1]} : vector<8x32xf32> to vector<8x8xf32>
    %327 = vector.extract_strided_slice %259 {offsets = [0, 24], sizes = [8, 8], strides = [1, 1]} : vector<8x32xf32> to vector<8x8xf32>
    %cst_92 = arith.constant dense<0.000000e+00> : vector<8x8xf32>
    %328 = tpu.matmul %326, %327, %cst_92 {dimension_numbers = #tpu.dot_dimension_numbers<[1], [1], [0], [0], [0, 0, 1, 0], [], []>, precision = #tpu.contract_precision<fp32>} : vector<8x8xf32>, vector<8x8xf32>, vector<8x8xf32> -> vector<8x8xf32>
    %329 = arith.addf %328, %267 : vector<8x8xf32>
    %cst_93 = arith.constant dense<0xFF800000> : vector<8xf32>
    %330 = vector.multi_reduction <maximumf>, %329, %cst_93 [1] : vector<8x8xf32> to vector<8xf32>
    %331 = vector.shape_cast %330 : vector<8xf32> to vector<8x1xf32>
    %332 = vector.broadcast %331 : vector<8x1xf32> to vector<8x8xf32>
    %333 = arith.subf %329, %332 : vector<8x8xf32>
    %334 = math.exp %333 : vector<8x8xf32>
    %cst_94 = arith.constant dense<0.000000e+00> : vector<8xf32>
    %335 = vector.multi_reduction <add>, %334, %cst_94 [1] : vector<8x8xf32> to vector<8xf32>
    %336 = vector.shape_cast %335 : vector<8xf32> to vector<8x1xf32>
    %337 = tpu.reciprocal %336 {approx = true} : vector<8x1xf32> -> vector<8x1xf32>
    %338 = vector.broadcast %337 : vector<8x1xf32> to vector<8x8xf32>
    %339 = arith.mulf %334, %338 : vector<8x8xf32>
    %340 = vector.extract_strided_slice %260 {offsets = [0, 24], sizes = [8, 8], strides = [1, 1]} : vector<8x32xf32> to vector<8x8xf32>
    %cst_95 = arith.constant dense<0.000000e+00> : vector<8x8xf32>
    %341 = tpu.matmul %339, %340, %cst_95 {dimension_numbers = #tpu.dot_dimension_numbers<[1], [0], [0], [1], [0, 0, 1, 1], [], []>, precision = #tpu.contract_precision<fp32>} : vector<8x8xf32>, vector<8x8xf32>, vector<8x8xf32> -> vector<8x8xf32>
    %342 = vector.extract_strided_slice %7 {offsets = [24, 0], sizes = [8, 32], strides = [1, 1]} : vector<32x32xf32> to vector<8x32xf32>
    %cst_96 = arith.constant dense<0.000000e+00> : vector<8x32xf32>
    %343 = tpu.matmul %341, %342, %cst_96 {dimension_numbers = #tpu.dot_dimension_numbers<[1], [0], [0], [1], [0, 0, 1, 1], [], []>, precision = #tpu.contract_precision<fp32>} : vector<8x8xf32>, vector<8x32xf32>, vector<8x32xf32> -> vector<8x32xf32>
    %344 = arith.addf %325, %343 : vector<8x32xf32>
    %345 = vector.extract_strided_slice %251 {offsets = [8, 0], sizes = [8, 32], strides = [1, 1]} : vector<16x32xf32> to vector<8x32xf32>
    %346 = vector.extract_strided_slice %255 {offsets = [8, 0], sizes = [8, 32], strides = [1, 1]} : vector<16x32xf32> to vector<8x32xf32>
    %347 = vector.extract_strided_slice %256 {offsets = [8, 0], sizes = [8, 32], strides = [1, 1]} : vector<16x32xf32> to vector<8x32xf32>
    %348 = vector.extract_strided_slice %257 {offsets = [1, 0, 0], sizes = [1, 8, 8], strides = [1, 1, 1]} : vector<2x8x8xf32> to vector<1x8x8xf32>
    %349 = vector.shape_cast %348 : vector<1x8x8xf32> to vector<8x8xf32>
    %cst_97 = arith.constant 0.000000e+00 : f32
    %350 = vector.broadcast %cst_97 : f32 to vector<8x8xf32>
    %351 = arith.cmpf oeq, %349, %350 : vector<8x8xf32>
    %cst_98 = arith.constant -1.000000e+09 : f32
    %cst_99 = arith.constant 0.000000e+00 : f32
    %352 = vector.broadcast %cst_98 : f32 to vector<8x8xf32>
    %353 = vector.broadcast %cst_99 : f32 to vector<8x8xf32>
    %354 = arith.select %351, %352, %353 : vector<8x8xi1>, vector<8x8xf32>
    %cst_100 = arith.constant 0.000000e+00 : f32
    %355 = vector.broadcast %cst_100 : f32 to vector<8x32xf32>
    %356 = vector.extract_strided_slice %345 {offsets = [0, 0], sizes = [8, 8], strides = [1, 1]} : vector<8x32xf32> to vector<8x8xf32>
    %357 = vector.extract_strided_slice %346 {offsets = [0, 0], sizes = [8, 8], strides = [1, 1]} : vector<8x32xf32> to vector<8x8xf32>
    %cst_101 = arith.constant dense<0.000000e+00> : vector<8x8xf32>
    %358 = tpu.matmul %356, %357, %cst_101 {dimension_numbers = #tpu.dot_dimension_numbers<[1], [1], [0], [0], [0, 0, 1, 0], [], []>, precision = #tpu.contract_precision<fp32>} : vector<8x8xf32>, vector<8x8xf32>, vector<8x8xf32> -> vector<8x8xf32>
    %359 = arith.addf %358, %354 : vector<8x8xf32>
    %cst_102 = arith.constant dense<0xFF800000> : vector<8xf32>
    %360 = vector.multi_reduction <maximumf>, %359, %cst_102 [1] : vector<8x8xf32> to vector<8xf32>
    %361 = vector.shape_cast %360 : vector<8xf32> to vector<8x1xf32>
    %362 = vector.broadcast %361 : vector<8x1xf32> to vector<8x8xf32>
    %363 = arith.subf %359, %362 : vector<8x8xf32>
    %364 = math.exp %363 : vector<8x8xf32>
    %cst_103 = arith.constant dense<0.000000e+00> : vector<8xf32>
    %365 = vector.multi_reduction <add>, %364, %cst_103 [1] : vector<8x8xf32> to vector<8xf32>
    %366 = vector.shape_cast %365 : vector<8xf32> to vector<8x1xf32>
    %367 = tpu.reciprocal %366 {approx = true} : vector<8x1xf32> -> vector<8x1xf32>
    %368 = vector.broadcast %367 : vector<8x1xf32> to vector<8x8xf32>
    %369 = arith.mulf %364, %368 : vector<8x8xf32>
    %370 = vector.extract_strided_slice %347 {offsets = [0, 0], sizes = [8, 8], strides = [1, 1]} : vector<8x32xf32> to vector<8x8xf32>
    %cst_104 = arith.constant dense<0.000000e+00> : vector<8x8xf32>
    %371 = tpu.matmul %369, %370, %cst_104 {dimension_numbers = #tpu.dot_dimension_numbers<[1], [0], [0], [1], [0, 0, 1, 1], [], []>, precision = #tpu.contract_precision<fp32>} : vector<8x8xf32>, vector<8x8xf32>, vector<8x8xf32> -> vector<8x8xf32>
    %372 = vector.extract_strided_slice %7 {offsets = [0, 0], sizes = [8, 32], strides = [1, 1]} : vector<32x32xf32> to vector<8x32xf32>
    %cst_105 = arith.constant dense<0.000000e+00> : vector<8x32xf32>
    %373 = tpu.matmul %371, %372, %cst_105 {dimension_numbers = #tpu.dot_dimension_numbers<[1], [0], [0], [1], [0, 0, 1, 1], [], []>, precision = #tpu.contract_precision<fp32>} : vector<8x8xf32>, vector<8x32xf32>, vector<8x32xf32> -> vector<8x32xf32>
    %374 = arith.addf %355, %373 : vector<8x32xf32>
    %375 = vector.extract_strided_slice %345 {offsets = [0, 8], sizes = [8, 8], strides = [1, 1]} : vector<8x32xf32> to vector<8x8xf32>
    %376 = vector.extract_strided_slice %346 {offsets = [0, 8], sizes = [8, 8], strides = [1, 1]} : vector<8x32xf32> to vector<8x8xf32>
    %cst_106 = arith.constant dense<0.000000e+00> : vector<8x8xf32>
    %377 = tpu.matmul %375, %376, %cst_106 {dimension_numbers = #tpu.dot_dimension_numbers<[1], [1], [0], [0], [0, 0, 1, 0], [], []>, precision = #tpu.contract_precision<fp32>} : vector<8x8xf32>, vector<8x8xf32>, vector<8x8xf32> -> vector<8x8xf32>
    %378 = arith.addf %377, %354 : vector<8x8xf32>
    %cst_107 = arith.constant dense<0xFF800000> : vector<8xf32>
    %379 = vector.multi_reduction <maximumf>, %378, %cst_107 [1] : vector<8x8xf32> to vector<8xf32>
    %380 = vector.shape_cast %379 : vector<8xf32> to vector<8x1xf32>
    %381 = vector.broadcast %380 : vector<8x1xf32> to vector<8x8xf32>
    %382 = arith.subf %378, %381 : vector<8x8xf32>
    %383 = math.exp %382 : vector<8x8xf32>
    %cst_108 = arith.constant dense<0.000000e+00> : vector<8xf32>
    %384 = vector.multi_reduction <add>, %383, %cst_108 [1] : vector<8x8xf32> to vector<8xf32>
    %385 = vector.shape_cast %384 : vector<8xf32> to vector<8x1xf32>
    %386 = tpu.reciprocal %385 {approx = true} : vector<8x1xf32> -> vector<8x1xf32>
    %387 = vector.broadcast %386 : vector<8x1xf32> to vector<8x8xf32>
    %388 = arith.mulf %383, %387 : vector<8x8xf32>
    %389 = vector.extract_strided_slice %347 {offsets = [0, 8], sizes = [8, 8], strides = [1, 1]} : vector<8x32xf32> to vector<8x8xf32>
    %cst_109 = arith.constant dense<0.000000e+00> : vector<8x8xf32>
    %390 = tpu.matmul %388, %389, %cst_109 {dimension_numbers = #tpu.dot_dimension_numbers<[1], [0], [0], [1], [0, 0, 1, 1], [], []>, precision = #tpu.contract_precision<fp32>} : vector<8x8xf32>, vector<8x8xf32>, vector<8x8xf32> -> vector<8x8xf32>
    %391 = vector.extract_strided_slice %7 {offsets = [8, 0], sizes = [8, 32], strides = [1, 1]} : vector<32x32xf32> to vector<8x32xf32>
    %cst_110 = arith.constant dense<0.000000e+00> : vector<8x32xf32>
    %392 = tpu.matmul %390, %391, %cst_110 {dimension_numbers = #tpu.dot_dimension_numbers<[1], [0], [0], [1], [0, 0, 1, 1], [], []>, precision = #tpu.contract_precision<fp32>} : vector<8x8xf32>, vector<8x32xf32>, vector<8x32xf32> -> vector<8x32xf32>
    %393 = arith.addf %374, %392 : vector<8x32xf32>
    %394 = vector.extract_strided_slice %345 {offsets = [0, 16], sizes = [8, 8], strides = [1, 1]} : vector<8x32xf32> to vector<8x8xf32>
    %395 = vector.extract_strided_slice %346 {offsets = [0, 16], sizes = [8, 8], strides = [1, 1]} : vector<8x32xf32> to vector<8x8xf32>
    %cst_111 = arith.constant dense<0.000000e+00> : vector<8x8xf32>
    %396 = tpu.matmul %394, %395, %cst_111 {dimension_numbers = #tpu.dot_dimension_numbers<[1], [1], [0], [0], [0, 0, 1, 0], [], []>, precision = #tpu.contract_precision<fp32>} : vector<8x8xf32>, vector<8x8xf32>, vector<8x8xf32> -> vector<8x8xf32>
    %397 = arith.addf %396, %354 : vector<8x8xf32>
    %cst_112 = arith.constant dense<0xFF800000> : vector<8xf32>
    %398 = vector.multi_reduction <maximumf>, %397, %cst_112 [1] : vector<8x8xf32> to vector<8xf32>
    %399 = vector.shape_cast %398 : vector<8xf32> to vector<8x1xf32>
    %400 = vector.broadcast %399 : vector<8x1xf32> to vector<8x8xf32>
    %401 = arith.subf %397, %400 : vector<8x8xf32>
    %402 = math.exp %401 : vector<8x8xf32>
    %cst_113 = arith.constant dense<0.000000e+00> : vector<8xf32>
    %403 = vector.multi_reduction <add>, %402, %cst_113 [1] : vector<8x8xf32> to vector<8xf32>
    %404 = vector.shape_cast %403 : vector<8xf32> to vector<8x1xf32>
    %405 = tpu.reciprocal %404 {approx = true} : vector<8x1xf32> -> vector<8x1xf32>
    %406 = vector.broadcast %405 : vector<8x1xf32> to vector<8x8xf32>
    %407 = arith.mulf %402, %406 : vector<8x8xf32>
    %408 = vector.extract_strided_slice %347 {offsets = [0, 16], sizes = [8, 8], strides = [1, 1]} : vector<8x32xf32> to vector<8x8xf32>
    %cst_114 = arith.constant dense<0.000000e+00> : vector<8x8xf32>
    %409 = tpu.matmul %407, %408, %cst_114 {dimension_numbers = #tpu.dot_dimension_numbers<[1], [0], [0], [1], [0, 0, 1, 1], [], []>, precision = #tpu.contract_precision<fp32>} : vector<8x8xf32>, vector<8x8xf32>, vector<8x8xf32> -> vector<8x8xf32>
    %410 = vector.extract_strided_slice %7 {offsets = [16, 0], sizes = [8, 32], strides = [1, 1]} : vector<32x32xf32> to vector<8x32xf32>
    %cst_115 = arith.constant dense<0.000000e+00> : vector<8x32xf32>
    %411 = tpu.matmul %409, %410, %cst_115 {dimension_numbers = #tpu.dot_dimension_numbers<[1], [0], [0], [1], [0, 0, 1, 1], [], []>, precision = #tpu.contract_precision<fp32>} : vector<8x8xf32>, vector<8x32xf32>, vector<8x32xf32> -> vector<8x32xf32>
    %412 = arith.addf %393, %411 : vector<8x32xf32>
    %413 = vector.extract_strided_slice %345 {offsets = [0, 24], sizes = [8, 8], strides = [1, 1]} : vector<8x32xf32> to vector<8x8xf32>
    %414 = vector.extract_strided_slice %346 {offsets = [0, 24], sizes = [8, 8], strides = [1, 1]} : vector<8x32xf32> to vector<8x8xf32>
    %cst_116 = arith.constant dense<0.000000e+00> : vector<8x8xf32>
    %415 = tpu.matmul %413, %414, %cst_116 {dimension_numbers = #tpu.dot_dimension_numbers<[1], [1], [0], [0], [0, 0, 1, 0], [], []>, precision = #tpu.contract_precision<fp32>} : vector<8x8xf32>, vector<8x8xf32>, vector<8x8xf32> -> vector<8x8xf32>
    %416 = arith.addf %415, %354 : vector<8x8xf32>
    %cst_117 = arith.constant dense<0xFF800000> : vector<8xf32>
    %417 = vector.multi_reduction <maximumf>, %416, %cst_117 [1] : vector<8x8xf32> to vector<8xf32>
    %418 = vector.shape_cast %417 : vector<8xf32> to vector<8x1xf32>
    %419 = vector.broadcast %418 : vector<8x1xf32> to vector<8x8xf32>
    %420 = arith.subf %416, %419 : vector<8x8xf32>
    %421 = math.exp %420 : vector<8x8xf32>
    %cst_118 = arith.constant dense<0.000000e+00> : vector<8xf32>
    %422 = vector.multi_reduction <add>, %421, %cst_118 [1] : vector<8x8xf32> to vector<8xf32>
    %423 = vector.shape_cast %422 : vector<8xf32> to vector<8x1xf32>
    %424 = tpu.reciprocal %423 {approx = true} : vector<8x1xf32> -> vector<8x1xf32>
    %425 = vector.broadcast %424 : vector<8x1xf32> to vector<8x8xf32>
    %426 = arith.mulf %421, %425 : vector<8x8xf32>
    %427 = vector.extract_strided_slice %347 {offsets = [0, 24], sizes = [8, 8], strides = [1, 1]} : vector<8x32xf32> to vector<8x8xf32>
    %cst_119 = arith.constant dense<0.000000e+00> : vector<8x8xf32>
    %428 = tpu.matmul %426, %427, %cst_119 {dimension_numbers = #tpu.dot_dimension_numbers<[1], [0], [0], [1], [0, 0, 1, 1], [], []>, precision = #tpu.contract_precision<fp32>} : vector<8x8xf32>, vector<8x8xf32>, vector<8x8xf32> -> vector<8x8xf32>
    %429 = vector.extract_strided_slice %7 {offsets = [24, 0], sizes = [8, 32], strides = [1, 1]} : vector<32x32xf32> to vector<8x32xf32>
    %cst_120 = arith.constant dense<0.000000e+00> : vector<8x32xf32>
    %430 = tpu.matmul %428, %429, %cst_120 {dimension_numbers = #tpu.dot_dimension_numbers<[1], [0], [0], [1], [0, 0, 1, 1], [], []>, precision = #tpu.contract_precision<fp32>} : vector<8x8xf32>, vector<8x32xf32>, vector<8x32xf32> -> vector<8x32xf32>
    %431 = arith.addf %412, %430 : vector<8x32xf32>
    %432 = tpu.concatenate %344, %431 in 0 : vector<8x32xf32>, vector<8x32xf32> -> vector<16x32xf32>
    %433 = vector.broadcast %15 : vector<1x32xf32> to vector<16x32xf32>
    %434 = arith.addf %432, %433 : vector<16x32xf32>
    %435 = arith.addf %226, %434 : vector<16x32xf32>
    %436 = vector.extract_strided_slice %18 {offsets = [2, 0], sizes = [1, 32], strides = [1, 1]} : vector<3x32xf32> to vector<1x32xf32>
    %437 = vector.extract_strided_slice %19 {offsets = [2, 0], sizes = [1, 32], strides = [1, 1]} : vector<3x32xf32> to vector<1x32xf32>
    %cst_121 = arith.constant dense<0.000000e+00> : vector<16xf32>
    %438 = vector.multi_reduction <add>, %435, %cst_121 [1] : vector<16x32xf32> to vector<16xf32>
    %439 = vector.shape_cast %438 : vector<16xf32> to vector<16x1xf32>
    %cst_122 = arith.constant 3.200000e+01 : f32
    %440 = vector.broadcast %cst_122 : f32 to vector<16x1xf32>
    %441 = arith.divf %439, %440 : vector<16x1xf32>
    %442 = vector.broadcast %441 : vector<16x1xf32> to vector<16x32xf32>
    %443 = arith.subf %435, %442 : vector<16x32xf32>
    %444 = arith.mulf %443, %443 : vector<16x32xf32>
    %cst_123 = arith.constant dense<0.000000e+00> : vector<16xf32>
    %445 = vector.multi_reduction <add>, %444, %cst_123 [1] : vector<16x32xf32> to vector<16xf32>
    %446 = vector.shape_cast %445 : vector<16xf32> to vector<16x1xf32>
    %cst_124 = arith.constant 0.0322580636 : f32
    %447 = vector.broadcast %cst_124 : f32 to vector<16x1xf32>
    %448 = arith.mulf %446, %447 : vector<16x1xf32>
    %449 = math.sqrt %448 : vector<16x1xf32>
    %cst_125 = arith.constant 9.99999997E-7 : f32
    %450 = vector.broadcast %cst_125 : f32 to vector<16x1xf32>
    %451 = arith.addf %449, %450 : vector<16x1xf32>
    %452 = vector.broadcast %451 : vector<16x1xf32> to vector<16x32xf32>
    %453 = arith.divf %443, %452 : vector<16x32xf32>
    %454 = vector.broadcast %436 : vector<1x32xf32> to vector<16x32xf32>
    %455 = arith.mulf %453, %454 : vector<16x32xf32>
    %456 = vector.broadcast %437 : vector<1x32xf32> to vector<16x32xf32>
    %457 = arith.addf %455, %456 : vector<16x32xf32>
    %cst_126 = arith.constant dense<0.000000e+00> : vector<16x64xf32>
    %458 = tpu.matmul %457, %8, %cst_126 {dimension_numbers = #tpu.dot_dimension_numbers<[1], [0], [0], [1], [0, 0, 1, 1], [], []>, precision = #tpu.contract_precision<fp32>} : vector<16x32xf32>, vector<32x64xf32>, vector<16x64xf32> -> vector<16x64xf32>
    %459 = vector.broadcast %16 : vector<1x64xf32> to vector<16x64xf32>
    %460 = arith.addf %458, %459 : vector<16x64xf32>
    %cst_127 = arith.constant 0.000000e+00 : f32
    %461 = vector.broadcast %cst_127 : f32 to vector<16x64xf32>
    %462 = arith.maximumf %460, %461 : vector<16x64xf32>
    %cst_128 = arith.constant dense<0.000000e+00> : vector<16x32xf32>
    %463 = tpu.matmul %462, %9, %cst_128 {dimension_numbers = #tpu.dot_dimension_numbers<[1], [0], [0], [1], [0, 0, 1, 1], [], []>, precision = #tpu.contract_precision<fp32>} : vector<16x64xf32>, vector<64x32xf32>, vector<16x32xf32> -> vector<16x32xf32>
    %464 = vector.broadcast %17 : vector<1x32xf32> to vector<16x32xf32>
    %465 = arith.addf %463, %464 : vector<16x32xf32>
    %466 = arith.addf %435, %465 : vector<16x32xf32>
    %c0_129 = arith.constant 0 : index
    %c0_130 = arith.constant 0 : index
    %467 = vector.load %arg5[%c0_129, %c0_130] : memref<16x32xf32, #tpu.memory_space<vmem>>, vector<16x32xf32>
    tpu.vector_store %arg5[%c0_129, %c0_130], %466 {strides = array<i32>} : memref<16x32xf32, #tpu.memory_space<vmem>>, vector<16x32xf32>,
    return
  }
}

</mosaic_0001>

<bundles_post_ra>
// kernel: decoder_layer.1
= control target key start
LH: loop header
LB: loop body
LE: loop exit
PB: predicated region body
PF: predicated region fallthrough
CT: control target
= control target key end

     0   :  { %vm47_vm0 = vcmask 261120   ;;  %s30254_s0 = inlined_call_operand.vmem [shape: f32[16,32], index: 0, kind: input, shape index: {}]   ;;  %s30255_s1 = inlined_call_operand.vmem [shape: f32[16,32], index: 1, kind: input, shape index: {}]   ;;  %s30256_s2 = inlined_call_operand.vmem [shape: f32[2,8,8], index: 2, kind: input, shape index: {}]   ;;  %s30257_s3 = inlined_call_operand.vmem [shape: f32[2,8,8], index: 3, kind: input, shape index: {}]   ;;  %s30258_s4 = inlined_call_operand.vmem [shape: f32[109,320], index: 4, kind: input, shape index: {}]   ;;  %s30259_s5 = inlined_call_operand.hbm [shape: f32[16,32], index: 5, kind: output, shape index: {}]  }
   0x1   :  { %v21_v0 = vld [vmem:[%s30254_s0] sm:$0xff]  ;;  %v22_v1 = vld [vmem:[%s30254_s0 + $0x8] sm:$0xff] }
   0x2   :  { %10 = vsyncpa [#allocation3], 0  ;;  %v48_v2 = vsel %vm47_vm0, %v21_v0, 0.0  ;;  %v51_v3 = vsel %vm47_vm0, %v22_v1, 0.0  ;;  %v28389_v14 = vld [vmem:[%s30258_s4] sm:$0xff]  ;;  %v28394_v15 = vld [vmem:[%s30258_s4 + $0x18] sm:$0xff]  ;;  %v89_v56 = vlaneseq }
   0x3   :  { %49 = vadd.xlane.f32.xlu0 %v48_v2  ;;  %v28399_v16 = vld [vmem:[%s30258_s4 + $0x30] sm:$0xff]  ;;  %v112_v17 = vand.u32 4294901760, %v28389_v14  ;;  %v115_v18 = vand.u32 4294901760, %v28394_v15  ;;  %v34_v19 = vld [vmem:[%s30258_s4 + $0x48] sm:$0xff]  ;;  %vm28322_vm5 = vmmov 0   ;;  %s28323_s9 = smov 120  }
   0x4   :  { %v118_v20 = vand.u32 4294901760, %v28399_v16  ;;  %v121_v21 = vand.u32 4294901760, %v34_v19  ;;  %v28429_v62 = vshrl.u32 %v89_v56, 7  ;;  %s28324_s10 = smov 96   ;;  %s28325_s11 = smov 88   ;;  %vm646_vm6 = vcmask 64512  }
   0x5   :  { %v28407_v22 = vpack.c.bf16 %v115_v18, %v112_v17  ;;  %v202_v24 = vsub.f32 %v28389_v14, %v112_v17  ;;  %v209_v25 = vsub.f32 %v28394_v15, %v115_v18  ;;  %s28326_s14 = smov 56   ;;  %s28327_s15 = smov 64  }
   0x6   :  { %v28409_v23 = vpack.c.bf16 %v121_v21, %v118_v20  ;;  %v216_v30 = vsub.f32 %v28399_v16, %v118_v20  ;;  %v223_v31 = vsub.f32 %v34_v19, %v121_v21  ;;  %v97_v2 = vsub.s32 2, %v28429_v62  ;;  %s28328_s16 = smov 32   ;;  %s28329_s17 = smov 112  }
   0x7   :  { %52 = vadd.xlane.f32.xlu0 %v51_v3  ;;  %27500 = vmatprep.subr.bf16.mxu0 %v28407_v22  ;;  %v203_v26 = vand.u32 4294901760, %v202_v24  ;;  %v210_v27 = vand.u32 4294901760, %v209_v25  ;;  %v28421_v42 = vpack.c.bf16 %v209_v25, %v202_v24  ;;  %v46_v3 = vld [vmem:[%s30258_s4 + $0x138] sm:$0x1f]  ;;  %s28330_s18 = smov 80   ;;  %s28331_s19 = smov 104  }
   0x8   :  { %27502 = vmatpush3.bf16.msra.mxu0 %v28407_v22  ;;  %v217_v34 = vand.u32 4294901760, %v216_v30  ;;  %v224_v35 = vand.u32 4294901760, %v223_v31  ;;  %v28423_v43 = vpack.c.bf16 %v223_v31, %v216_v30  ;;  %s28332_s20 = smov 48   ;;  %s28333_s21 = smov 72  }
   0x9   :  { %27504 = vmatprep.subr.bf16.mxu0 %v28409_v23  ;;  %v204_v28 = vsub.f32 %v202_v24, %v203_v26  ;;  %v211_v29 = vsub.f32 %v209_v25, %v210_v27  ;;  %v28425_v44 = vpack.c.bf16 %v210_v27, %v203_v26  ;;  %s28334_s24 = smov 40  }
   0xa   :  { %v218_v37 = vsub.f32 %v216_v30, %v217_v34  ;;  %v225_v38 = vsub.f32 %v223_v31, %v224_v35  ;;  %v28427_v45 = vpack.c.bf16 %v224_v35, %v217_v34 }
   0xb   :  { %v205_v32 = vand.u32 4294901760, %v204_v28  ;;  %v212_v33 = vand.u32 4294901760, %v211_v29 }
   0xc   :  { %27506 = vmatpush3.bf16.msra.mxu0 %v28409_v23  ;;  %v219_v39 = vand.u32 4294901760, %v218_v37  ;;  %v226_v40 = vand.u32 4294901760, %v225_v38 }
   0xd   :  { %v28418_v36 = vpack.c.bf16 %v212_v33, %v205_v32  ;;  %v28321_v32 = vmov 0.0  }
   0xe   :  { %v27511_v41 = vpack.c.bf16 %v226_v40, %v219_v39  ;;  %25747 = vmatprep.subr.mxu1 %v28321_v32  ;;  %25749 = vmatprep.mubr.msk.f32.mxu1 %vm28322_vm5, %v28321_v32 }
   0xf   :  { %27508 = vmatprep.subr.bf16.mxu0 %v28418_v36 }
  0x90   :  { %v50_v4 = vpop.xlane.xlu0 %49 }
  0x91   :  { %v55_v5 = vmul.f32 0.03125, %v50_v4 }
  0x93   :  { %v28376_v6 = vsub.f32 %v21_v0, %v55_v5  ;;  %v91_v0 = vsub.s32 7, %v28429_v62 }
  0x94   :  { %v53_v7 = vpop.xlane.xlu0 %52 }
  0x95   :  { %v56_v8 = vmul.f32 0.03125, %v53_v7  ;;  %v59_v9 = vmul.f32 %v28376_v6, %v28376_v6 }
  0x97   :  { %v28380_v10 = vsub.f32 %v22_v1, %v56_v8  ;;  %v61_v11 = vsel %vm47_vm0, %v59_v9, 0.0  ;;  %v28435_v1 = vld [vmem:[%s30258_s4 + $0x120] sm:$0xff]  ;;  %v98_v8 = vrot.slane %v46_v3, %v97_v2 }
  0x98   :  { %62 = vadd.xlane.f32.xlu1 %v61_v11  ;;  %v92_v4 = vrot.slane %v28435_v1, %v91_v0  ;;  %v639_v0 = vld [vmem:[%s30256_s2] sm:$0xff] }
  0x99   :  { %v60_v12 = vmul.f32 %v28380_v10, %v28380_v10  ;;  %vm641_vm7 = vcmp.eq.f32.partialorder %v639_v0, 0.0 }
  0x9b   :  { %v64_v13 = vsel %vm47_vm0, %v60_v12, 0.0 }
  0x9c   :  { %65 = vadd.xlane.f32.xlu1 %v64_v13 }
 0x125   :  { %v63_v46 = vpop.xlane.xlu1 %62 }
 0x126   :  { %v67_v47 = vmul.f32 0.032258064, %v63_v46 }
 0x128   :  { %28200 = vrsqrt.f32 %v67_v47  ;;  %vm71_vm1 = vcmp.eq.f32.partialorder %v67_v47, inf  ;;  %v74_v52 = vand.u32 2147483648, %v67_v47  ;;  %vm73_vm2 = vcmp.eq.f32.partialorder %v67_v47, 0.0 }
 0x129   :  { %v66_v48 = vpop.xlane.xlu1 %65 }
 0x12a   :  { %v68_v49 = vmul.f32 0.032258064, %v66_v48 }
 0x12c   :  { %28202 = vrsqrt.f32 %v68_v49  ;;  %vm78_vm3 = vcmp.eq.f32.partialorder %v68_v49, inf  ;;  %v81_v59 = vand.u32 2147483648, %v68_v49  ;;  %vm80_vm4 = vcmp.eq.f32.partialorder %v68_v49, 0.0 }
 0x132   :  { %v28201_v50 = vpop.eup %28200 }
 0x133   :  { %v70_v51 = vmul.f32 %v28201_v50, %v67_v47 }
 0x135   :  { %v72_v53 = vsel %vm71_vm1, %v67_v47, %v70_v51 }
 0x136   :  { %v28203_v54 = vpop.eup %28202  ;;  %v75_v55 = vsel %vm73_vm2, %v74_v52, %v72_v53 }
 0x137   :  { %v83_v57 = vadd.f32 1e-06, %v75_v55  ;;  %v77_v58 = vmul.f32 %v28203_v54, %v68_v49 }
 0x139   :  { %28204 = vrcp.f32 %v83_v57  ;;  %v79_v60 = vsel %vm78_vm3, %v68_v49, %v77_v58 }
 0x13a   :  { %v82_v61 = vsel %vm80_vm4, %v81_v59, %v79_v60  ;;  %vm24294_vm4 = vcmask 523264  }
 0x13b   :  { %v84_v63 = vadd.f32 1e-06, %v82_v61 }
 0x13d   :  { %28206 = vrcp.f32 %v84_v63 }
 0x143   :  { %v28205_v5 = vpop.eup %28204 }
 0x144   :  { %v86_v7 = vmul.f32 %v28205_v5, %v28376_v6 }
 0x146   :  { %v93_v9 = vmul.f32 %v92_v4, %v86_v7 }
 0x147   :  { %v28207_v11 = vpop.eup %28206 }
 0x148   :  { %v99_v12 = vadd.f32 %v98_v8, %v93_v9  ;;  %v88_v13 = vmul.f32 %v28207_v11, %v28380_v10  ;;  %v103_v10 = vsub.s32 0, %v28429_v62 }
 0x14a   :  { %v106_v17 = vsel %vm47_vm0, %v99_v12, 0  ;;  %v94_v18 = vmul.f32 %v92_v4, %v88_v13 }
 0x14b   :  { %v180_v19 = vand.u32 4294901760, %v106_v17 }
 0x14c   :  { %v100_v20 = vadd.f32 %v98_v8, %v94_v18 }
 0x14d   :  { %v181_v21 = vsub.f32 %v106_v17, %v180_v19 }
 0x14e   :  { %v109_v24 = vsel %vm47_vm0, %v100_v20, 0 }
 0x14f   :  { %v182_v25 = vand.u32 4294901760, %v181_v21  ;;  %v190_v26 = vand.u32 4294901760, %v109_v24 }
 0x151   :  { %v183_v27 = vsub.f32 %v181_v21, %v182_v25  ;;  %v191_v6 = vsub.f32 %v109_v24, %v190_v26 }
 0x153   :  { %v184_v28 = vand.u32 4294901760, %v183_v27  ;;  %v192_v29 = vand.u32 4294901760, %v191_v6 }
 0x155   :  { %25689 = vmatprep.mubr.f32.mxu0 %v184_v28  ;;  %v193_v30 = vsub.f32 %v191_v6, %v192_v29 }
 0x157   :  { %v194_v31 = vand.u32 4294901760, %v193_v30 }
 0x159   :  { %25690 = vmatmul.mubr.f32.vlgmr.msra.gmra.mrb[0].mxu0 %v194_v31 }
 0x15a   :  { %27510 = vmatpush3.bf16.msra.mxu0 %v28418_v36  ;;  %25700 = vmatprep.mubr.f32.mxu0 %v180_v19 }
 0x15b   :  { %27512 = vmatprep.subr.bf16.mxu0 %v27511_v41 }
 0x15e   :  { %27514 = vmatpush3.bf16.msra.mxu0 %v27511_v41 }
 0x15f   :  { %27516 = vmatprep.subr.bf16.mxu0 %v28421_v42 }
 0x161   :  { %25701 = vmatmul.mubr.f32.vlgmr.msra.gmra.mrb[0].mxu0 %v190_v26 }
 0x162   :  { %27518 = vmatpush3.bf16.msra.mxu0 %v28421_v42  ;;  %25711 = vmatprep.mubr.f32.mxu0 %v181_v21 }
 0x163   :  { %27520 = vmatprep.subr.bf16.mxu0 %v28423_v43 }
 0x166   :  { %27522 = vmatpush3.bf16.msra.mxu0 %v28423_v43 }
 0x167   :  { %27524 = vmatprep.subr.bf16.mxu0 %v28407_v22 }
 0x169   :  { %25712 = vmatmul.mubr.f32.vlgmr.msra.gmra.mrb[0].mxu0 %v191_v6 }
 0x16a   :  { %27526 = vmatpush3.bf16.msra.mxu0 %v28407_v22  ;;  %25722 = vmatprep.mubr.f32.mxu0 %v182_v25 }
 0x16b   :  { %27528 = vmatprep.subr.bf16.mxu0 %v28409_v23 }
 0x16e   :  { %27530 = vmatpush3.bf16.msra.mxu0 %v28409_v23 }
 0x16f   :  { %27532 = vmatprep.subr.bf16.mxu0 %v28425_v44 }
 0x171   :  { %25723 = vmatmul.mubr.f32.vlgmr.msra.gmra.mrb[0].mxu0 %v192_v29 }
 0x172   :  { %27534 = vmatpush3.bf16.msra.mxu0 %v28425_v44  ;;  %25733 = vmatprep.mubr.f32.mxu0 %v180_v19 }
 0x173   :  { %27536 = vmatprep.subr.bf16.mxu0 %v28427_v45 }
 0x176   :  { %27538 = vmatpush3.bf16.msra.mxu0 %v28427_v45 }
 0x177   :  { %27540 = vmatprep.subr.bf16.mxu0 %v28407_v22 }
 0x179   :  { %25734 = vmatmul.mubr.f32.vlgmr.msra.gmra.mrb[0].mxu0 %v190_v26 }
 0x17a   :  { %27542 = vmatpush3.bf16.msra.mxu0 %v28407_v22  ;;  %25744 = vmatprep.mubr.f32.mxu0 %v180_v19  ;;  %v104_v22 = vrot.slane %v28435_v1, %v103_v10  ;;  %v28542_v1 = vsel %vm641_vm7, -1e+09, %v28321_v32 }
 0x17b   :  { %27544 = vmatprep.subr.bf16.mxu0 %v28409_v23 }
 0x17e   :  { %27546 = vmatpush3.bf16.msra.mxu0 %v28409_v23 }
 0x17f   :  { %25807 = vmatprep.subr.mxu0 %v28321_v32 }
 0x181   :  { %25745 = vmatmul.mubr.f32.vlgmr.msra.gmra.mrb[0].mxu0 %v190_v26 }
 0x182   :  { %25809 = vmatprep.mubr.msk.f32.mxu0 %vm28322_vm5, %v28321_v32 }
 0x254   :  { %v25746_v23 = vpop.f32.mrb[0].mxu0 }
 0x255   :  { %v28475_v33 = vadd.f32 %v25746_v23, %v104_v22  ;;  %v629_v34 = vpop.f32.mrb[1].mxu0 }
 0x256   :  { %v28477_v35 = vadd.f32 %v629_v34, %v104_v22 }
 0x258   :  { %1560 = vrot.lane.b32.xlu1 %v28477_v35, %s28323_s9  ;;  %644 = vrot.lane.b32.xlu0 %v28477_v35, %s28324_s10  ;;  %v647_v36 = vsel %vm646_vm6, %v28477_v35, 0 }
 0x259   :  { %v28487_v37 = vand.u32 4294901760, %v647_v36 }
 0x25b   :  { %v718_v38 = vsub.f32 %v647_v36, %v28487_v37 }
 0x25c   :  { %1562 = vrot.lane.b32.xlu1 %v28477_v35, %s28325_s11 }
 0x25d   :  { %v719_v39 = vand.u32 4294901760, %v718_v38 }
 0x25f   :  { %v720_v44 = vsub.f32 %v718_v38, %v719_v39 }
 0x261   :  { %v721_v51 = vand.u32 4294901760, %v720_v44 }
 0x2ca   :  { %v1561_v40 = vpop.permute.xlu1 %1560  ;;  %v645_v41 = vpop.permute.xlu0 %644 }
 0x2cb   :  { %v1564_v42 = vsel %vm646_vm6, %v1561_v40, 0  ;;  %v649_v43 = vsel %vm646_vm6, %v645_v41, 0 }
 0x2cc   :  { %v28492_v45 = vand.u32 4294901760, %v1564_v42  ;;  %v652_v46 = vand.u32 4294901760, %v649_v43 }
 0x2ce   :  { %v1635_v47 = vsub.f32 %v1564_v42, %v28492_v45  ;;  %v729_v48 = vsub.f32 %v649_v43, %v652_v46  ;;  %v1563_v49 = vpop.permute.xlu1 %1562  ;;  %25748 = vmatpush3.xpose.msra.mxu1 %v652_v46 }
 0x2cf   :  { %v1566_v50 = vsel %vm646_vm6, %v1563_v49, 0  ;;  %25752 = vmatprep.subr.mxu1 %v28321_v32 }
 0x2d0   :  { %v1636_v52 = vand.u32 4294901760, %v1635_v47  ;;  %v730_v53 = vand.u32 4294901760, %v729_v48  ;;  %v1569_v54 = vand.u32 4294901760, %v1566_v50 }
 0x2d1   :  { %25750 = vmatmul.mubr.f32.vlgmr.msra.gmra.mrb[0].mxu1 %v721_v51 }
 0x2d2   :  { %v1637_v55 = vsub.f32 %v1635_v47, %v1636_v52  ;;  %v731_v56 = vsub.f32 %v729_v48, %v730_v53  ;;  %v1646_v57 = vsub.f32 %v1566_v50, %v1569_v54  ;;  %25808 = vmatpush3.xpose.msra.mxu0 %v1569_v54  ;;  %25754 = vmatprep.mubr.msk.f32.mxu1 %vm28322_vm5, %v28321_v32 }
 0x2d3   :  { %25812 = vmatprep.subr.mxu0 %v28321_v32 }
 0x2d4   :  { %v1638_v58 = vand.u32 4294901760, %v1637_v55  ;;  %v732_v59 = vand.u32 4294901760, %v731_v56  ;;  %v1647_v60 = vand.u32 4294901760, %v1646_v57 }
 0x2d6   :  { %v1648_v61 = vsub.f32 %v1646_v57, %v1647_v60  ;;  %25753 = vmatpush3.xpose.msra.mxu1 %v732_v59  ;;  %25810 = vmatmul.mubr.f32.vlgmr.msra.gmra.mrb[2].mxu0 %v1638_v58 }
 0x2d7   :  { %25757 = vmatprep.subr.mxu1 %v28321_v32  ;;  %25814 = vmatprep.mubr.msk.f32.mxu0 %vm28322_vm5, %v28321_v32 }
 0x2d8   :  { %v1649_v63 = vand.u32 4294901760, %v1648_v61 }
 0x2d9   :  { %25755 = vmatmul.mubr.f32.vlgmr.msra.gmra.mrb[0].mxu1 %v28487_v37 }
 0x2da   :  { %25758 = vmatpush3.xpose.msra.mxu1 %v729_v48  ;;  %25813 = vmatpush3.xpose.msra.mxu0 %v1649_v63 }
 0x2db   :  { %25817 = vmatprep.subr.mxu0 %v28321_v32  ;;  %25759 = vmatprep.mubr.msk.f32.mxu1 %vm28322_vm5, %v28321_v32 }
 0x2dc   :  { %25762 = vmatprep.subr.mxu1 %v28321_v32 }
 0x2de   :  { %25815 = vmatmul.mubr.f32.vlgmr.msra.gmra.mrb[2].mxu0 %v28492_v45 }
 0x2df   :  { %25818 = vmatpush3.xpose.msra.mxu0 %v1646_v57  ;;  %25819 = vmatprep.mubr.msk.f32.mxu0 %vm28322_vm5, %v28321_v32 }
 0x2e0   :  { %25822 = vmatprep.subr.mxu0 %v28321_v32 }
 0x2e1   :  { %25760 = vmatmul.mubr.f32.vlgmr.msra.gmra.mrb[0].mxu1 %v718_v38 }
 0x2e2   :  { %25763 = vmatpush3.xpose.msra.mxu1 %v652_v46  ;;  %25764 = vmatprep.mubr.msk.f32.mxu1 %vm28322_vm5, %v28321_v32 }
 0x2e3   :  { %25767 = vmatprep.subr.mxu1 %v28321_v32 }
 0x2e6   :  { %25820 = vmatmul.mubr.f32.vlgmr.msra.gmra.mrb[2].mxu0 %v1635_v47 }
 0x2e7   :  { %25823 = vmatpush3.xpose.msra.mxu0 %v1569_v54  ;;  %25824 = vmatprep.mubr.msk.f32.mxu0 %vm28322_vm5, %v28321_v32 }
 0x2e8   :  { %25827 = vmatprep.subr.mxu0 %v28321_v32 }
 0x2e9   :  { %25765 = vmatmul.mubr.f32.vlgmr.msra.gmra.mrb[0].mxu1 %v719_v39 }
 0x2ea   :  { %25768 = vmatpush3.xpose.msra.mxu1 %v730_v53  ;;  %25769 = vmatprep.mubr.msk.f32.mxu1 %vm28322_vm5, %v28321_v32 }
 0x2eb   :  { %25772 = vmatprep.subr.mxu1 %v28321_v32 }
 0x2ee   :  { %25825 = vmatmul.mubr.f32.vlgmr.msra.gmra.mrb[2].mxu0 %v1636_v52 }
 0x2ef   :  { %25828 = vmatpush3.xpose.msra.mxu0 %v1647_v60  ;;  %25829 = vmatprep.mubr.msk.f32.mxu0 %vm28322_vm5, %v28321_v32 }
 0x2f0   :  { %25832 = vmatprep.subr.mxu0 %v28321_v32 }
 0x2f1   :  { %25770 = vmatmul.mubr.f32.vlgmr.msra.gmra.mrb[0].mxu1 %v28487_v37 }
 0x2f2   :  { %25773 = vmatpush3.xpose.msra.mxu1 %v652_v46  ;;  %25774 = vmatprep.mubr.msk.f32.mxu1 %vm28322_vm5, %v28321_v32 }
 0x2f3   :  { %25777 = vmatprep.subr.mxu1 %v28321_v32 }
 0x2f6   :  { %25830 = vmatmul.mubr.f32.vlgmr.msra.gmra.mrb[2].mxu0 %v28492_v45 }
 0x2f7   :  { %25833 = vmatpush3.xpose.msra.mxu0 %v1569_v54  ;;  %25834 = vmatprep.mubr.msk.f32.mxu0 %vm28322_vm5, %v28321_v32 }
 0x2f8   :  { %25867 = vmatprep.subr.mxu0 %v28321_v32 }
 0x2f9   :  { %25775 = vmatmul.mubr.f32.vlgmr.msra.gmra.mrb[0].mxu1 %v28487_v37 }
 0x2fa   :  { %25779 = vmatprep.mubr.msk.f32.mxu1 %vm28322_vm5, %v28321_v32 }
 0x2fe   :  { %25835 = vmatmul.mubr.f32.vlgmr.msra.gmra.mrb[2].mxu0 %v28492_v45 }
 0x2ff   :  { %25869 = vmatprep.mubr.msk.f32.mxu0 %vm28322_vm5, %v28321_v32 }
 0x3cc   :  { %v1093_v3 = vpop.f32.mrb[0].mxu1 }
 0x3cd   :  { %v27789_v4 = vadd.f32 %v1093_v3, %v28542_v1  ;;  %v25776_v5 = vpop.f32.mrb[1].mxu1 }
 0x3cf   :  { %v1097_v7 = vsel %vm646_vm6, %v27789_v4, -inf }
 0x3d0   :  { %1098 = vmax.xlane.f32.xlu1 %v1097_v7 }
 0x3d1   :  { %v2010_v8 = vpop.f32.mrb[2].mxu0 }
 0x3d2   :  { %v27790_v9 = vadd.f32 %v2010_v8, %v28542_v1  ;;  %v25836_v11 = vpop.f32.mrb[3].mxu0 }
 0x3d4   :  { %v2014_v12 = vsel %vm646_vm6, %v27790_v9, -inf }
 0x3d5   :  { %2015 = vmax.xlane.f32.xlu0 %v2014_v12 }
 0x45d   :  { %v1099_v13 = vpop.xlane.xlu1 %1098 }
 0x45e   :  { %v1100_v17 = vsub.f32 %v27789_v4, %v1099_v13 }
 0x460   :  { %v1101_v18 = vmul.f32 1.442695, %v1100_v17 }
 0x462   :  { %28208 = vpow2.f32 %v1101_v18  ;;  %v2016_v19 = vpop.xlane.xlu0 %2015 }
 0x463   :  { %v2017_v20 = vsub.f32 %v27790_v9, %v2016_v19 }
 0x465   :  { %v2018_v21 = vmul.f32 1.442695, %v2017_v20 }
 0x467   :  { %28210 = vpow2.f32 %v2018_v21 }
 0x46c   :  { %v28209_v24 = vpop.eup %28208 }
 0x46d   :  { %v1103_v25 = vsel %vm646_vm6, %v28209_v24, 0.0 }
 0x46e   :  { %1104 = vadd.xlane.f32.xlu0 %v1103_v25 }
 0x471   :  { %v28211_v26 = vpop.eup %28210 }
 0x472   :  { %v2020_v27 = vsel %vm646_vm6, %v28211_v26, 0.0 }
 0x473   :  { %2021 = vadd.xlane.f32.xlu1 %v2020_v27 }
 0x484   :  { %2025 = vrot.lane.b32.xlu1 %v28477_v35, %s28326_s14  ;;  %1108 = vrot.lane.b32.xlu0 %v28477_v35, %s28327_s15 }
 0x488   :  { %2478 = vrot.lane.b32.xlu1 %v28394_v15, %s28328_s16  ;;  %2931 = vrot.lane.b32.xlu0 %v28389_v14, %s28328_s16 }
 0x48c   :  { %3383 = vrot.lane.b32.xlu1 %v28477_v35, %s28329_s17  ;;  %3385 = vrot.lane.b32.xlu0 %v28477_v35, %s28330_s18 }
 0x4fb   :  { %v1105_v6 = vpop.xlane.xlu0 %1104 }
 0x4fc   :  { %28212 = vrcp.f32 %v1105_v6 }
 0x4ff   :  { %v1109_v28 = vpop.permute.xlu0 %1108 }
 0x500   :  { %v1115_v29 = vand.u32 4294901760, %v1109_v28  ;;  %v2022_v30 = vpop.xlane.xlu1 %2021 }
 0x501   :  { %28214 = vrcp.f32 %v2022_v30 }
 0x502   :  { %25778 = vmatpush3.msra.mxu1 %v1115_v29  ;;  %v1192_v14 = vsub.f32 %v1109_v28, %v1115_v29 }
 0x503   :  { %25782 = vmatprep.subr.mxu1 %v28321_v32  ;;  %v2932_v3 = vpop.permute.xlu0 %2931 }
 0x504   :  { %v2026_v15 = vpop.permute.xlu1 %2025  ;;  %v1193_v38 = vand.u32 4294901760, %v1192_v14  ;;  %v28620_v4 = vand.u32 4294901760, %v2932_v3 }
 0x505   :  { %v2032_v49 = vand.u32 4294901760, %v2026_v15 }
 0x506   :  { %v28213_v31 = vpop.eup %28212  ;;  %v1194_v41 = vsub.f32 %v1192_v14, %v1193_v38  ;;  %v28623_v5 = vsub.f32 %v2932_v3, %v28620_v4 }
 0x507   :  { %v1107_v22 = vmul.f32 %v28213_v31, %v28209_v24  ;;  %v2109_v51 = vsub.f32 %v2026_v15, %v2032_v49  ;;  %v3386_v28 = vpop.permute.xlu0 %3385 }
 0x508   :  { %v28563_v23 = vpop.permute.xlu1 %2478  ;;  %v1195_v44 = vand.u32 4294901760, %v1194_v41  ;;  %v28627_v11 = vand.u32 4294901760, %v28623_v5  ;;  %v3389_v15 = vsel %vm646_vm6, %v3386_v28, 0 }
 0x509   :  { %v28566_v34 = vand.u32 4294901760, %v28563_v23  ;;  %v1112_v36 = vsel %vm646_vm6, %v1107_v22, 0  ;;  %v2110_v53 = vand.u32 4294901760, %v2109_v51  ;;  %v3392_v22 = vand.u32 4294901760, %v3389_v15 }
 0x50a   :  { %v1180_v37 = vand.u32 4294901760, %v1112_v36  ;;  %v3017_v20 = vsub.f32 %v28623_v5, %v28627_v11 }
 0x50b   :  { %25868 = vmatpush3.msra.mxu0 %v28566_v34  ;;  %v28215_v45 = vpop.eup %28214  ;;  %v2111_v55 = vsub.f32 %v2109_v51, %v2110_v53  ;;  %v28609_v58 = vsub.f32 %v28563_v23, %v28566_v34 }
 0x50c   :  { %v1181_v39 = vsub.f32 %v1112_v36, %v1180_v37  ;;  %25877 = vmatprep.subr.mxu0 %v28321_v32  ;;  %v2024_v46 = vmul.f32 %v28215_v45, %v28211_v26  ;;  %v28640_v26 = vand.u32 4294901760, %v3017_v20  ;;  %v3384_v6 = vpop.permute.xlu1 %3383  ;;  %v3469_v36 = vsub.f32 %v3389_v15, %v3392_v22 }
 0x50d   :  { %v2112_v57 = vand.u32 4294901760, %v2111_v55  ;;  %v28612_v59 = vand.u32 4294901760, %v28609_v58 }
 0x50e   :  { %v1182_v40 = vand.u32 4294901760, %v1181_v39  ;;  %v2029_v47 = vsel %vm646_vm6, %v2024_v46, 0 }
 0x50f   :  { %v2097_v48 = vand.u32 4294901760, %v2029_v47  ;;  %v2564_v60 = vsub.f32 %v28609_v58, %v28612_v59 }
 0x510   :  { %v1183_v42 = vsub.f32 %v1181_v39, %v1182_v40 }
 0x511   :  { %v2098_v50 = vsub.f32 %v2029_v47, %v2097_v48  ;;  %v28616_v61 = vand.u32 4294901760, %v2564_v60 }
 0x512   :  { %v1184_v43 = vand.u32 4294901760, %v1183_v42 }
 0x513   :  { %v2099_v52 = vand.u32 4294901760, %v2098_v50 }
 0x514   :  { %25780 = vmatmul.mubr.f32.vlgmr.msra.gmra.mrb[2].mxu1 %v1184_v43 }
 0x515   :  { %25783 = vmatpush3.msra.mxu1 %v1195_v44  ;;  %25784 = vmatprep.mubr.msk.f32.mxu1 %vm28322_vm5, %v28321_v32  ;;  %v2100_v54 = vsub.f32 %v2098_v50, %v2099_v52 }
 0x516   :  { %25787 = vmatprep.subr.mxu1 %v28321_v32 }
 0x517   :  { %v2101_v56 = vand.u32 4294901760, %v2100_v54 }
 0x51c   :  { %25785 = vmatmul.mubr.f32.vlgmr.msra.gmra.mrb[2].mxu1 %v1180_v37 }
 0x51d   :  { %25788 = vmatpush3.msra.mxu1 %v1192_v14  ;;  %25789 = vmatprep.mubr.msk.f32.mxu1 %vm28322_vm5, %v28321_v32 }
 0x51e   :  { %25792 = vmatprep.subr.mxu1 %v28321_v32 }
 0x524   :  { %25790 = vmatmul.mubr.f32.vlgmr.msra.gmra.mrb[2].mxu1 %v1181_v39 }
 0x525   :  { %25793 = vmatpush3.msra.mxu1 %v1115_v29  ;;  %25794 = vmatprep.mubr.msk.f32.mxu1 %vm28322_vm5, %v28321_v32 }
 0x526   :  { %25797 = vmatprep.subr.mxu1 %v28321_v32 }
 0x52c   :  { %25795 = vmatmul.mubr.f32.vlgmr.msra.gmra.mrb[2].mxu1 %v1182_v40 }
 0x52d   :  { %25798 = vmatpush3.msra.mxu1 %v1193_v38  ;;  %25799 = vmatprep.mubr.msk.f32.mxu1 %vm28322_vm5, %v28321_v32  ;;  %v3470_v38 = vand.u32 4294901760, %v3469_v36 }
 0x52e   :  { %25802 = vmatprep.subr.mxu1 %v28321_v32 }
 0x52f   :  { %v3471_v40 = vsub.f32 %v3469_v36, %v3470_v38 }
 0x531   :  { %v3472_v42 = vand.u32 4294901760, %v3471_v40 }
 0x534   :  { %25800 = vmatmul.mubr.f32.vlgmr.msra.gmra.mrb[2].mxu1 %v1180_v37 }
 0x535   :  { %25803 = vmatpush3.msra.mxu1 %v1115_v29  ;;  %25804 = vmatprep.mubr.msk.f32.mxu1 %vm28322_vm5, %v28321_v32  ;;  %v3387_v29 = vsel %vm646_vm6, %v3384_v6, 0 }
 0x536   :  { %25837 = vmatprep.subr.mxu1 %v28321_v32  ;;  %v3457_v31 = vand.u32 4294901760, %v3387_v29 }
 0x538   :  { %v3458_v23 = vsub.f32 %v3387_v29, %v3457_v31 }
 0x53c   :  { %25805 = vmatmul.mubr.f32.vlgmr.msra.gmra.mrb[2].mxu1 %v1180_v37  ;;  %v3459_v37 = vand.u32 4294901760, %v3458_v23 }
 0x53d   :  { %25838 = vmatpush3.msra.mxu1 %v2032_v49  ;;  %25839 = vmatprep.mubr.msk.f32.mxu1 %vm28322_vm5, %v28321_v32 }
 0x53e   :  { %25842 = vmatprep.subr.mxu1 %v28321_v32  ;;  %v3460_v39 = vsub.f32 %v3458_v23, %v3459_v37 }
 0x540   :  { %25840 = vmatmul.mubr.f32.vlgmr.msra.gmra.mrb[4].mxu1 %v2101_v56  ;;  %v3461_v41 = vand.u32 4294901760, %v3460_v39 }
 0x541   :  { %25843 = vmatpush3.msra.mxu1 %v2112_v57  ;;  %25844 = vmatprep.mubr.msk.f32.mxu1 %vm28322_vm5, %v28321_v32 }
 0x542   :  { %25847 = vmatprep.subr.mxu1 %v28321_v32 }
 0x548   :  { %25845 = vmatmul.mubr.f32.vlgmr.msra.gmra.mrb[4].mxu1 %v2097_v48 }
 0x549   :  { %25848 = vmatpush3.msra.mxu1 %v2109_v51  ;;  %25849 = vmatprep.mubr.msk.f32.mxu1 %vm28322_vm5, %v28321_v32 }
 0x54a   :  { %25852 = vmatprep.subr.mxu1 %v28321_v32 }
 0x550   :  { %25850 = vmatmul.mubr.f32.vlgmr.msra.gmra.mrb[4].mxu1 %v2098_v50 }
 0x551   :  { %25853 = vmatpush3.msra.mxu1 %v2032_v49  ;;  %25854 = vmatprep.mubr.msk.f32.mxu1 %vm28322_vm5, %v28321_v32 }
 0x552   :  { %25857 = vmatprep.subr.mxu1 %v28321_v32 }
 0x558   :  { %25855 = vmatmul.mubr.f32.vlgmr.msra.gmra.mrb[4].mxu1 %v2099_v52 }
 0x559   :  { %25858 = vmatpush3.msra.mxu1 %v2110_v53  ;;  %25859 = vmatprep.mubr.msk.f32.mxu1 %vm28322_vm5, %v28321_v32 }
 0x55a   :  { %25862 = vmatprep.subr.mxu1 %v28321_v32 }
 0x560   :  { %25860 = vmatmul.mubr.f32.vlgmr.msra.gmra.mrb[4].mxu1 %v2097_v48 }
 0x561   :  { %25863 = vmatpush3.msra.mxu1 %v2032_v49  ;;  %25864 = vmatprep.mubr.msk.f32.mxu1 %vm28322_vm5, %v28321_v32 }
 0x562   :  { %25872 = vmatprep.subr.mxu1 %v28321_v32 }
 0x568   :  { %25865 = vmatmul.mubr.f32.vlgmr.msra.gmra.mrb[4].mxu1 %v2097_v48 }
 0x569   :  { %25874 = vmatprep.mubr.msk.f32.mxu1 %vm28322_vm5, %v28321_v32  ;;  %25873 = vmatpush3.msra.mxu1 %v28616_v61 }
 0x56a   :  { %25882 = vmatprep.subr.mxu1 %v28321_v32 }
 0x60f   :  { %v1556_v63 = vpop.f32.mrb[2].mxu1 }
 0x610   :  { %v25806_v0 = vpop.f32.mrb[3].mxu1  ;;  %v2935_v13 = vsel %vm646_vm6, %v1556_v63, 0 }
 0x611   :  { %v3003_v18 = vand.u32 4294901760, %v2935_v13 }
 0x613   :  { %v3004_v24 = vsub.f32 %v2935_v13, %v3003_v18 }
 0x615   :  { %v3005_v27 = vand.u32 4294901760, %v3004_v24 }
 0x617   :  { %v3006_v30 = vsub.f32 %v3004_v24, %v3005_v27 }
 0x619   :  { %v3007_v14 = vand.u32 4294901760, %v3006_v30 }
 0x63b   :  { %v2473_v7 = vpop.f32.mrb[4].mxu1 }
 0x63c   :  { %v2482_v8 = vsel %vm646_vm6, %v2473_v7, 0  ;;  %v25866_v9 = vpop.f32.mrb[5].mxu1 }
 0x63d   :  { %v2550_v12 = vand.u32 4294901760, %v2482_v8 }
 0x63f   :  { %v2551_v17 = vsub.f32 %v2482_v8, %v2550_v12  ;;  %25875 = vmatmul.mubr.f32.vlgmr.msra.gmra.mrb[6].mxu1 %v2550_v12 }
 0x640   :  { %25883 = vmatpush3.msra.mxu1 %v28566_v34  ;;  %25884 = vmatprep.mubr.msk.f32.mxu1 %vm28322_vm5, %v28321_v32 }
 0x641   :  { %v2552_v19 = vand.u32 4294901760, %v2551_v17  ;;  %25892 = vmatprep.subr.mxu1 %v28321_v32 }
 0x643   :  { %v2553_v21 = vsub.f32 %v2551_v17, %v2552_v19  ;;  %25885 = vmatmul.mubr.f32.vlgmr.msra.gmra.mrb[8].mxu1 %v2552_v19 }
 0x644   :  { %25893 = vmatpush3.msra.mxu1 %v28566_v34  ;;  %25894 = vmatprep.mubr.msk.f32.mxu1 %vm28322_vm5, %v28321_v32 }
 0x645   :  { %v2554_v25 = vand.u32 4294901760, %v2553_v21  ;;  %25902 = vmatprep.subr.mxu1 %v28321_v32 }
 0x647   :  { %25870 = vmatmul.mubr.f32.vlgmr.msra.gmra.mrb[4].mxu0 %v2554_v25  ;;  %25895 = vmatmul.mubr.f32.vlgmr.msra.gmra.mrb[10].mxu1 %v2550_v12 }
 0x648   :  { %25878 = vmatpush3.msra.mxu0 %v28609_v58  ;;  %25879 = vmatprep.mubr.msk.f32.mxu0 %vm28322_vm5, %v28321_v32 }
 0x649   :  { %25887 = vmatprep.subr.mxu0 %v28321_v32  ;;  %25903 = vmatpush3.msra.mxu1 %v28640_v26 }
 0x64a   :  { %25904 = vmatprep.mubr.msk.f32.mxu1 %vm28322_vm5, %v28321_v32  ;;  %25912 = vmatprep.subr.mxu1 %v28321_v32 }
 0x64b   :  { %25880 = vmatmul.mubr.f32.vlgmr.msra.gmra.mrb[6].mxu0 %v2551_v17  ;;  %25905 = vmatmul.mubr.f32.vlgmr.msra.gmra.mrb[12].mxu1 %v3003_v18 }
 0x64c   :  { %25888 = vmatpush3.msra.mxu0 %v28612_v59  ;;  %25889 = vmatprep.mubr.msk.f32.mxu0 %vm28322_vm5, %v28321_v32 }
 0x64d   :  { %25913 = vmatpush3.msra.mxu1 %v28620_v4  ;;  %25914 = vmatprep.mubr.msk.f32.mxu1 %vm28322_vm5, %v28321_v32 }
 0x64e   :  { %25897 = vmatprep.subr.mxu0 %v28321_v32  ;;  %25922 = vmatprep.subr.mxu1 %v28321_v32 }
 0x64f   :  { %25890 = vmatmul.mubr.f32.vlgmr.msra.gmra.mrb[8].mxu0 %v2550_v12  ;;  %25915 = vmatmul.mubr.f32.vlgmr.msra.gmra.mrb[14].mxu1 %v3005_v27 }
 0x650   :  { %25898 = vmatpush3.msra.mxu0 %v28620_v4  ;;  %25899 = vmatprep.mubr.msk.f32.mxu0 %vm28322_vm5, %v28321_v32 }
 0x651   :  { %25907 = vmatprep.subr.mxu0 %v28321_v32  ;;  %25923 = vmatpush3.msra.mxu1 %v28620_v4 }
 0x652   :  { %25924 = vmatprep.mubr.msk.f32.mxu1 %vm28322_vm5, %v28321_v32  ;;  %25957 = vmatprep.subr.mxu1 %v28321_v32 }
 0x653   :  { %25900 = vmatmul.mubr.f32.vlgmr.msra.gmra.mrb[10].mxu0 %v3007_v14  ;;  %25925 = vmatmul.mubr.f32.vlgmr.msra.gmra.mrb[16].mxu1 %v3003_v18 }
 0x654   :  { %25908 = vmatpush3.msra.mxu0 %v28623_v5  ;;  %25909 = vmatprep.mubr.msk.f32.mxu0 %vm28322_vm5, %v28321_v32 }
 0x655   :  { %25917 = vmatprep.subr.mxu0 %v28321_v32  ;;  %25959 = vmatprep.mubr.msk.f32.mxu1 %vm28322_vm5, %v28321_v32 }
 0x657   :  { %25910 = vmatmul.mubr.f32.vlgmr.msra.gmra.mrb[12].mxu0 %v3004_v24 }
 0x658   :  { %25918 = vmatpush3.msra.mxu0 %v28627_v11  ;;  %25919 = vmatprep.mubr.msk.f32.mxu0 %vm28322_vm5, %v28321_v32 }
 0x659   :  { %25927 = vmatprep.subr.mxu0 %v28321_v32 }
 0x65b   :  { %25920 = vmatmul.mubr.f32.vlgmr.msra.gmra.mrb[14].mxu0 %v3003_v18 }
 0x65c   :  { %25929 = vmatprep.mubr.msk.f32.mxu0 %vm28322_vm5, %v28321_v32 }
 0x65f   :  { %25928 = vmatpush3.xpose.msra.mxu0 %v3392_v22 }
 0x660   :  { %25932 = vmatprep.subr.mxu0 %v28321_v32 }
 0x662   :  { %25930 = vmatmul.mubr.f32.vlgmr.msra.gmra.mrb[16].mxu0 %v3461_v41 }
 0x663   :  { %25933 = vmatpush3.xpose.msra.mxu0 %v3472_v42  ;;  %25934 = vmatprep.mubr.msk.f32.mxu0 %vm28322_vm5, %v28321_v32 }
 0x664   :  { %25937 = vmatprep.subr.mxu0 %v28321_v32 }
 0x66a   :  { %25935 = vmatmul.mubr.f32.vlgmr.msra.gmra.mrb[16].mxu0 %v3457_v31 }
 0x66b   :  { %25938 = vmatpush3.xpose.msra.mxu0 %v3469_v36  ;;  %25939 = vmatprep.mubr.msk.f32.mxu0 %vm28322_vm5, %v28321_v32 }
 0x66c   :  { %25942 = vmatprep.subr.mxu0 %v28321_v32 }
 0x672   :  { %25940 = vmatmul.mubr.f32.vlgmr.msra.gmra.mrb[16].mxu0 %v3458_v23 }
 0x673   :  { %25943 = vmatpush3.xpose.msra.mxu0 %v3392_v22  ;;  %25944 = vmatprep.mubr.msk.f32.mxu0 %vm28322_vm5, %v28321_v32 }
 0x674   :  { %25947 = vmatprep.subr.mxu0 %v28321_v32 }
 0x67a   :  { %25945 = vmatmul.mubr.f32.vlgmr.msra.gmra.mrb[16].mxu0 %v3459_v37 }
 0x67b   :  { %25948 = vmatpush3.xpose.msra.mxu0 %v3470_v38  ;;  %25949 = vmatprep.mubr.msk.f32.mxu0 %vm28322_vm5, %v28321_v32 }
 0x67c   :  { %25952 = vmatprep.subr.mxu0 %v28321_v32 }
 0x682   :  { %25950 = vmatmul.mubr.f32.vlgmr.msra.gmra.mrb[16].mxu0 %v3457_v31 }
 0x683   :  { %25953 = vmatpush3.xpose.msra.mxu0 %v3392_v22  ;;  %25954 = vmatprep.mubr.msk.f32.mxu0 %vm28322_vm5, %v28321_v32 }
 0x684   :  { %25987 = vmatprep.subr.mxu0 %v28321_v32 }
 0x68a   :  { %25955 = vmatmul.mubr.f32.vlgmr.msra.gmra.mrb[16].mxu0 %v3457_v31 }
 0x68b   :  { %25989 = vmatprep.mubr.msk.f32.mxu0 %vm28322_vm5, %v28321_v32 }
 0x712   :  { %v2632_v43 = vpop.f32.mrb[6].mxu1 }
 0x713   :  { %v25876_v44 = vpop.f32.mrb[7].mxu1 }
 0x716   :  { %v2780_v45 = vpop.f32.mrb[8].mxu1 }
 0x717   :  { %v25886_v46 = vpop.f32.mrb[9].mxu1 }
 0x71a   :  { %v2556_v47 = vpop.f32.mrb[4].mxu0  ;;  %v2926_v48 = vpop.f32.mrb[10].mxu1 }
 0x71b   :  { %v2633_v49 = vadd.f32 %v2632_v43, %v2556_v47  ;;  %v25871_v50 = vpop.f32.mrb[5].mxu0  ;;  %v25896_v51 = vpop.f32.mrb[11].mxu1 }
 0x71e   :  { %v2706_v52 = vpop.f32.mrb[6].mxu0  ;;  %v3085_v53 = vpop.f32.mrb[12].mxu1 }
 0x71f   :  { %v2707_v54 = vadd.f32 %v2706_v52, %v2633_v49  ;;  %v25881_v55 = vpop.f32.mrb[7].mxu0  ;;  %v25906_v56 = vpop.f32.mrb[13].mxu1 }
 0x721   :  { %v2781_v57 = vadd.f32 %v2780_v45, %v2707_v54 }
 0x722   :  { %v2854_v60 = vpop.f32.mrb[8].mxu0  ;;  %v3233_v63 = vpop.f32.mrb[14].mxu1 }
 0x723   :  { %v2855_v0 = vadd.f32 %v2854_v60, %v2781_v57  ;;  %v25891_v3 = vpop.f32.mrb[9].mxu0  ;;  %v25916_v7 = vpop.f32.mrb[15].mxu1 }
 0x725   :  { %v2927_v8 = vadd.f32 %v2926_v48, %v2855_v0 }
 0x726   :  { %v3009_v9 = vpop.f32.mrb[10].mxu0  ;;  %v3379_v12 = vpop.f32.mrb[16].mxu1 }
 0x727   :  { %v3010_v13 = vadd.f32 %v3009_v9, %v2927_v8  ;;  %v25901_v17 = vpop.f32.mrb[11].mxu0  ;;  %v25926_v18 = vpop.f32.mrb[17].mxu1 }
 0x729   :  { %v3086_v19 = vadd.f32 %v3085_v53, %v3010_v13 }
 0x72a   :  { %v3159_v20 = vpop.f32.mrb[12].mxu0 }
 0x72b   :  { %v3160_v21 = vadd.f32 %v3159_v20, %v3086_v19  ;;  %v25911_v24 = vpop.f32.mrb[13].mxu0 }
 0x72d   :  { %v3234_v25 = vadd.f32 %v3233_v63, %v3160_v21 }
 0x72e   :  { %v3307_v27 = vpop.f32.mrb[14].mxu0 }
 0x72f   :  { %v3308_v6 = vadd.f32 %v3307_v27, %v3234_v25  ;;  %v25921_v28 = vpop.f32.mrb[15].mxu0 }
 0x731   :  { %v28698_v29 = vadd.f32 %v3379_v12, %v3308_v6 }
 0x75d   :  { %v3833_v30 = vpop.f32.mrb[16].mxu0 }
 0x75e   :  { %v27791_v15 = vadd.f32 %v3833_v30, %v28542_v1  ;;  %v25956_v31 = vpop.f32.mrb[17].mxu0 }
 0x760   :  { %v3837_v22 = vsel %vm646_vm6, %v27791_v15, -inf }
 0x761   :  { %3838 = vmax.xlane.f32.xlu1 %v3837_v22 }
 0x772   :  { %4301 = vrot.lane.b32.xlu1 %v28399_v16, %s28328_s16 }
 0x776   :  { %4754 = vrot.lane.b32.xlu1 %v28477_v35, %s28331_s19 }
 0x7ee   :  { %v3839_v14 = vpop.xlane.xlu1 %3838 }
 0x7ef   :  { %v3840_v23 = vsub.f32 %v27791_v15, %v3839_v14 }
 0x7f1   :  { %v3841_v36 = vmul.f32 1.442695, %v3840_v23 }
 0x7f2   :  { %v4302_v37 = vpop.permute.xlu1 %4301 }
 0x7f3   :  { %28216 = vpow2.f32 %v3841_v36  ;;  %v28706_v38 = vand.u32 4294901760, %v4302_v37 }
 0x7f5   :  { %25988 = vmatpush3.msra.mxu0 %v28706_v38  ;;  %v28735_v55 = vsub.f32 %v4302_v37, %v28706_v38 }
 0x7f6   :  { %25997 = vmatprep.subr.mxu0 %v28321_v32  ;;  %v4755_v8 = vpop.permute.xlu1 %4754 }
 0x7f7   :  { %v28738_v56 = vand.u32 4294901760, %v28735_v55  ;;  %v4758_v13 = vsel %vm646_vm6, %v4755_v8, 0 }
 0x7f8   :  { %v4828_v20 = vand.u32 4294901760, %v4758_v13 }
 0x7f9   :  { %v4387_v57 = vsub.f32 %v28735_v55, %v28738_v56 }
 0x7fa   :  { %v4829_v25 = vsub.f32 %v4758_v13, %v4828_v20 }
 0x7fb   :  { %v28742_v60 = vand.u32 4294901760, %v4387_v57 }
 0x7fc   :  { %v4830_v6 = vand.u32 4294901760, %v4829_v25 }
 0x7fd   :  { %v28217_v39 = vpop.eup %28216 }
 0x7fe   :  { %v3843_v40 = vsel %vm646_vm6, %v28217_v39, 0.0  ;;  %v4831_v30 = vsub.f32 %v4829_v25, %v4830_v6 }
 0x7ff   :  { %3844 = vadd.xlane.f32.xlu0 %v3843_v40 }
 0x800   :  { %v4832_v31 = vand.u32 4294901760, %v4831_v30 }
 0x815   :  { %3848 = vrot.lane.b32.xlu0 %v28477_v35, %s28332_s20 }
 0x819   :  { %4756 = vrot.lane.b32.xlu0 %v28477_v35, %s28333_s21 }
 0x88c   :  { %v3845_v16 = vpop.xlane.xlu0 %3844 }
 0x88d   :  { %28218 = vrcp.f32 %v3845_v16 }
 0x890   :  { %v3849_v41 = vpop.permute.xlu0 %3848 }
 0x891   :  { %v3855_v42 = vand.u32 4294901760, %v3849_v41 }
 0x893   :  { %25958 = vmatpush3.msra.mxu1 %v3855_v42  ;;  %v3932_v45 = vsub.f32 %v3849_v41, %v3855_v42 }
 0x894   :  { %25962 = vmatprep.subr.mxu1 %v28321_v32  ;;  %v4757_v9 = vpop.permute.xlu0 %4756 }
 0x895   :  { %v3933_v48 = vand.u32 4294901760, %v3932_v45  ;;  %v4760_v18 = vsel %vm646_vm6, %v4757_v9, 0 }
 0x896   :  { %v4763_v21 = vand.u32 4294901760, %v4760_v18 }
 0x897   :  { %v28219_v43 = vpop.eup %28218  ;;  %v3934_v51 = vsub.f32 %v3932_v45, %v3933_v48 }
 0x898   :  { %v3847_v44 = vmul.f32 %v28219_v43, %v28217_v39  ;;  %v4840_v27 = vsub.f32 %v4760_v18, %v4763_v21 }
 0x899   :  { %v3935_v54 = vand.u32 4294901760, %v3934_v51 }
 0x89a   :  { %v3852_v46 = vsel %vm646_vm6, %v3847_v44, 0  ;;  %v4841_v28 = vand.u32 4294901760, %v4840_v27 }
 0x89b   :  { %v3920_v47 = vand.u32 4294901760, %v3852_v46 }
 0x89c   :  { %v4842_v15 = vsub.f32 %v4840_v27, %v4841_v28 }
 0x89d   :  { %v3921_v49 = vsub.f32 %v3852_v46, %v3920_v47 }
 0x89e   :  { %v4843_v22 = vand.u32 4294901760, %v4842_v15 }
 0x89f   :  { %v3922_v50 = vand.u32 4294901760, %v3921_v49 }
 0x8a1   :  { %v3923_v52 = vsub.f32 %v3921_v49, %v3922_v50 }
 0x8a3   :  { %v3924_v53 = vand.u32 4294901760, %v3923_v52 }
 0x8a5   :  { %25960 = vmatmul.mubr.f32.vlgmr.msra.gmra.mrb[18].mxu1 %v3924_v53 }
 0x8a6   :  { %25963 = vmatpush3.msra.mxu1 %v3935_v54  ;;  %25964 = vmatprep.mubr.msk.f32.mxu1 %vm28322_vm5, %v28321_v32 }
 0x8a7   :  { %25967 = vmatprep.subr.mxu1 %v28321_v32 }
 0x8ad   :  { %25965 = vmatmul.mubr.f32.vlgmr.msra.gmra.mrb[18].mxu1 %v3920_v47 }
 0x8ae   :  { %25968 = vmatpush3.msra.mxu1 %v3932_v45  ;;  %25969 = vmatprep.mubr.msk.f32.mxu1 %vm28322_vm5, %v28321_v32 }
 0x8af   :  { %25972 = vmatprep.subr.mxu1 %v28321_v32 }
 0x8b5   :  { %25970 = vmatmul.mubr.f32.vlgmr.msra.gmra.mrb[18].mxu1 %v3921_v49 }
 0x8b6   :  { %25973 = vmatpush3.msra.mxu1 %v3855_v42  ;;  %25974 = vmatprep.mubr.msk.f32.mxu1 %vm28322_vm5, %v28321_v32 }
 0x8b7   :  { %25977 = vmatprep.subr.mxu1 %v28321_v32 }
 0x8bd   :  { %25975 = vmatmul.mubr.f32.vlgmr.msra.gmra.mrb[18].mxu1 %v3922_v50 }
 0x8be   :  { %25978 = vmatpush3.msra.mxu1 %v3933_v48  ;;  %25979 = vmatprep.mubr.msk.f32.mxu1 %vm28322_vm5, %v28321_v32 }
 0x8bf   :  { %25982 = vmatprep.subr.mxu1 %v28321_v32 }
 0x8c5   :  { %25980 = vmatmul.mubr.f32.vlgmr.msra.gmra.mrb[18].mxu1 %v3920_v47 }
 0x8c6   :  { %25983 = vmatpush3.msra.mxu1 %v3855_v42  ;;  %25984 = vmatprep.mubr.msk.f32.mxu1 %vm28322_vm5, %v28321_v32 }
 0x8c7   :  { %25992 = vmatprep.subr.mxu1 %v28321_v32 }
 0x8cd   :  { %25985 = vmatmul.mubr.f32.vlgmr.msra.gmra.mrb[18].mxu1 %v3920_v47 }
 0x8ce   :  { %25994 = vmatprep.mubr.msk.f32.mxu1 %vm28322_vm5, %v28321_v32  ;;  %25993 = vmatpush3.msra.mxu1 %v28742_v60 }
 0x8cf   :  { %26002 = vmatprep.subr.mxu1 %v28321_v32 }
 0x9a0   :  { %v4296_v63 = vpop.f32.mrb[18].mxu1 }
 0x9a1   :  { %v4305_v0 = vsel %vm646_vm6, %v4296_v63, 0  ;;  %v25986_v3 = vpop.f32.mrb[19].mxu1  ;;  %v28288_v63 = vld [vmem:[%s30258_s4 + $0x48] sm:$0xff] }
 0x9a2   :  { %v4373_v7 = vand.u32 4294901760, %v4305_v0 }
 0x9a4   :  { %v4374_v12 = vsub.f32 %v4305_v0, %v4373_v7  ;;  %25995 = vmatmul.mubr.f32.vlgmr.msra.gmra.mrb[20].mxu1 %v4373_v7 }
 0x9a5   :  { %26003 = vmatpush3.msra.mxu1 %v28706_v38  ;;  %26004 = vmatprep.mubr.msk.f32.mxu1 %vm28322_vm5, %v28321_v32 }
 0x9a6   :  { %v4375_v17 = vand.u32 4294901760, %v4374_v12  ;;  %26012 = vmatprep.subr.mxu1 %v28321_v32 }
 0x9a8   :  { %v4376_v19 = vsub.f32 %v4374_v12, %v4375_v17  ;;  %26005 = vmatmul.mubr.f32.vlgmr.msra.gmra.mrb[22].mxu1 %v4375_v17 }
 0x9a9   :  { %26013 = vmatpush3.msra.mxu1 %v28706_v38  ;;  %26014 = vmatprep.mubr.msk.f32.mxu1 %vm28322_vm5, %v28321_v32 }
 0x9aa   :  { %v4377_v24 = vand.u32 4294901760, %v4376_v19  ;;  %26047 = vmatprep.subr.mxu1 %v28321_v32 }
 0x9ac   :  { %25990 = vmatmul.mubr.f32.vlgmr.msra.gmra.mrb[18].mxu0 %v4377_v24  ;;  %26015 = vmatmul.mubr.f32.vlgmr.msra.gmra.mrb[24].mxu1 %v4373_v7 }
 0x9ad   :  { %25998 = vmatpush3.msra.mxu0 %v28735_v55  ;;  %25999 = vmatprep.mubr.msk.f32.mxu0 %vm28322_vm5, %v28321_v32 }
 0x9ae   :  { %26007 = vmatprep.subr.mxu0 %v28321_v32  ;;  %26049 = vmatprep.mubr.msk.f32.mxu1 %vm28322_vm5, %v28321_v32 }
 0x9b0   :  { %26000 = vmatmul.mubr.f32.vlgmr.msra.gmra.mrb[20].mxu0 %v4374_v12 }
 0x9b1   :  { %26008 = vmatpush3.msra.mxu0 %v28738_v56  ;;  %26009 = vmatprep.mubr.msk.f32.mxu0 %vm28322_vm5, %v28321_v32 }
 0x9b2   :  { %26017 = vmatprep.subr.mxu0 %v28321_v32 }
 0x9b4   :  { %26010 = vmatmul.mubr.f32.vlgmr.msra.gmra.mrb[22].mxu0 %v4373_v7 }
 0x9b5   :  { %26019 = vmatprep.mubr.msk.f32.mxu0 %vm28322_vm5, %v28321_v32 }
 0x9b8   :  { %26018 = vmatpush3.xpose.msra.mxu0 %v4763_v21 }
 0x9b9   :  { %26022 = vmatprep.subr.mxu0 %v28321_v32 }
 0x9bb   :  { %26020 = vmatmul.mubr.f32.vlgmr.msra.gmra.mrb[24].mxu0 %v4832_v31 }
 0x9bc   :  { %26023 = vmatpush3.xpose.msra.mxu0 %v4843_v22  ;;  %26024 = vmatprep.mubr.msk.f32.mxu0 %vm28322_vm5, %v28321_v32 }
 0x9bd   :  { %26027 = vmatprep.subr.mxu0 %v28321_v32 }
 0x9c3   :  { %26025 = vmatmul.mubr.f32.vlgmr.msra.gmra.mrb[24].mxu0 %v4828_v20 }
 0x9c4   :  { %26028 = vmatpush3.xpose.msra.mxu0 %v4840_v27  ;;  %26029 = vmatprep.mubr.msk.f32.mxu0 %vm28322_vm5, %v28321_v32 }
 0x9c5   :  { %26032 = vmatprep.subr.mxu0 %v28321_v32 }
 0x9cb   :  { %26030 = vmatmul.mubr.f32.vlgmr.msra.gmra.mrb[24].mxu0 %v4829_v25 }
 0x9cc   :  { %26033 = vmatpush3.xpose.msra.mxu0 %v4763_v21  ;;  %26034 = vmatprep.mubr.msk.f32.mxu0 %vm28322_vm5, %v28321_v32 }
 0x9cd   :  { %26037 = vmatprep.subr.mxu0 %v28321_v32 }
 0x9d3   :  { %26035 = vmatmul.mubr.f32.vlgmr.msra.gmra.mrb[24].mxu0 %v4830_v6 }
 0x9d4   :  { %26038 = vmatpush3.xpose.msra.mxu0 %v4841_v28  ;;  %26039 = vmatprep.mubr.msk.f32.mxu0 %vm28322_vm5, %v28321_v32 }
 0x9d5   :  { %26042 = vmatprep.subr.mxu0 %v28321_v32 }
 0x9db   :  { %26040 = vmatmul.mubr.f32.vlgmr.msra.gmra.mrb[24].mxu0 %v4828_v20 }
 0x9dc   :  { %26043 = vmatpush3.xpose.msra.mxu0 %v4763_v21  ;;  %26044 = vmatprep.mubr.msk.f32.mxu0 %vm28322_vm5, %v28321_v32 }
 0x9dd   :  { %26077 = vmatprep.subr.mxu0 %v28321_v32 }
 0x9e3   :  { %26045 = vmatmul.mubr.f32.vlgmr.msra.gmra.mrb[24].mxu0 %v4828_v20 }
 0x9e4   :  { %26079 = vmatprep.mubr.msk.f32.mxu0 %vm28322_vm5, %v28321_v32 }
 0xa77   :  { %v4455_v14 = vpop.f32.mrb[20].mxu1 }
 0xa78   :  { %v25996_v23 = vpop.f32.mrb[21].mxu1 }
 0xa7b   :  { %v4603_v36 = vpop.f32.mrb[22].mxu1 }
 0xa7c   :  { %v26006_v37 = vpop.f32.mrb[23].mxu1 }
 0xa7f   :  { %v4379_v39 = vpop.f32.mrb[18].mxu0  ;;  %v4749_v40 = vpop.f32.mrb[24].mxu1 }
 0xa80   :  { %v4456_v16 = vadd.f32 %v4455_v14, %v4379_v39  ;;  %v25991_v41 = vpop.f32.mrb[19].mxu0  ;;  %v26016_v42 = vpop.f32.mrb[25].mxu1 }
 0xa83   :  { %v4529_v43 = vpop.f32.mrb[20].mxu0 }
 0xa84   :  { %v4530_v44 = vadd.f32 %v4529_v43, %v4456_v16  ;;  %v26001_v45 = vpop.f32.mrb[21].mxu0  ;;  %v6130_v43 = vsel %vm646_vm6, %v28475_v33, 0 }
 0xa86   :  { %v4604_v46 = vadd.f32 %v4603_v36, %v4530_v44 }
 0xa87   :  { %v4677_v47 = vpop.f32.mrb[22].mxu0 }
 0xa88   :  { %v4678_v48 = vadd.f32 %v4677_v47, %v4604_v46  ;;  %v26011_v49 = vpop.f32.mrb[23].mxu0  ;;  %v6200_v46 = vand.u32 4294901760, %v6130_v43 }
 0xa8a   :  { %v4750_v50 = vadd.f32 %v4749_v40, %v4678_v48  ;;  %v6201_v49 = vsub.f32 %v6130_v43, %v6200_v46 }
 0xa8c   :  { %v28788_v51 = vadd.f32 %v4750_v50, %v28698_v29 }
 0xab6   :  { %v5204_v52 = vpop.f32.mrb[24].mxu0 }
 0xab7   :  { %v27792_v53 = vadd.f32 %v5204_v52, %v28542_v1  ;;  %v26046_v54 = vpop.f32.mrb[25].mxu0  ;;  %v6202_v52 = vand.u32 4294901760, %v6201_v49 }
 0xab9   :  { %v5208_v57 = vsel %vm646_vm6, %v27792_v53, -inf  ;;  %v6203_v54 = vsub.f32 %v6201_v49, %v6202_v52 }
 0xaba   :  { %5209 = vmax.xlane.f32.xlu1 %v5208_v57 }
 0xacb   :  { %5672 = vrot.lane.b32.xlu1 %v28288_v63, %s28328_s16  ;;  %v6204_v63 = vand.u32 4294901760, %v6203_v54 }
 0xacf   :  { %6128 = vrot.lane.b32.xlu1 %v28475_v33, %s28324_s10 }
 0xad3   :  { %7045 = vrot.lane.b32.xlu1 %v28475_v33, %s28325_s11 }
 0xb47   :  { %v5210_v29 = vpop.xlane.xlu1 %5209 }
 0xb48   :  { %v5211_v0 = vsub.f32 %v27792_v53, %v5210_v29 }
 0xb4a   :  { %v5212_v3 = vmul.f32 1.442695, %v5211_v0 }
 0xb4b   :  { %v5673_v1 = vpop.permute.xlu1 %5672 }
 0xb4c   :  { %28220 = vpow2.f32 %v5212_v3  ;;  %v28800_v7 = vand.u32 4294901760, %v5673_v1 }
 0xb4e   :  { %26078 = vmatpush3.msra.mxu0 %v28800_v7  ;;  %v28829_v31 = vsub.f32 %v5673_v1, %v28800_v7 }
 0xb4f   :  { %26087 = vmatprep.subr.mxu0 %v28321_v32  ;;  %v6129_v16 = vpop.permute.xlu1 %6128 }
 0xb50   :  { %v28832_v22 = vand.u32 4294901760, %v28829_v31  ;;  %v6132_v44 = vsel %vm646_vm6, %v6129_v16, 0 }
 0xb51   :  { %v6135_v47 = vand.u32 4294901760, %v6132_v44 }
 0xb52   :  { %v5758_v14 = vsub.f32 %v28829_v31, %v28832_v22 }
 0xb53   :  { %v6212_v50 = vsub.f32 %v6132_v44, %v6135_v47  ;;  %v7046_v3 = vpop.permute.xlu1 %7045 }
 0xb54   :  { %v28836_v23 = vand.u32 4294901760, %v5758_v14 }
 0xb55   :  { %v6213_v53 = vand.u32 4294901760, %v6212_v50 }
 0xb56   :  { %v28221_v8 = vpop.eup %28220 }
 0xb57   :  { %v5214_v9 = vsel %vm646_vm6, %v28221_v8, 0.0  ;;  %v6214_v57 = vsub.f32 %v6212_v50, %v6213_v53 }
 0xb58   :  { %5215 = vadd.xlane.f32.xlu0 %v5214_v9 }
 0xb59   :  { %v6215_v29 = vand.u32 4294901760, %v6214_v57 }
 0xb6e   :  { %5219 = vrot.lane.b32.xlu0 %v28477_v35, %s28334_s24 }
 0xb72   :  { %7043 = vrot.lane.b32.xlu0 %v28475_v33, %s28323_s9 }
 0xbe5   :  { %v5216_v12 = vpop.xlane.xlu0 %5215 }
 0xbe6   :  { %28222 = vrcp.f32 %v5216_v12 }
 0xbe9   :  { %v5220_v13 = vpop.permute.xlu0 %5219 }
 0xbea   :  { %v5226_v17 = vand.u32 4294901760, %v5220_v13 }
 0xbec   :  { %26048 = vmatpush3.msra.mxu1 %v5226_v17  ;;  %v5303_v20 = vsub.f32 %v5220_v13, %v5226_v17 }
 0xbed   :  { %26052 = vmatprep.subr.mxu1 %v28321_v32  ;;  %v7044_v0 = vpop.permute.xlu0 %7043 }
 0xbee   :  { %v5304_v25 = vand.u32 4294901760, %v5303_v20  ;;  %v7047_v1 = vsel %vm646_vm6, %v7044_v0, 0 }
 0xbef   :  { %v7117_v9 = vand.u32 4294901760, %v7047_v1 }
 0xbf0   :  { %v28223_v18 = vpop.eup %28222  ;;  %v5305_v35 = vsub.f32 %v5303_v20, %v5304_v25 }
 0xbf1   :  { %v5218_v19 = vmul.f32 %v28223_v18, %v28221_v8  ;;  %v7049_v8 = vsel %vm646_vm6, %v7046_v3, 0  ;;  %v7118_v13 = vsub.f32 %v7047_v1, %v7117_v9 }
 0xbf2   :  { %v5306_v15 = vand.u32 4294901760, %v5305_v35  ;;  %v7052_v12 = vand.u32 4294901760, %v7049_v8 }
 0xbf3   :  { %v5223_v21 = vsel %vm646_vm6, %v5218_v19, 0  ;;  %v7119_v18 = vand.u32 4294901760, %v7118_v13 }
 0xbf4   :  { %v5291_v24 = vand.u32 4294901760, %v5223_v21 }
 0xbf6   :  { %v5292_v27 = vsub.f32 %v5223_v21, %v5291_v24 }
 0xbf8   :  { %v5293_v6 = vand.u32 4294901760, %v5292_v27 }
 0xbfa   :  { %v5294_v28 = vsub.f32 %v5292_v27, %v5293_v6 }
 0xbfc   :  { %v5295_v30 = vand.u32 4294901760, %v5294_v28 }
 0xbfe   :  { %26050 = vmatmul.mubr.f32.vlgmr.msra.gmra.mrb[26].mxu1 %v5295_v30 }
 0xbff   :  { %26053 = vmatpush3.msra.mxu1 %v5306_v15  ;;  %26054 = vmatprep.mubr.msk.f32.mxu1 %vm28322_vm5, %v28321_v32 }
 0xc00   :  { %26057 = vmatprep.subr.mxu1 %v28321_v32 }
 0xc06   :  { %26055 = vmatmul.mubr.f32.vlgmr.msra.gmra.mrb[26].mxu1 %v5291_v24 }
 0xc07   :  { %26058 = vmatpush3.msra.mxu1 %v5303_v20  ;;  %26059 = vmatprep.mubr.msk.f32.mxu1 %vm28322_vm5, %v28321_v32  ;;  %v7120_v20 = vsub.f32 %v7118_v13, %v7119_v18 }
 0xc08   :  { %26062 = vmatprep.subr.mxu1 %v28321_v32 }
 0xc0e   :  { %26060 = vmatmul.mubr.f32.vlgmr.msra.gmra.mrb[26].mxu1 %v5292_v27 }
 0xc0f   :  { %26063 = vmatpush3.msra.mxu1 %v5226_v17  ;;  %26064 = vmatprep.mubr.msk.f32.mxu1 %vm28322_vm5, %v28321_v32 }
 0xc10   :  { %26067 = vmatprep.subr.mxu1 %v28321_v32 }
 0xc16   :  { %26065 = vmatmul.mubr.f32.vlgmr.msra.gmra.mrb[26].mxu1 %v5293_v6 }
 0xc17   :  { %26068 = vmatpush3.msra.mxu1 %v5304_v25  ;;  %26069 = vmatprep.mubr.msk.f32.mxu1 %vm28322_vm5, %v28321_v32 }
 0xc18   :  { %26072 = vmatprep.subr.mxu1 %v28321_v32 }
 0xc1e   :  { %26070 = vmatmul.mubr.f32.vlgmr.msra.gmra.mrb[26].mxu1 %v5291_v24 }
 0xc1f   :  { %26073 = vmatpush3.msra.mxu1 %v5226_v17  ;;  %26074 = vmatprep.mubr.msk.f32.mxu1 %vm28322_vm5, %v28321_v32  ;;  %v7129_v17 = vsub.f32 %v7049_v8, %v7052_v12 }
 0xc20   :  { %26082 = vmatprep.subr.mxu1 %v28321_v32 }
 0xc21   :  { %v7130_v19 = vand.u32 4294901760, %v7129_v17 }
 0xc23   :  { %v7131_v21 = vsub.f32 %v7129_v17, %v7130_v19 }
 0xc25   :  { %v7132_v25 = vand.u32 4294901760, %v7131_v21 }
 0xc26   :  { %26075 = vmatmul.mubr.f32.vlgmr.msra.gmra.mrb[26].mxu1 %v5291_v24  ;;  %v7121_v24 = vand.u32 4294901760, %v7120_v20 }
 0xc27   :  { %26084 = vmatprep.mubr.msk.f32.mxu1 %vm28322_vm5, %v28321_v32  ;;  %26083 = vmatpush3.msra.mxu1 %v28836_v23 }
 0xc28   :  { %26092 = vmatprep.subr.mxu1 %v28321_v32 }
 0xcf9   :  { %v5667_v36 = vpop.f32.mrb[26].mxu1 }
 0xcfa   :  { %v5676_v37 = vsel %vm646_vm6, %v5667_v36, 0  ;;  %v26076_v39 = vpop.f32.mrb[27].mxu1 }
 0xcfb   :  { %v5744_v40 = vand.u32 4294901760, %v5676_v37 }
 0xcfd   :  { %v5745_v41 = vsub.f32 %v5676_v37, %v5744_v40  ;;  %26085 = vmatmul.mubr.f32.vlgmr.msra.gmra.mrb[28].mxu1 %v5744_v40 }
 0xcfe   :  { %26093 = vmatpush3.msra.mxu1 %v28800_v7  ;;  %26094 = vmatprep.mubr.msk.f32.mxu1 %vm28322_vm5, %v28321_v32 }
 0xcff   :  { %v5746_v42 = vand.u32 4294901760, %v5745_v41  ;;  %26102 = vmatprep.subr.mxu1 %v28321_v32 }
 0xd01   :  { %v5747_v45 = vsub.f32 %v5745_v41, %v5746_v42  ;;  %26095 = vmatmul.mubr.f32.vlgmr.msra.gmra.mrb[30].mxu1 %v5746_v42 }
 0xd02   :  { %26103 = vmatpush3.msra.mxu1 %v28800_v7  ;;  %26104 = vmatprep.mubr.msk.f32.mxu1 %vm28322_vm5, %v28321_v32 }
 0xd03   :  { %v5748_v48 = vand.u32 4294901760, %v5747_v45  ;;  %26137 = vmatprep.subr.mxu1 %v28321_v32 }
 0xd05   :  { %26080 = vmatmul.mubr.f32.vlgmr.msra.gmra.mrb[26].mxu0 %v5748_v48  ;;  %26105 = vmatmul.mubr.f32.vlgmr.msra.gmra.mrb[32].mxu1 %v5744_v40 }
 0xd06   :  { %26088 = vmatpush3.msra.mxu0 %v28829_v31  ;;  %26089 = vmatprep.mubr.msk.f32.mxu0 %vm28322_vm5, %v28321_v32 }
 0xd07   :  { %26097 = vmatprep.subr.mxu0 %v28321_v32  ;;  %26139 = vmatprep.mubr.msk.f32.mxu1 %vm28322_vm5, %v28321_v32 }
 0xd09   :  { %26090 = vmatmul.mubr.f32.vlgmr.msra.gmra.mrb[28].mxu0 %v5745_v41 }
 0xd0a   :  { %26098 = vmatpush3.msra.mxu0 %v28832_v22  ;;  %26099 = vmatprep.mubr.msk.f32.mxu0 %vm28322_vm5, %v28321_v32 }
 0xd0b   :  { %26107 = vmatprep.subr.mxu0 %v28321_v32 }
 0xd0d   :  { %26100 = vmatmul.mubr.f32.vlgmr.msra.gmra.mrb[30].mxu0 %v5744_v40 }
 0xd0e   :  { %26109 = vmatprep.mubr.msk.f32.mxu0 %vm28322_vm5, %v28321_v32 }
 0xd11   :  { %26108 = vmatpush3.xpose.msra.mxu0 %v6135_v47 }
 0xd12   :  { %26112 = vmatprep.subr.mxu0 %v28321_v32 }
 0xd14   :  { %26110 = vmatmul.mubr.f32.vlgmr.msra.gmra.mrb[32].mxu0 %v6204_v63 }
 0xd15   :  { %26113 = vmatpush3.xpose.msra.mxu0 %v6215_v29  ;;  %26114 = vmatprep.mubr.msk.f32.mxu0 %vm28322_vm5, %v28321_v32 }
 0xd16   :  { %26117 = vmatprep.subr.mxu0 %v28321_v32 }
 0xd1c   :  { %26115 = vmatmul.mubr.f32.vlgmr.msra.gmra.mrb[32].mxu0 %v6200_v46 }
 0xd1d   :  { %26118 = vmatpush3.xpose.msra.mxu0 %v6212_v50  ;;  %26119 = vmatprep.mubr.msk.f32.mxu0 %vm28322_vm5, %v28321_v32 }
 0xd1e   :  { %26122 = vmatprep.subr.mxu0 %v28321_v32 }
 0xd24   :  { %26120 = vmatmul.mubr.f32.vlgmr.msra.gmra.mrb[32].mxu0 %v6201_v49 }
 0xd25   :  { %26123 = vmatpush3.xpose.msra.mxu0 %v6135_v47  ;;  %26124 = vmatprep.mubr.msk.f32.mxu0 %vm28322_vm5, %v28321_v32 }
 0xd26   :  { %26127 = vmatprep.subr.mxu0 %v28321_v32 }
 0xd2c   :  { %26125 = vmatmul.mubr.f32.vlgmr.msra.gmra.mrb[32].mxu0 %v6202_v52 }
 0xd2d   :  { %26128 = vmatpush3.xpose.msra.mxu0 %v6213_v53  ;;  %26129 = vmatprep.mubr.msk.f32.mxu0 %vm28322_vm5, %v28321_v32 }
 0xd2e   :  { %26132 = vmatprep.subr.mxu0 %v28321_v32 }
 0xd34   :  { %26130 = vmatmul.mubr.f32.vlgmr.msra.gmra.mrb[32].mxu0 %v6200_v46 }
 0xd35   :  { %26133 = vmatpush3.xpose.msra.mxu0 %v6135_v47  ;;  %26134 = vmatprep.mubr.msk.f32.mxu0 %vm28322_vm5, %v28321_v32  ;;  %v640_v47 = vld [vmem:[%s30256_s2 + $0x8] sm:$0xff] }
 0xd36   :  { %26167 = vmatprep.subr.mxu0 %v28321_v32  ;;  %vm6125_vm8 = vcmp.eq.f32.partialorder %v640_v47, 0.0 }
 0xd37   :  { %v28911_v48 = vsel %vm6125_vm8, -1e+09, %v28321_v32 }
 0xd3c   :  { %26135 = vmatmul.mubr.f32.vlgmr.msra.gmra.mrb[32].mxu0 %v6200_v46 }
 0xd3d   :  { %26168 = vmatpush3.xpose.msra.mxu0 %v7052_v12  ;;  %26169 = vmatprep.mubr.msk.f32.mxu0 %vm28322_vm5, %v28321_v32 }
 0xd3e   :  { %26172 = vmatprep.subr.mxu0 %v28321_v32 }
 0xd40   :  { %26170 = vmatmul.mubr.f32.vlgmr.msra.gmra.mrb[34].mxu0 %v7121_v24 }
 0xd41   :  { %26173 = vmatpush3.xpose.msra.mxu0 %v7132_v25  ;;  %26174 = vmatprep.mubr.msk.f32.mxu0 %vm28322_vm5, %v28321_v32 }
 0xd42   :  { %26177 = vmatprep.subr.mxu0 %v28321_v32 }
 0xd48   :  { %26175 = vmatmul.mubr.f32.vlgmr.msra.gmra.mrb[34].mxu0 %v7117_v9 }
 0xd49   :  { %26178 = vmatpush3.xpose.msra.mxu0 %v7129_v17  ;;  %26179 = vmatprep.mubr.msk.f32.mxu0 %vm28322_vm5, %v28321_v32 }
 0xd4a   :  { %26182 = vmatprep.subr.mxu0 %v28321_v32 }
 0xd50   :  { %26180 = vmatmul.mubr.f32.vlgmr.msra.gmra.mrb[34].mxu0 %v7118_v13 }
 0xd51   :  { %26183 = vmatpush3.xpose.msra.mxu0 %v7052_v12  ;;  %26184 = vmatprep.mubr.msk.f32.mxu0 %vm28322_vm5, %v28321_v32 }
 0xd52   :  { %26187 = vmatprep.subr.mxu0 %v28321_v32 }
 0xd58   :  { %26185 = vmatmul.mubr.f32.vlgmr.msra.gmra.mrb[34].mxu0 %v7119_v18 }
 0xd59   :  { %26188 = vmatpush3.xpose.msra.mxu0 %v7130_v19  ;;  %26189 = vmatprep.mubr.msk.f32.mxu0 %vm28322_vm5, %v28321_v32 }
 0xd5a   :  { %26192 = vmatprep.subr.mxu0 %v28321_v32 }
 0xd60   :  { %26190 = vmatmul.mubr.f32.vlgmr.msra.gmra.mrb[34].mxu0 %v7117_v9 }
 0xd61   :  { %26193 = vmatpush3.xpose.msra.mxu0 %v7052_v12  ;;  %26194 = vmatprep.mubr.msk.f32.mxu0 %vm28322_vm5, %v28321_v32 }
 0xd62   :  { %26227 = vmatprep.subr.mxu0 %v28321_v32 }
 0xd68   :  { %26195 = vmatmul.mubr.f32.vlgmr.msra.gmra.mrb[34].mxu0 %v7117_v9 }
 0xd69   :  { %26228 = vmatpush3.msra.mxu0 %v28566_v34  ;;  %26229 = vmatprep.mubr.msk.f32.mxu0 %vm28322_vm5, %v28321_v32 }
 0xd6a   :  { %26237 = vmatprep.subr.mxu0 %v28321_v32 }
 0xdd0   :  { %v5826_v27 = vpop.f32.mrb[28].mxu1 }
 0xdd1   :  { %v26086_v6 = vpop.f32.mrb[29].mxu1 }
 0xdd4   :  { %v5974_v35 = vpop.f32.mrb[30].mxu1 }
 0xdd5   :  { %v26096_v28 = vpop.f32.mrb[31].mxu1 }
 0xdd8   :  { %v5750_v30 = vpop.f32.mrb[26].mxu0  ;;  %v6120_v15 = vpop.f32.mrb[32].mxu1 }
 0xdd9   :  { %v5827_v14 = vadd.f32 %v5826_v27, %v5750_v30  ;;  %v26081_v36 = vpop.f32.mrb[27].mxu0  ;;  %v26106_v37 = vpop.f32.mrb[33].mxu1 }
 0xddc   :  { %v5900_v39 = vpop.f32.mrb[28].mxu0 }
 0xddd   :  { %v5901_v40 = vadd.f32 %v5900_v39, %v5827_v14  ;;  %v26091_v16 = vpop.f32.mrb[29].mxu0 }
 0xddf   :  { %v5975_v41 = vadd.f32 %v5974_v35, %v5901_v40 }
 0xde0   :  { %v6048_v42 = vpop.f32.mrb[30].mxu0 }
 0xde1   :  { %v6049_v43 = vadd.f32 %v6048_v42, %v5975_v41  ;;  %v26101_v44 = vpop.f32.mrb[31].mxu0 }
 0xde3   :  { %v6121_v45 = vadd.f32 %v6120_v15, %v6049_v43 }
 0xde5   :  { %v28905_v46 = vadd.f32 %v6121_v45, %v28788_v51 }
 0xe0f   :  { %v6576_v49 = vpop.f32.mrb[32].mxu0 }
 0xe10   :  { %v27793_v50 = vadd.f32 %v6576_v49, %v28911_v48  ;;  %v26136_v52 = vpop.f32.mrb[33].mxu0 }
 0xe12   :  { %v6580_v53 = vsel %vm646_vm6, %v27793_v50, -inf }
 0xe13   :  { %6581 = vmax.xlane.f32.xlu0 %v6580_v53 }
 0xe3b   :  { %v7493_v54 = vpop.f32.mrb[34].mxu0 }
 0xe3c   :  { %v27794_v57 = vadd.f32 %v7493_v54, %v28911_v48  ;;  %v26196_v51 = vpop.f32.mrb[35].mxu0 }
 0xe3e   :  { %v7497_v63 = vsel %vm646_vm6, %v27794_v57, -inf }
 0xe3f   :  { %7498 = vmax.xlane.f32.xlu1 %v7497_v63 }
 0xea0   :  { %v6582_v29 = vpop.xlane.xlu0 %6581 }
 0xea1   :  { %v6583_v0 = vsub.f32 %v27793_v50, %v6582_v29 }
 0xea3   :  { %v6584_v3 = vmul.f32 1.442695, %v6583_v0 }
 0xea5   :  { %28224 = vpow2.f32 %v6584_v3 }
 0xeaf   :  { %v28225_v1 = vpop.eup %28224 }
 0xeb0   :  { %v6586_v8 = vsel %vm646_vm6, %v28225_v1, 0.0 }
 0xeb1   :  { %6587 = vadd.xlane.f32.xlu0 %v6586_v8 }
 0xec7   :  { %6591 = vrot.lane.b32.xlu0 %v28475_v33, %s28327_s15 }
 0xecb   :  { %8858 = vrot.lane.b32.xlu0 %v28475_v33, %s28329_s17 }
 0xecc   :  { %v7499_v9 = vpop.xlane.xlu1 %7498 }
 0xecd   :  { %v7500_v12 = vsub.f32 %v27794_v57, %v7499_v9 }
 0xecf   :  { %v7501_v13 = vmul.f32 1.442695, %v7500_v12 }
 0xed1   :  { %28226 = vpow2.f32 %v7501_v13 }
 0xedb   :  { %v28227_v17 = vpop.eup %28226 }
 0xedc   :  { %v7503_v18 = vsel %vm646_vm6, %v28227_v17, 0.0 }
 0xedd   :  { %7504 = vadd.xlane.f32.xlu1 %v7503_v18 }
 0xeee   :  { %7508 = vrot.lane.b32.xlu1 %v28475_v33, %s28326_s14 }
 0xef2   :  { %8860 = vrot.lane.b32.xlu1 %v28475_v33, %s28330_s18 }
 0xf3e   :  { %v6588_v19 = vpop.xlane.xlu0 %6587 }
 0xf3f   :  { %28228 = vrcp.f32 %v6588_v19 }
 0xf42   :  { %v6592_v20 = vpop.permute.xlu0 %6591 }
 0xf43   :  { %v6598_v21 = vand.u32 4294901760, %v6592_v20 }
 0xf45   :  { %26138 = vmatpush3.msra.mxu1 %v6598_v21  ;;  %v6675_v27 = vsub.f32 %v6592_v20, %v6598_v21 }
 0xf46   :  { %26142 = vmatprep.subr.mxu1 %v28321_v32 }
 0xf47   :  { %v6676_v28 = vand.u32 4294901760, %v6675_v27 }
 0xf49   :  { %v28229_v24 = vpop.eup %28228  ;;  %v6677_v14 = vsub.f32 %v6675_v27, %v6676_v28 }
 0xf4a   :  { %v6590_v25 = vmul.f32 %v28229_v24, %v28225_v1 }
 0xf4b   :  { %v6678_v39 = vand.u32 4294901760, %v6677_v14 }
 0xf4c   :  { %v6595_v6 = vsel %vm646_vm6, %v6590_v25, 0 }
 0xf4d   :  { %v6663_v35 = vand.u32 4294901760, %v6595_v6 }
 0xf4f   :  { %v6664_v30 = vsub.f32 %v6595_v6, %v6663_v35 }
 0xf51   :  { %v6665_v15 = vand.u32 4294901760, %v6664_v30 }
 0xf53   :  { %v6666_v36 = vsub.f32 %v6664_v30, %v6665_v15 }
 0xf55   :  { %v6667_v37 = vand.u32 4294901760, %v6666_v36 }
 0xf57   :  { %26140 = vmatmul.mubr.f32.vlgmr.msra.gmra.mrb[34].mxu1 %v6667_v37 }
 0xf58   :  { %26143 = vmatpush3.msra.mxu1 %v6678_v39  ;;  %26144 = vmatprep.mubr.msk.f32.mxu1 %vm28322_vm5, %v28321_v32 }
 0xf59   :  { %26147 = vmatprep.subr.mxu1 %v28321_v32 }
 0xf5f   :  { %26145 = vmatmul.mubr.f32.vlgmr.msra.gmra.mrb[34].mxu1 %v6663_v35 }
 0xf60   :  { %26148 = vmatpush3.msra.mxu1 %v6675_v27  ;;  %26149 = vmatprep.mubr.msk.f32.mxu1 %vm28322_vm5, %v28321_v32 }
 0xf61   :  { %26152 = vmatprep.subr.mxu1 %v28321_v32 }
 0xf67   :  { %26150 = vmatmul.mubr.f32.vlgmr.msra.gmra.mrb[34].mxu1 %v6664_v30 }
 0xf68   :  { %26153 = vmatpush3.msra.mxu1 %v6598_v21  ;;  %26154 = vmatprep.mubr.msk.f32.mxu1 %vm28322_vm5, %v28321_v32 }
 0xf69   :  { %26157 = vmatprep.subr.mxu1 %v28321_v32 }
 0xf6a   :  { %v7505_v40 = vpop.xlane.xlu1 %7504 }
 0xf6b   :  { %28230 = vrcp.f32 %v7505_v40 }
 0xf6e   :  { %v7509_v16 = vpop.permute.xlu1 %7508 }
 0xf6f   :  { %26155 = vmatmul.mubr.f32.vlgmr.msra.gmra.mrb[34].mxu1 %v6665_v15  ;;  %v7515_v41 = vand.u32 4294901760, %v7509_v16 }
 0xf70   :  { %26158 = vmatpush3.msra.mxu1 %v6676_v28  ;;  %26159 = vmatprep.mubr.msk.f32.mxu1 %vm28322_vm5, %v28321_v32 }
 0xf71   :  { %26162 = vmatprep.subr.mxu1 %v28321_v32  ;;  %v7592_v44 = vsub.f32 %v7509_v16, %v7515_v41 }
 0xf73   :  { %v7593_v49 = vand.u32 4294901760, %v7592_v44 }
 0xf75   :  { %v28231_v42 = vpop.eup %28230  ;;  %v7594_v53 = vsub.f32 %v7592_v44, %v7593_v49 }
 0xf76   :  { %v7507_v43 = vmul.f32 %v28231_v42, %v28227_v17 }
 0xf77   :  { %26160 = vmatmul.mubr.f32.vlgmr.msra.gmra.mrb[34].mxu1 %v6663_v35  ;;  %v7595_v51 = vand.u32 4294901760, %v7594_v53 }
 0xf78   :  { %26163 = vmatpush3.msra.mxu1 %v6598_v21  ;;  %26164 = vmatprep.mubr.msk.f32.mxu1 %vm28322_vm5, %v28321_v32  ;;  %v7512_v45 = vsel %vm646_vm6, %v7507_v43, 0  ;;  %v8861_v21 = vpop.permute.xlu1 %8860 }
 0xf79   :  { %26197 = vmatprep.subr.mxu1 %v28321_v32  ;;  %v7580_v47 = vand.u32 4294901760, %v7512_v45  ;;  %v8864_v24 = vsel %vm646_vm6, %v8861_v21, 0 }
 0xf7a   :  { %v8867_v25 = vand.u32 4294901760, %v8864_v24 }
 0xf7b   :  { %v7581_v50 = vsub.f32 %v7512_v45, %v7580_v47 }
 0xf7d   :  { %v7582_v52 = vand.u32 4294901760, %v7581_v50 }
 0xf7f   :  { %26165 = vmatmul.mubr.f32.vlgmr.msra.gmra.mrb[34].mxu1 %v6663_v35  ;;  %v7583_v54 = vsub.f32 %v7581_v50, %v7582_v52 }
 0xf80   :  { %26198 = vmatpush3.msra.mxu1 %v7515_v41  ;;  %26199 = vmatprep.mubr.msk.f32.mxu1 %vm28322_vm5, %v28321_v32 }
 0xf81   :  { %26202 = vmatprep.subr.mxu1 %v28321_v32  ;;  %v7584_v57 = vand.u32 4294901760, %v7583_v54 }
 0xf83   :  { %26200 = vmatmul.mubr.f32.vlgmr.msra.gmra.mrb[36].mxu1 %v7584_v57 }
 0xf84   :  { %26203 = vmatpush3.msra.mxu1 %v7595_v51  ;;  %26204 = vmatprep.mubr.msk.f32.mxu1 %vm28322_vm5, %v28321_v32 }
 0xf85   :  { %26207 = vmatprep.subr.mxu1 %v28321_v32 }
 0xf8b   :  { %26205 = vmatmul.mubr.f32.vlgmr.msra.gmra.mrb[36].mxu1 %v7580_v47 }
 0xf8c   :  { %26208 = vmatpush3.msra.mxu1 %v7592_v44  ;;  %26209 = vmatprep.mubr.msk.f32.mxu1 %vm28322_vm5, %v28321_v32 }
 0xf8d   :  { %26212 = vmatprep.subr.mxu1 %v28321_v32 }
 0xf93   :  { %26210 = vmatmul.mubr.f32.vlgmr.msra.gmra.mrb[36].mxu1 %v7581_v50 }
 0xf94   :  { %26213 = vmatpush3.msra.mxu1 %v7515_v41  ;;  %26214 = vmatprep.mubr.msk.f32.mxu1 %vm28322_vm5, %v28321_v32 }
 0xf95   :  { %26217 = vmatprep.subr.mxu1 %v28321_v32 }
 0xf9b   :  { %26215 = vmatmul.mubr.f32.vlgmr.msra.gmra.mrb[36].mxu1 %v7582_v52 }
 0xf9c   :  { %26218 = vmatpush3.msra.mxu1 %v7593_v49  ;;  %26219 = vmatprep.mubr.msk.f32.mxu1 %vm28322_vm5, %v28321_v32 }
 0xf9d   :  { %26222 = vmatprep.subr.mxu1 %v28321_v32 }
 0xfa3   :  { %26220 = vmatmul.mubr.f32.vlgmr.msra.gmra.mrb[36].mxu1 %v7580_v47 }
 0xfa4   :  { %26223 = vmatpush3.msra.mxu1 %v7515_v41  ;;  %26224 = vmatprep.mubr.msk.f32.mxu1 %vm28322_vm5, %v28321_v32 }
 0xfa5   :  { %26232 = vmatprep.subr.mxu1 %v28321_v32 }
 0xfab   :  { %26225 = vmatmul.mubr.f32.vlgmr.msra.gmra.mrb[36].mxu1 %v7580_v47 }
 0xfac   :  { %26233 = vmatpush3.msra.mxu1 %v28616_v61  ;;  %26234 = vmatprep.mubr.msk.f32.mxu1 %vm28322_vm5, %v28321_v32 }
 0xfad   :  { %26242 = vmatprep.subr.mxu1 %v28321_v32 }
0x1052   :  { %v7039_v63 = vpop.f32.mrb[34].mxu1 }
0x1053   :  { %v26166_v29 = vpop.f32.mrb[35].mxu1  ;;  %v8410_v9 = vsel %vm646_vm6, %v7039_v63, 0 }
0x1054   :  { %v8478_v61 = vand.u32 4294901760, %v8410_v9 }
0x1056   :  { %v8479_v18 = vsub.f32 %v8410_v9, %v8478_v61 }
0x1058   :  { %v8480_v20 = vand.u32 4294901760, %v8479_v18 }
0x107e   :  { %v7956_v0 = vpop.f32.mrb[36].mxu1 }
0x107f   :  { %v7961_v3 = vsel %vm646_vm6, %v7956_v0, 0  ;;  %v26226_v1 = vpop.f32.mrb[37].mxu1 }
0x1080   :  { %v8029_v8 = vand.u32 4294901760, %v7961_v3 }
0x1082   :  { %v8030_v12 = vsub.f32 %v7961_v3, %v8029_v8  ;;  %26235 = vmatmul.mubr.f32.vlgmr.msra.gmra.mrb[38].mxu1 %v8029_v8 }
0x1083   :  { %26243 = vmatpush3.msra.mxu1 %v28566_v34  ;;  %26244 = vmatprep.mubr.msk.f32.mxu1 %vm28322_vm5, %v28321_v32 }
0x1084   :  { %v8031_v13 = vand.u32 4294901760, %v8030_v12  ;;  %26252 = vmatprep.subr.mxu1 %v28321_v32 }
0x1086   :  { %v8032_v17 = vsub.f32 %v8030_v12, %v8031_v13  ;;  %26245 = vmatmul.mubr.f32.vlgmr.msra.gmra.mrb[40].mxu1 %v8031_v13 }
0x1087   :  { %26253 = vmatpush3.msra.mxu1 %v28566_v34  ;;  %26254 = vmatprep.mubr.msk.f32.mxu1 %vm28322_vm5, %v28321_v32  ;;  %v8859_v34 = vpop.permute.xlu0 %8858 }
0x1088   :  { %v8033_v19 = vand.u32 4294901760, %v8032_v17  ;;  %26262 = vmatprep.subr.mxu1 %v28321_v32 }
0x108a   :  { %26230 = vmatmul.mubr.f32.vlgmr.msra.gmra.mrb[36].mxu0 %v8033_v19  ;;  %26255 = vmatmul.mubr.f32.vlgmr.msra.gmra.mrb[42].mxu1 %v8029_v8 }
0x108b   :  { %26238 = vmatpush3.msra.mxu0 %v28609_v58  ;;  %26263 = vmatpush3.msra.mxu1 %v28640_v26  ;;  %v8862_v58 = vsel %vm646_vm6, %v8859_v34, 0  ;;  %v8481_v26 = vsub.f32 %v8479_v18, %v8480_v20 }
0x108c   :  { %26239 = vmatprep.mubr.msk.f32.mxu0 %vm28322_vm5, %v28321_v32  ;;  %26247 = vmatprep.subr.mxu0 %v28321_v32 }
0x108d   :  { %26264 = vmatprep.mubr.msk.f32.mxu1 %vm28322_vm5, %v28321_v32  ;;  %26272 = vmatprep.subr.mxu1 %v28321_v32  ;;  %v8482_v27 = vand.u32 4294901760, %v8481_v26 }
0x108e   :  { %26240 = vmatmul.mubr.f32.vlgmr.msra.gmra.mrb[38].mxu0 %v8030_v12  ;;  %26265 = vmatmul.mubr.f32.vlgmr.msra.gmra.mrb[44].mxu1 %v8478_v61 }
0x108f   :  { %26248 = vmatpush3.msra.mxu0 %v28612_v59  ;;  %26273 = vmatpush3.msra.mxu1 %v28620_v4  ;;  %v8932_v59 = vand.u32 4294901760, %v8862_v58 }
0x1090   :  { %26249 = vmatprep.mubr.msk.f32.mxu0 %vm28322_vm5, %v28321_v32  ;;  %26257 = vmatprep.subr.mxu0 %v28321_v32 }
0x1091   :  { %26274 = vmatprep.mubr.msk.f32.mxu1 %vm28322_vm5, %v28321_v32  ;;  %26282 = vmatprep.subr.mxu1 %v28321_v32  ;;  %v8933_v6 = vsub.f32 %v8862_v58, %v8932_v59 }
0x1092   :  { %26250 = vmatmul.mubr.f32.vlgmr.msra.gmra.mrb[40].mxu0 %v8029_v8  ;;  %26275 = vmatmul.mubr.f32.vlgmr.msra.gmra.mrb[46].mxu1 %v8480_v20 }
0x1093   :  { %26258 = vmatpush3.msra.mxu0 %v28620_v4  ;;  %26283 = vmatpush3.msra.mxu1 %v28620_v4  ;;  %v8944_v4 = vsub.f32 %v8864_v24, %v8867_v25  ;;  %v8934_v35 = vand.u32 4294901760, %v8933_v6 }
0x1094   :  { %26259 = vmatprep.mubr.msk.f32.mxu0 %vm28322_vm5, %v28321_v32  ;;  %26267 = vmatprep.subr.mxu0 %v28321_v32 }
0x1095   :  { %26284 = vmatprep.mubr.msk.f32.mxu1 %vm28322_vm5, %v28321_v32  ;;  %26317 = vmatprep.subr.mxu1 %v28321_v32  ;;  %v8945_v28 = vand.u32 4294901760, %v8944_v4 }
0x1096   :  { %26260 = vmatmul.mubr.f32.vlgmr.msra.gmra.mrb[42].mxu0 %v8482_v27  ;;  %26285 = vmatmul.mubr.f32.vlgmr.msra.gmra.mrb[48].mxu1 %v8478_v61 }
0x1097   :  { %26268 = vmatpush3.msra.mxu0 %v28623_v5  ;;  %26269 = vmatprep.mubr.msk.f32.mxu0 %vm28322_vm5, %v28321_v32  ;;  %v8935_v5 = vsub.f32 %v8933_v6, %v8934_v35  ;;  %v8946_v30 = vsub.f32 %v8944_v4, %v8945_v28 }
0x1098   :  { %26277 = vmatprep.subr.mxu0 %v28321_v32  ;;  %26319 = vmatprep.mubr.msk.f32.mxu1 %vm28322_vm5, %v28321_v32 }
0x1099   :  { %v8936_v15 = vand.u32 4294901760, %v8935_v5  ;;  %v8947_v14 = vand.u32 4294901760, %v8946_v30 }
0x109a   :  { %26270 = vmatmul.mubr.f32.vlgmr.msra.gmra.mrb[44].mxu0 %v8479_v18 }
0x109b   :  { %26278 = vmatpush3.msra.mxu0 %v28627_v11  ;;  %26279 = vmatprep.mubr.msk.f32.mxu0 %vm28322_vm5, %v28321_v32 }
0x109c   :  { %26287 = vmatprep.subr.mxu0 %v28321_v32 }
0x109e   :  { %26280 = vmatmul.mubr.f32.vlgmr.msra.gmra.mrb[46].mxu0 %v8478_v61 }
0x109f   :  { %26289 = vmatprep.mubr.msk.f32.mxu0 %vm28322_vm5, %v28321_v32 }
0x10a2   :  { %26288 = vmatpush3.xpose.msra.mxu0 %v8867_v25 }
0x10a3   :  { %26292 = vmatprep.subr.mxu0 %v28321_v32 }
0x10a5   :  { %26290 = vmatmul.mubr.f32.vlgmr.msra.gmra.mrb[48].mxu0 %v8936_v15 }
0x10a6   :  { %26293 = vmatpush3.xpose.msra.mxu0 %v8947_v14  ;;  %26294 = vmatprep.mubr.msk.f32.mxu0 %vm28322_vm5, %v28321_v32 }
0x10a7   :  { %26297 = vmatprep.subr.mxu0 %v28321_v32 }
0x10ad   :  { %26295 = vmatmul.mubr.f32.vlgmr.msra.gmra.mrb[48].mxu0 %v8932_v59 }
0x10ae   :  { %26298 = vmatpush3.xpose.msra.mxu0 %v8944_v4  ;;  %26299 = vmatprep.mubr.msk.f32.mxu0 %vm28322_vm5, %v28321_v32 }
0x10af   :  { %26302 = vmatprep.subr.mxu0 %v28321_v32 }
0x10b5   :  { %26300 = vmatmul.mubr.f32.vlgmr.msra.gmra.mrb[48].mxu0 %v8933_v6 }
0x10b6   :  { %26303 = vmatpush3.xpose.msra.mxu0 %v8867_v25  ;;  %26304 = vmatprep.mubr.msk.f32.mxu0 %vm28322_vm5, %v28321_v32 }
0x10b7   :  { %26307 = vmatprep.subr.mxu0 %v28321_v32 }
0x10bd   :  { %26305 = vmatmul.mubr.f32.vlgmr.msra.gmra.mrb[48].mxu0 %v8934_v35 }
0x10be   :  { %26308 = vmatpush3.xpose.msra.mxu0 %v8945_v28  ;;  %26309 = vmatprep.mubr.msk.f32.mxu0 %vm28322_vm5, %v28321_v32 }
0x10bf   :  { %26312 = vmatprep.subr.mxu0 %v28321_v32 }
0x10c5   :  { %26310 = vmatmul.mubr.f32.vlgmr.msra.gmra.mrb[48].mxu0 %v8932_v59 }
0x10c6   :  { %26313 = vmatpush3.xpose.msra.mxu0 %v8867_v25  ;;  %26314 = vmatprep.mubr.msk.f32.mxu0 %vm28322_vm5, %v28321_v32 }
0x10c7   :  { %26347 = vmatprep.subr.mxu0 %v28321_v32 }
0x10cd   :  { %26315 = vmatmul.mubr.f32.vlgmr.msra.gmra.mrb[48].mxu0 %v8932_v59 }
0x10ce   :  { %26348 = vmatpush3.msra.mxu0 %v28706_v38  ;;  %26349 = vmatprep.mubr.msk.f32.mxu0 %vm28322_vm5, %v28321_v32 }
0x10cf   :  { %26357 = vmatprep.subr.mxu0 %v28321_v32 }
0x1155   :  { %v8111_v11 = vpop.f32.mrb[38].mxu1 }
0x1156   :  { %v26236_v36 = vpop.f32.mrb[39].mxu1 }
0x1159   :  { %v8259_v37 = vpop.f32.mrb[40].mxu1 }
0x115a   :  { %v26246_v39 = vpop.f32.mrb[41].mxu1 }
0x115d   :  { %v8035_v40 = vpop.f32.mrb[36].mxu0  ;;  %v8405_v16 = vpop.f32.mrb[42].mxu1 }
0x115e   :  { %v8112_v41 = vadd.f32 %v8111_v11, %v8035_v40  ;;  %v26231_v42 = vpop.f32.mrb[37].mxu0  ;;  %v26256_v43 = vpop.f32.mrb[43].mxu1 }
0x1161   :  { %v8185_v44 = vpop.f32.mrb[38].mxu0  ;;  %v8560_v45 = vpop.f32.mrb[44].mxu1 }
0x1162   :  { %v8186_v47 = vadd.f32 %v8185_v44, %v8112_v41  ;;  %v26241_v49 = vpop.f32.mrb[39].mxu0  ;;  %v26266_v50 = vpop.f32.mrb[45].mxu1 }
0x1164   :  { %v8260_v52 = vadd.f32 %v8259_v37, %v8186_v47 }
0x1165   :  { %v8333_v53 = vpop.f32.mrb[40].mxu0  ;;  %v8708_v54 = vpop.f32.mrb[46].mxu1 }
0x1166   :  { %v8334_v57 = vadd.f32 %v8333_v53, %v8260_v52  ;;  %v26251_v51 = vpop.f32.mrb[41].mxu0  ;;  %v26276_v63 = vpop.f32.mrb[47].mxu1 }
0x1168   :  { %v8406_v29 = vadd.f32 %v8405_v16, %v8334_v57 }
0x1169   :  { %v8484_v0 = vpop.f32.mrb[42].mxu0  ;;  %v8854_v3 = vpop.f32.mrb[48].mxu1 }
0x116a   :  { %v8485_v1 = vadd.f32 %v8484_v0, %v8406_v29  ;;  %v26261_v8 = vpop.f32.mrb[43].mxu0  ;;  %v26286_v9 = vpop.f32.mrb[49].mxu1 }
0x116c   :  { %v8561_v12 = vadd.f32 %v8560_v45, %v8485_v1 }
0x116d   :  { %v8634_v61 = vpop.f32.mrb[44].mxu0 }
0x116e   :  { %v8635_v13 = vadd.f32 %v8634_v61, %v8561_v12  ;;  %v26271_v17 = vpop.f32.mrb[45].mxu0 }
0x1170   :  { %v8709_v18 = vadd.f32 %v8708_v54, %v8635_v13 }
0x1171   :  { %v8782_v19 = vpop.f32.mrb[46].mxu0 }
0x1172   :  { %v8783_v20 = vadd.f32 %v8782_v19, %v8709_v18  ;;  %v26281_v34 = vpop.f32.mrb[47].mxu0 }
0x1174   :  { %v29035_v21 = vadd.f32 %v8854_v3, %v8783_v20 }
0x11a0   :  { %v9308_v58 = vpop.f32.mrb[48].mxu0 }
0x11a1   :  { %v27795_v26 = vadd.f32 %v9308_v58, %v28911_v48  ;;  %v26316_v24 = vpop.f32.mrb[49].mxu0 }
0x11a3   :  { %v9312_v59 = vsel %vm646_vm6, %v27795_v26, -inf }
0x11a4   :  { %9313 = vmax.xlane.f32.xlu0 %v9312_v59 }
0x11ba   :  { %9323 = vrot.lane.b32.xlu0 %v28475_v33, %s28332_s20 }
0x11be   :  { %10227 = vrot.lane.b32.xlu0 %v28475_v33, %s28333_s21 }
0x1231   :  { %v9314_v25 = vpop.xlane.xlu0 %9313 }
0x1232   :  { %v9315_v27 = vsub.f32 %v27795_v26, %v9314_v25 }
0x1234   :  { %v9316_v6 = vmul.f32 1.442695, %v9315_v27 }
0x1235   :  { %v9324_v4 = vpop.permute.xlu0 %9323 }
0x1236   :  { %28232 = vpow2.f32 %v9316_v6  ;;  %v9330_v35 = vand.u32 4294901760, %v9324_v4 }
0x1238   :  { %26318 = vmatpush3.msra.mxu1 %v9330_v35  ;;  %v9407_v14 = vsub.f32 %v9324_v4, %v9330_v35 }
0x1239   :  { %26322 = vmatprep.subr.mxu1 %v28321_v32  ;;  %v10228_v53 = vpop.permute.xlu0 %10227 }
0x123a   :  { %v9408_v39 = vand.u32 4294901760, %v9407_v14  ;;  %v10231_v51 = vsel %vm646_vm6, %v10228_v53, 0 }
0x123b   :  { %v10234_v0 = vand.u32 4294901760, %v10231_v51 }
0x123c   :  { %v9409_v41 = vsub.f32 %v9407_v14, %v9408_v39 }
0x123d   :  { %v10311_v8 = vsub.f32 %v10231_v51, %v10234_v0 }
0x123e   :  { %v9410_v44 = vand.u32 4294901760, %v9409_v41 }
0x123f   :  { %v10312_v9 = vand.u32 4294901760, %v10311_v8 }
0x1240   :  { %v28233_v28 = vpop.eup %28232 }
0x1241   :  { %v9318_v5 = vsel %vm646_vm6, %v28233_v28, 0.0  ;;  %v10313_v12 = vsub.f32 %v10311_v8, %v10312_v9 }
0x1242   :  { %9319 = vadd.xlane.f32.xlu1 %v9318_v5 }
0x1243   :  { %v10314_v13 = vand.u32 4294901760, %v10313_v12 }
0x1253   :  { %10225 = vrot.lane.b32.xlu1 %v28475_v33, %s28331_s19 }
0x12cf   :  { %v9320_v30 = vpop.xlane.xlu1 %9319 }
0x12d0   :  { %28234 = vrcp.f32 %v9320_v30 }
0x12d3   :  { %v10226_v52 = vpop.permute.xlu1 %10225 }
0x12da   :  { %v28235_v15 = vpop.eup %28234 }
0x12db   :  { %v9322_v11 = vmul.f32 %v28235_v15, %v28233_v28  ;;  %v11594_v15 = vsub.s32 1, %v28429_v62 }
0x12dd   :  { %v9327_v36 = vsel %vm646_vm6, %v9322_v11, 0 }
0x12de   :  { %v9395_v37 = vand.u32 4294901760, %v9327_v36 }
0x12e0   :  { %v9396_v40 = vsub.f32 %v9327_v36, %v9395_v37 }
0x12e2   :  { %v9397_v16 = vand.u32 4294901760, %v9396_v40 }
0x12e4   :  { %v9398_v42 = vsub.f32 %v9396_v40, %v9397_v16 }
0x12e6   :  { %v9399_v43 = vand.u32 4294901760, %v9398_v42 }
0x12e8   :  { %26320 = vmatmul.mubr.f32.vlgmr.msra.gmra.mrb[50].mxu1 %v9399_v43 }
0x12e9   :  { %26323 = vmatpush3.msra.mxu1 %v9410_v44  ;;  %26324 = vmatprep.mubr.msk.f32.mxu1 %vm28322_vm5, %v28321_v32 }
0x12ea   :  { %26327 = vmatprep.subr.mxu1 %v28321_v32 }
0x12f0   :  { %26325 = vmatmul.mubr.f32.vlgmr.msra.gmra.mrb[50].mxu1 %v9395_v37 }
0x12f1   :  { %26328 = vmatpush3.msra.mxu1 %v9407_v14  ;;  %26329 = vmatprep.mubr.msk.f32.mxu1 %vm28322_vm5, %v28321_v32  ;;  %v29117_v14 = vld [vmem:[%s30258_s4 + $0x120] sm:$0xff] }
0x12f2   :  { %26332 = vmatprep.subr.mxu1 %v28321_v32  ;;  %v29122_v11 = vrot.slane %v29117_v14, %v11594_v15 }
0x12f4   :  { %v11596_v36 = vadd.f32 %v29122_v11, %v28905_v46 }
0x12f8   :  { %26330 = vmatmul.mubr.f32.vlgmr.msra.gmra.mrb[50].mxu1 %v9396_v40 }
0x12f9   :  { %26333 = vmatpush3.msra.mxu1 %v9330_v35  ;;  %26334 = vmatprep.mubr.msk.f32.mxu1 %vm28322_vm5, %v28321_v32 }
0x12fa   :  { %26337 = vmatprep.subr.mxu1 %v28321_v32 }
0x1300   :  { %26335 = vmatmul.mubr.f32.vlgmr.msra.gmra.mrb[50].mxu1 %v9397_v16  ;;  %v28290_v16 = vld [vmem:[%s30254_s0] sm:$0xff] }
0x1301   :  { %26338 = vmatpush3.msra.mxu1 %v9408_v39  ;;  %26339 = vmatprep.mubr.msk.f32.mxu1 %vm28322_vm5, %v28321_v32  ;;  %v29131_v41 = vadd.f32 %v28290_v16, %v11596_v36 }
0x1302   :  { %26342 = vmatprep.subr.mxu1 %v28321_v32 }
0x1303   :  { %v11600_v42 = vsel %vm47_vm0, %v29131_v41, 0.0 }
0x1308   :  { %26340 = vmatmul.mubr.f32.vlgmr.msra.gmra.mrb[50].mxu1 %v9395_v37 }
0x1309   :  { %26343 = vmatpush3.msra.mxu1 %v9330_v35  ;;  %26344 = vmatprep.mubr.msk.f32.mxu1 %vm28322_vm5, %v28321_v32 }
0x130a   :  { %26352 = vmatprep.subr.mxu1 %v28321_v32 }
0x1310   :  { %26345 = vmatmul.mubr.f32.vlgmr.msra.gmra.mrb[50].mxu1 %v9395_v37 }
0x1311   :  { %26353 = vmatpush3.msra.mxu1 %v28742_v60  ;;  %26354 = vmatprep.mubr.msk.f32.mxu1 %vm28322_vm5, %v28321_v32  ;;  %v10229_v60 = vsel %vm646_vm6, %v10226_v52, 0 }
0x1312   :  { %26362 = vmatprep.subr.mxu1 %v28321_v32  ;;  %v10299_v29 = vand.u32 4294901760, %v10229_v60 }
0x1314   :  { %v10300_v1 = vsub.f32 %v10229_v60, %v10299_v29 }
0x13e3   :  { %v9771_v45 = vpop.f32.mrb[50].mxu1 }
0x13e4   :  { %v9776_v47 = vsel %vm646_vm6, %v9771_v45, 0  ;;  %v26346_v49 = vpop.f32.mrb[51].mxu1 }
0x13e5   :  { %v9844_v50 = vand.u32 4294901760, %v9776_v47 }
0x13e7   :  { %v9845_v54 = vsub.f32 %v9776_v47, %v9844_v50  ;;  %26355 = vmatmul.mubr.f32.vlgmr.msra.gmra.mrb[52].mxu1 %v9844_v50 }
0x13e8   :  { %26363 = vmatpush3.msra.mxu1 %v28706_v38  ;;  %26364 = vmatprep.mubr.msk.f32.mxu1 %vm28322_vm5, %v28321_v32 }
0x13e9   :  { %v9846_v57 = vand.u32 4294901760, %v9845_v54  ;;  %26372 = vmatprep.subr.mxu1 %v28321_v32 }
0x13eb   :  { %v9847_v63 = vsub.f32 %v9845_v54, %v9846_v57  ;;  %26365 = vmatmul.mubr.f32.vlgmr.msra.gmra.mrb[54].mxu1 %v9846_v57 }
0x13ec   :  { %26373 = vmatpush3.msra.mxu1 %v28706_v38  ;;  %26374 = vmatprep.mubr.msk.f32.mxu1 %vm28322_vm5, %v28321_v32  ;;  %v10301_v38 = vand.u32 4294901760, %v10300_v1 }
0x13ed   :  { %v9848_v3 = vand.u32 4294901760, %v9847_v63  ;;  %26407 = vmatprep.subr.mxu1 %v28321_v32 }
0x13ef   :  { %26350 = vmatmul.mubr.f32.vlgmr.msra.gmra.mrb[50].mxu0 %v9848_v3  ;;  %26375 = vmatmul.mubr.f32.vlgmr.msra.gmra.mrb[56].mxu1 %v9844_v50 }
0x13f0   :  { %26358 = vmatpush3.msra.mxu0 %v28735_v55  ;;  %26359 = vmatprep.mubr.msk.f32.mxu0 %vm28322_vm5, %v28321_v32  ;;  %v10302_v55 = vsub.f32 %v10300_v1, %v10301_v38 }
0x13f1   :  { %26367 = vmatprep.subr.mxu0 %v28321_v32  ;;  %26409 = vmatprep.mubr.msk.f32.mxu1 %vm28322_vm5, %v28321_v32 }
0x13f2   :  { %v10303_v61 = vand.u32 4294901760, %v10302_v55 }
0x13f3   :  { %26360 = vmatmul.mubr.f32.vlgmr.msra.gmra.mrb[52].mxu0 %v9845_v54 }
0x13f4   :  { %26368 = vmatpush3.msra.mxu0 %v28738_v56  ;;  %26369 = vmatprep.mubr.msk.f32.mxu0 %vm28322_vm5, %v28321_v32 }
0x13f5   :  { %26377 = vmatprep.subr.mxu0 %v28321_v32 }
0x13f7   :  { %26370 = vmatmul.mubr.f32.vlgmr.msra.gmra.mrb[54].mxu0 %v9844_v50 }
0x13f8   :  { %26379 = vmatprep.mubr.msk.f32.mxu0 %vm28322_vm5, %v28321_v32 }
0x13fb   :  { %26378 = vmatpush3.xpose.msra.mxu0 %v10234_v0 }
0x13fc   :  { %26382 = vmatprep.subr.mxu0 %v28321_v32 }
0x13fe   :  { %26380 = vmatmul.mubr.f32.vlgmr.msra.gmra.mrb[56].mxu0 %v10303_v61 }
0x13ff   :  { %26383 = vmatpush3.xpose.msra.mxu0 %v10314_v13  ;;  %26384 = vmatprep.mubr.msk.f32.mxu0 %vm28322_vm5, %v28321_v32 }
0x1400   :  { %26387 = vmatprep.subr.mxu0 %v28321_v32 }
0x1406   :  { %26385 = vmatmul.mubr.f32.vlgmr.msra.gmra.mrb[56].mxu0 %v10299_v29 }
0x1407   :  { %26388 = vmatpush3.xpose.msra.mxu0 %v10311_v8  ;;  %26389 = vmatprep.mubr.msk.f32.mxu0 %vm28322_vm5, %v28321_v32 }
0x1408   :  { %26392 = vmatprep.subr.mxu0 %v28321_v32 }
0x140e   :  { %26390 = vmatmul.mubr.f32.vlgmr.msra.gmra.mrb[56].mxu0 %v10300_v1 }
0x140f   :  { %26393 = vmatpush3.xpose.msra.mxu0 %v10234_v0  ;;  %26394 = vmatprep.mubr.msk.f32.mxu0 %vm28322_vm5, %v28321_v32 }
0x1410   :  { %26397 = vmatprep.subr.mxu0 %v28321_v32 }
0x1416   :  { %26395 = vmatmul.mubr.f32.vlgmr.msra.gmra.mrb[56].mxu0 %v10301_v38 }
0x1417   :  { %26398 = vmatpush3.xpose.msra.mxu0 %v10312_v9  ;;  %26399 = vmatprep.mubr.msk.f32.mxu0 %vm28322_vm5, %v28321_v32 }
0x1418   :  { %26402 = vmatprep.subr.mxu0 %v28321_v32 }
0x141e   :  { %26400 = vmatmul.mubr.f32.vlgmr.msra.gmra.mrb[56].mxu0 %v10299_v29 }
0x141f   :  { %26403 = vmatpush3.xpose.msra.mxu0 %v10234_v0  ;;  %26404 = vmatprep.mubr.msk.f32.mxu0 %vm28322_vm5, %v28321_v32 }
0x1420   :  { %26437 = vmatprep.subr.mxu0 %v28321_v32 }
0x1426   :  { %26405 = vmatmul.mubr.f32.vlgmr.msra.gmra.mrb[56].mxu0 %v10299_v29 }
0x1427   :  { %26438 = vmatpush3.msra.mxu0 %v28800_v7  ;;  %26439 = vmatprep.mubr.msk.f32.mxu0 %vm28322_vm5, %v28321_v32 }
0x1428   :  { %26447 = vmatprep.subr.mxu0 %v28321_v32 }
0x14ba   :  { %v9926_v56 = vpop.f32.mrb[52].mxu1 }
0x14bb   :  { %v26356_v17 = vpop.f32.mrb[53].mxu1 }
0x14be   :  { %v10074_v18 = vpop.f32.mrb[54].mxu1 }
0x14bf   :  { %v26366_v19 = vpop.f32.mrb[55].mxu1 }
0x14c2   :  { %v9850_v20 = vpop.f32.mrb[50].mxu0  ;;  %v10220_v34 = vpop.f32.mrb[56].mxu1 }
0x14c3   :  { %v9927_v58 = vadd.f32 %v9926_v56, %v9850_v20  ;;  %v26351_v26 = vpop.f32.mrb[51].mxu0  ;;  %v26376_v24 = vpop.f32.mrb[57].mxu1 }
0x14c6   :  { %v10000_v59 = vpop.f32.mrb[52].mxu0 }
0x14c7   :  { %v10001_v25 = vadd.f32 %v10000_v59, %v9927_v58  ;;  %v26361_v27 = vpop.f32.mrb[53].mxu0 }
0x14c9   :  { %v10075_v6 = vadd.f32 %v10074_v18, %v10001_v25 }
0x14ca   :  { %v10148_v4 = vpop.f32.mrb[54].mxu0 }
0x14cb   :  { %v10149_v35 = vadd.f32 %v10148_v4, %v10075_v6  ;;  %v26371_v28 = vpop.f32.mrb[55].mxu0 }
0x14cd   :  { %v10221_v5 = vadd.f32 %v10220_v34, %v10149_v35 }
0x14cf   :  { %v29111_v30 = vadd.f32 %v10221_v5, %v29035_v21 }
0x14f9   :  { %v10675_v37 = vpop.f32.mrb[56].mxu0 }
0x14fa   :  { %v27796_v39 = vadd.f32 %v10675_v37, %v28911_v48  ;;  %v26406_v21 = vpop.f32.mrb[57].mxu0 }
0x14fc   :  { %v10679_v40 = vsel %vm646_vm6, %v27796_v39, -inf }
0x14fd   :  { %10680 = vmax.xlane.f32.xlu1 %v10679_v40 }
0x1501   :  { %11601 = vadd.xlane.f32.xlu1 %v11600_v42 }
0x158a   :  { %v10681_v43 = vpop.xlane.xlu1 %10680 }
0x158b   :  { %v10682_v44 = vsub.f32 %v27796_v39, %v10681_v43  ;;  %v28291_v39 = vld [vmem:[%s30254_s0 + $0x8] sm:$0xff] }
0x158d   :  { %v10683_v46 = vmul.f32 1.442695, %v10682_v44  ;;  %v32_v44 = vld [vmem:[%s30258_s4 + $0x38] sm:$0xff] }
0x158e   :  { %v11602_v27 = vpop.xlane.xlu1 %11601 }
0x158f   :  { %28236 = vpow2.f32 %v10683_v46  ;;  %v11606_v35 = vmul.f32 0.03125, %v11602_v27 }
0x1591   :  { %v11608_v36 = vsub.f32 %v29131_v41, %v11606_v35 }
0x1593   :  { %v11610_v16 = vmul.f32 %v11608_v36, %v11608_v36 }
0x1595   :  { %v11612_v42 = vsel %vm47_vm0, %v11610_v16, 0.0 }
0x1599   :  { %v28237_v45 = vpop.eup %28236 }
0x159a   :  { %v10685_v48 = vsel %vm646_vm6, %v28237_v45, 0.0 }
0x159b   :  { %10686 = vadd.xlane.f32.xlu0 %v10685_v48 }
0x15b1   :  { %10690 = vrot.lane.b32.xlu0 %v28475_v33, %s28334_s24 }
0x1628   :  { %v10687_v47 = vpop.xlane.xlu0 %10686 }
0x1629   :  { %28238 = vrcp.f32 %v10687_v47  ;;  %v35_v47 = vld [vmem:[%s30258_s4 + $0x50] sm:$0xff] }
0x162c   :  { %v10691_v49 = vpop.permute.xlu0 %10690 }
0x162d   :  { %v10697_v50 = vand.u32 4294901760, %v10691_v49 }
0x162f   :  { %26408 = vmatpush3.msra.mxu1 %v10697_v50  ;;  %v10774_v54 = vsub.f32 %v10691_v49, %v10697_v50  ;;  %v11672_v49 = vand.u32 4294901760, %v35_v47 }
0x1630   :  { %26412 = vmatprep.subr.mxu1 %v28321_v32 }
0x1631   :  { %v10775_v51 = vand.u32 4294901760, %v10774_v54 }
0x1633   :  { %v28239_v52 = vpop.eup %28238  ;;  %v10776_v0 = vsub.f32 %v10774_v54, %v10775_v51 }
0x1634   :  { %v10689_v53 = vmul.f32 %v28239_v52, %v28237_v45  ;;  %v11669_v45 = vand.u32 4294901760, %v32_v44 }
0x1635   :  { %v10777_v33 = vand.u32 4294901760, %v10776_v0 }
0x1636   :  { %v10694_v60 = vsel %vm646_vm6, %v10689_v53, 0  ;;  %v11767_v27 = vsub.f32 %v32_v44, %v11669_v45 }
0x1637   :  { %v10762_v57 = vand.u32 4294901760, %v10694_v60 }
0x1639   :  { %v10763_v63 = vsub.f32 %v10694_v60, %v10762_v57 }
0x163b   :  { %v10764_v29 = vand.u32 4294901760, %v10763_v63 }
0x163d   :  { %v10765_v3 = vsub.f32 %v10763_v63, %v10764_v29 }
0x163f   :  { %v10766_v1 = vand.u32 4294901760, %v10765_v3 }
0x1641   :  { %26410 = vmatmul.mubr.f32.vlgmr.msra.gmra.mrb[58].mxu1 %v10766_v1 }
0x1642   :  { %26413 = vmatpush3.msra.mxu1 %v10777_v33  ;;  %26414 = vmatprep.mubr.msk.f32.mxu1 %vm28322_vm5, %v28321_v32 }
0x1643   :  { %26417 = vmatprep.subr.mxu1 %v28321_v32 }
0x1649   :  { %26415 = vmatmul.mubr.f32.vlgmr.msra.gmra.mrb[58].mxu1 %v10762_v57 }
0x164a   :  { %26418 = vmatpush3.msra.mxu1 %v10774_v54  ;;  %26419 = vmatprep.mubr.msk.f32.mxu1 %vm28322_vm5, %v28321_v32 }
0x164b   :  { %26422 = vmatprep.subr.mxu1 %v28321_v32 }
0x1651   :  { %26420 = vmatmul.mubr.f32.vlgmr.msra.gmra.mrb[58].mxu1 %v10763_v63 }
0x1652   :  { %26423 = vmatpush3.msra.mxu1 %v10697_v50  ;;  %26424 = vmatprep.mubr.msk.f32.mxu1 %vm28322_vm5, %v28321_v32 }
0x1653   :  { %26427 = vmatprep.subr.mxu1 %v28321_v32 }
0x1659   :  { %26425 = vmatmul.mubr.f32.vlgmr.msra.gmra.mrb[58].mxu1 %v10764_v29 }
0x165a   :  { %26428 = vmatpush3.msra.mxu1 %v10775_v51  ;;  %26429 = vmatprep.mubr.msk.f32.mxu1 %vm28322_vm5, %v28321_v32 }
0x165b   :  { %26432 = vmatprep.subr.mxu1 %v28321_v32 }
0x1661   :  { %26430 = vmatmul.mubr.f32.vlgmr.msra.gmra.mrb[58].mxu1 %v10762_v57 }
0x1662   :  { %26433 = vmatpush3.msra.mxu1 %v10697_v50  ;;  %26434 = vmatprep.mubr.msk.f32.mxu1 %vm28322_vm5, %v28321_v32  ;;  %v29209_v50 = vpack.c.bf16 %v11672_v49, %v11669_v45 }
0x1663   :  { %26442 = vmatprep.subr.mxu1 %v28321_v32 }
0x1669   :  { %26435 = vmatmul.mubr.f32.vlgmr.msra.gmra.mrb[58].mxu1 %v10762_v57 }
0x166a   :  { %26443 = vmatpush3.msra.mxu1 %v28836_v23  ;;  %26444 = vmatprep.mubr.msk.f32.mxu1 %vm28322_vm5, %v28321_v32 }
0x166b   :  { %26452 = vmatprep.subr.mxu1 %v28321_v32 }
0x173c   :  { %v11138_v8 = vpop.f32.mrb[58].mxu1 }
0x173d   :  { %v11143_v38 = vsel %vm646_vm6, %v11138_v8, 0  ;;  %v26436_v9 = vpop.f32.mrb[59].mxu1 }
0x173e   :  { %v11211_v55 = vand.u32 4294901760, %v11143_v38  ;;  %v28292_v9 = vld [vmem:[%s30258_s4 + $0x138] sm:$0x1f] }
0x1740   :  { %v11212_v12 = vsub.f32 %v11143_v38, %v11211_v55  ;;  %26445 = vmatmul.mubr.f32.vlgmr.msra.gmra.mrb[60].mxu1 %v11211_v55  ;;  %v11648_v38 = vsub.s32 3, %v28429_v62 }
0x1741   :  { %26453 = vmatpush3.msra.mxu1 %v28800_v7  ;;  %26454 = vmatprep.mubr.msk.f32.mxu1 %vm28322_vm5, %v28321_v32 }
0x1742   :  { %v11213_v61 = vand.u32 4294901760, %v11212_v12  ;;  %26462 = vmatprep.subr.mxu1 %v28321_v32 }
0x1744   :  { %v11214_v23 = vsub.f32 %v11212_v12, %v11213_v61  ;;  %26455 = vmatmul.mubr.f32.vlgmr.msra.gmra.mrb[62].mxu1 %v11213_v61 }
0x1745   :  { %26463 = vmatpush3.msra.mxu1 %v28800_v7  ;;  %26464 = vmatprep.mubr.msk.f32.mxu1 %vm28322_vm5, %v28321_v32 }
0x1746   :  { %v11215_v13 = vand.u32 4294901760, %v11214_v23  ;;  %v29233_v23 = vrot.slane %v28292_v9, %v11648_v38 }
0x1748   :  { %26440 = vmatmul.mubr.f32.vlgmr.msra.gmra.mrb[58].mxu0 %v11215_v13  ;;  %26465 = vmatmul.mubr.f32.vlgmr.msra.gmra.mrb[64].mxu1 %v11211_v55 }
0x1749   :  { %26448 = vmatpush3.msra.mxu0 %v28829_v31  ;;  %26449 = vmatprep.mubr.msk.f32.mxu0 %vm28322_vm5, %v28321_v32 }
0x174a   :  { %26457 = vmatprep.subr.mxu0 %v28321_v32 }
0x174c   :  { %26450 = vmatmul.mubr.f32.vlgmr.msra.gmra.mrb[60].mxu0 %v11212_v12 }
0x174d   :  { %26458 = vmatpush3.msra.mxu0 %v28832_v22  ;;  %26459 = vmatprep.mubr.msk.f32.mxu0 %vm28322_vm5, %v28321_v32 }
0x1750   :  { %26460 = vmatmul.mubr.f32.vlgmr.msra.gmra.mrb[62].mxu0 %v11211_v55  ;;  %v29229_v55 = vrot.slane %v28292_v9, %v103_v10 }
0x1813   :  { %v11293_v7 = vpop.f32.mrb[60].mxu1 }
0x1814   :  { %v26446_v56 = vpop.f32.mrb[61].mxu1 }
0x1817   :  { %v11441_v17 = vpop.f32.mrb[62].mxu1 }
0x1818   :  { %v26456_v18 = vpop.f32.mrb[63].mxu1 }
0x1819   :  { %v23_v18 = vld [vmem:[%s30255_s1] sm:$0xff] }
0x181b   :  { %v11217_v19 = vpop.f32.mrb[58].mxu0  ;;  %v11587_v20 = vpop.f32.mrb[64].mxu1 }
0x181c   :  { %v11294_v34 = vadd.f32 %v11293_v7, %v11217_v19  ;;  %v26441_v31 = vpop.f32.mrb[59].mxu0  ;;  %v26466_v58 = vpop.f32.mrb[65].mxu1  ;;  %v29247_v19 = vsel %vm47_vm0, %v23_v18, 0 }
0x181f   :  { %v11367_v26 = vpop.f32.mrb[60].mxu0 }
0x1820   :  { %v11368_v24 = vadd.f32 %v11367_v26, %v11294_v34  ;;  %v26451_v59 = vpop.f32.mrb[61].mxu0 }
0x1822   :  { %v11442_v25 = vadd.f32 %v11441_v17, %v11368_v24 }
0x1823   :  { %v11515_v6 = vpop.f32.mrb[62].mxu0 }
0x1824   :  { %v11516_v22 = vadd.f32 %v11515_v6, %v11442_v25  ;;  %v26461_v4 = vpop.f32.mrb[63].mxu0  ;;  %v11774_v6 = vsub.f32 %v35_v47, %v11672_v49 }
0x1826   :  { %v11588_v28 = vadd.f32 %v11587_v20, %v11516_v22  ;;  %v29250_v20 = vand.u32 4294901760, %v29247_v19 }
0x1828   :  { %v11591_v5 = vadd.f32 %v11588_v28, %v29111_v30  ;;  %v29188_v30 = vld [vmem:[%s30258_s4 + $0x20] sm:$0xff]  ;;  %26552 = vmatprep.mubr.f32.mxu1 %v29250_v20 }
0x1829   :  { %v11666_v43 = vand.u32 4294901760, %v29188_v30  ;;  %12200 = vrot.lane.b32.xlu0 %v29188_v30, %s28324_s10 }
0x182a   :  { %v11597_v37 = vadd.f32 %v29122_v11, %v11591_v5  ;;  %v29193_v11 = vld [vmem:[%s30258_s4 + $0x8] sm:$0xff]  ;;  %v11768_v5 = vand.u32 4294901760, %v11767_v27 }
0x182b   :  { %v11663_v46 = vand.u32 4294901760, %v29193_v11  ;;  %v11760_v26 = vsub.f32 %v29188_v30, %v11666_v43 }
0x182c   :  { %v29180_v21 = vadd.f32 %v28291_v39, %v11597_v37  ;;  %v11769_v39 = vsub.f32 %v11767_v27, %v11768_v5 }
0x182d   :  { %v29202_v48 = vpack.c.bf16 %v11666_v43, %v11663_v46  ;;  %12202 = vrot.lane.b32.xlu0 %v32_v44, %s28324_s10  ;;  %v11753_v24 = vsub.f32 %v29193_v11, %v11663_v46  ;;  %v11761_v25 = vand.u32 4294901760, %v11760_v26  ;;  %v29266_v44 = vpack.c.bf16 %v11774_v6, %v11767_v27 }
0x182e   :  { %v11603_v40 = vsel %vm47_vm0, %v29180_v21, 0.0  ;;  %v11770_v16 = vand.u32 4294901760, %v11769_v39 }
0x182f   :  { %11604 = vadd.xlane.f32.xlu1 %v11603_v40  ;;  %27548 = vmatprep.subr.bf16.mxu0 %v29202_v48  ;;  %v11754_v59 = vand.u32 4294901760, %v11753_v24  ;;  %v11762_v4 = vsub.f32 %v11760_v26, %v11761_v25  ;;  %v29264_v46 = vpack.c.bf16 %v11760_v26, %v11753_v24 }
0x1830   :  { %27550 = vmatpush3.bf16.msra.mxu0 %v29202_v48 }
0x1831   :  { %27552 = vmatprep.subr.bf16.mxu0 %v29209_v50  ;;  %12204 = vrot.lane.b32.xlu0 %v35_v47, %s28324_s10  ;;  %v11755_v22 = vsub.f32 %v11753_v24, %v11754_v59  ;;  %v11763_v28 = vand.u32 4294901760, %v11762_v4  ;;  %v29268_v45 = vpack.c.bf16 %v11761_v25, %v11754_v59 }
0x1833   :  { %11613 = vadd.xlane.f32.xlu1 %v11612_v42  ;;  %v11756_v35 = vand.u32 4294901760, %v11755_v22 }
0x1834   :  { %27554 = vmatpush3.bf16.msra.mxu0 %v29209_v50 }
0x1835   :  { %v29259_v37 = vpack.c.bf16 %v11763_v28, %v11756_v35  ;;  %v24_v28 = vld [vmem:[%s30255_s1 + $0x8] sm:$0xff] }
0x1837   :  { %27556 = vmatprep.subr.bf16.mxu0 %v29259_v37 }
0x189b   :  { %v12201_v49 = vpop.permute.xlu0 %12200 }
0x18bc   :  { %v11605_v52 = vpop.xlane.xlu1 %11604 }
0x18bd   :  { %v11607_v53 = vmul.f32 0.03125, %v11605_v52  ;;  %v12203_v52 = vpop.permute.xlu0 %12202 }
0x18bf   :  { %v29216_v54 = vsub.f32 %v29180_v21, %v11607_v53 }
0x18c0   :  { %v11614_v60 = vpop.xlane.xlu1 %11613 }
0x18c1   :  { %v11618_v57 = vmul.f32 0.032258064, %v11614_v60  ;;  %v11611_v51 = vmul.f32 %v29216_v54, %v29216_v54  ;;  %v12205_v53 = vpop.permute.xlu0 %12204  ;;  %v12220_v60 = vand.u32 4294901760, %v12201_v49 }
0x18c3   :  { %28240 = vrsqrt.f32 %v11618_v57  ;;  %v11615_v63 = vsel %vm47_vm0, %v11611_v51, 0.0  ;;  %vm11622_vm9 = vcmp.eq.f32.partialorder %v11618_v57, inf  ;;  %v11625_v3 = vand.u32 2147483648, %v11618_v57 }
0x18c4   :  { %11616 = vadd.xlane.f32.xlu1 %v11615_v63  ;;  %vm11624_vm10 = vcmp.eq.f32.partialorder %v11618_v57, 0.0  ;;  %v12226_v51 = vand.u32 4294901760, %v12205_v53  ;;  %v12314_v63 = vsub.f32 %v12201_v49, %v12220_v60  ;;  %v29286_v49 = vsub.f32 %v29247_v19, %v29250_v20 }
0x18cd   :  { %v28241_v29 = vpop.eup %28240 }
0x18ce   :  { %v11621_v0 = vmul.f32 %v28241_v29, %v11618_v57 }
0x18d0   :  { %v11623_v1 = vsel %vm11622_vm9, %v11618_v57, %v11621_v0  ;;  %v12223_v57 = vand.u32 4294901760, %v12203_v52  ;;  %v29274_v0 = vsub.f32 %v12205_v53, %v12226_v51 }
0x18d1   :  { %v11626_v33 = vsel %vm11624_vm10, %v11625_v3, %v11623_v1 }
0x18d2   :  { %v11634_v8 = vadd.f32 1e-06, %v11626_v33  ;;  %v29272_v29 = vsub.f32 %v12203_v52, %v12223_v57  ;;  %v12315_v33 = vand.u32 4294901760, %v12314_v63  ;;  %v12329_v9 = vand.u32 4294901760, %v29274_v0 }
0x18d4   :  { %28242 = vrcp.f32 %v11634_v8  ;;  %v12322_v8 = vand.u32 4294901760, %v29272_v29  ;;  %v12330_v18 = vsub.f32 %v29274_v0, %v12329_v9  ;;  %v27615_v52 = vpack.c.bf16 %v29274_v0, %v29272_v29 }
0x18d5   :  { %12198 = vrot.lane.b32.xlu1 %v29193_v11, %s28324_s10 }
0x18d6   :  { %v12331_v59 = vand.u32 4294901760, %v12330_v18 }
0x18de   :  { %v28243_v12 = vpop.eup %28242 }
0x18df   :  { %v11637_v61 = vmul.f32 %v28243_v12, %v11608_v36  ;;  %v11775_v36 = vand.u32 4294901760, %v11774_v6 }
0x18e1   :  { %v11644_v13 = vmul.f32 %v29229_v55, %v11637_v61  ;;  %v11776_v40 = vsub.f32 %v11774_v6, %v11775_v36  ;;  %v29270_v47 = vpack.c.bf16 %v11775_v36, %v11768_v5 }
0x18e3   :  { %v11650_v7 = vadd.f32 %v29233_v23, %v11644_v13  ;;  %v11777_v42 = vand.u32 4294901760, %v11776_v40  ;;  %v12316_v13 = vsub.f32 %v12314_v63, %v12315_v33  ;;  %v12214_v40 = vsel %vm47_vm0, %v24_v28, 0 }
0x18e5   :  { %v11657_v56 = vsel %vm47_vm0, %v11650_v7, 0  ;;  %v29262_v43 = vpack.c.bf16 %v11777_v42, %v11770_v16  ;;  %v12323_v7 = vsub.f32 %v29272_v29, %v12322_v8  ;;  %v12317_v26 = vand.u32 4294901760, %v12316_v13 }
0x18e6   :  { %v29238_v17 = vand.u32 4294901760, %v11657_v56  ;;  %v12295_v42 = vand.u32 4294901760, %v12214_v40 }
0x18e7   :  { %v12324_v24 = vand.u32 4294901760, %v12323_v7 }
0x18e8   :  { %v29244_v10 = vsub.f32 %v11657_v56, %v29238_v17 }
0x18e9   :  { %v27607_v35 = vpack.c.bf16 %v12331_v59, %v12324_v24 }
0x18ea   :  { %v11733_v34 = vand.u32 4294901760, %v29244_v10 }
0x18ec   :  { %v11734_v31 = vsub.f32 %v29244_v10, %v11733_v34 }
0x18ee   :  { %v11735_v58 = vand.u32 4294901760, %v11734_v31 }
0x18f0   :  { %26475 = vmatprep.mubr.f32.mxu0 %v11735_v58 }
0x1951   :  { %v11617_v3 = vpop.xlane.xlu1 %11616 }
0x1952   :  { %v11619_v1 = vmul.f32 0.032258064, %v11617_v3  ;;  %v29293_v3 = vsub.f32 %v12214_v40, %v12295_v42 }
0x1954   :  { %28244 = vrsqrt.f32 %v11619_v1  ;;  %vm11629_vm11 = vcmp.eq.f32.partialorder %v11619_v1, inf  ;;  %v11632_v22 = vand.u32 2147483648, %v11619_v1  ;;  %vm11631_vm12 = vcmp.eq.f32.partialorder %v11619_v1, 0.0 }
0x1955   :  { %v12199_v12 = vpop.permute.xlu1 %12198 }
0x1956   :  { %v12217_v61 = vand.u32 4294901760, %v12199_v12 }
0x1958   :  { %v12307_v56 = vsub.f32 %v12199_v12, %v12217_v61  ;;  %v29291_v53 = vpack.c.bf16 %v12220_v60, %v12217_v61  ;;  %v29296_v12 = vpack.c.bf16 %v12226_v51, %v12223_v57  ;;  %v12297_v61 = vand.u32 4294901760, %v29293_v3 }
0x195a   :  { %v12308_v31 = vand.u32 4294901760, %v12307_v56  ;;  %v27611_v16 = vpack.c.bf16 %v12314_v63, %v12307_v56 }
0x195c   :  { %v12309_v58 = vsub.f32 %v12307_v56, %v12308_v31  ;;  %v27627_v60 = vpack.c.bf16 %v12315_v33, %v12308_v31 }
0x195e   :  { %v28245_v25 = vpop.eup %28244  ;;  %v12310_v27 = vand.u32 4294901760, %v12309_v58 }
0x195f   :  { %v11628_v6 = vmul.f32 %v28245_v25, %v11619_v1 }
0x1960   :  { %v27603_v4 = vpack.c.bf16 %v12317_v26, %v12310_v27 }
0x1961   :  { %v11630_v5 = vsel %vm11629_vm11, %v11619_v1, %v11628_v6  ;;  %v12287_v1 = vand.u32 4294901760, %v29286_v49 }
0x1962   :  { %v11633_v36 = vsel %vm11631_vm12, %v11632_v22, %v11630_v5  ;;  %27604 = vmatprep.subr.bf16.mxu1 %v27603_v4 }
0x1963   :  { %v11635_v39 = vadd.f32 1e-06, %v11633_v36  ;;  %27606 = vmatpush3.bf16.msra.mxu1 %v27603_v4 }
0x1964   :  { %27608 = vmatprep.subr.bf16.mxu1 %v27607_v35 }
0x1965   :  { %28246 = vrcp.f32 %v11635_v39 }
0x1967   :  { %27610 = vmatpush3.bf16.msra.mxu1 %v27607_v35 }
0x1968   :  { %27612 = vmatprep.subr.bf16.mxu1 %v27611_v16 }
0x196a   :  { %26553 = vmatmul.mubr.f32.vlgmr.msra.gmra.mrb[66].mxu1 %v12295_v42 }
0x196b   :  { %27614 = vmatpush3.bf16.msra.mxu1 %v27611_v16  ;;  %26563 = vmatprep.mubr.f32.mxu1 %v29286_v49 }
0x196c   :  { %27616 = vmatprep.subr.bf16.mxu1 %v27615_v52 }
0x196f   :  { %v28247_v63 = vpop.eup %28246  ;;  %27618 = vmatpush3.bf16.msra.mxu1 %v27615_v52 }
0x1970   :  { %27620 = vmatprep.subr.bf16.mxu1 %v29291_v53  ;;  %v11639_v19 = vmul.f32 %v28247_v63, %v29216_v54  ;;  %v27631_v54 = vpack.c.bf16 %v12329_v9, %v12322_v8  ;;  %v12193_v8 = vrot.slane %v29117_v14, %v11648_v38 }
0x1972   :  { %26564 = vmatmul.mubr.f32.vlgmr.msra.gmra.mrb[66].mxu1 %v29293_v3  ;;  %v11645_v29 = vmul.f32 %v29229_v55, %v11639_v19 }
0x1973   :  { %27622 = vmatpush3.bf16.msra.mxu1 %v29291_v53  ;;  %26574 = vmatprep.mubr.f32.mxu1 %v12287_v1 }
0x1974   :  { %27624 = vmatprep.subr.bf16.mxu1 %v29296_v12  ;;  %v11651_v0 = vadd.f32 %v29233_v23, %v11645_v29  ;;  %v12288_v23 = vsub.f32 %v29286_v49, %v12287_v1 }
0x1976   :  { %v11660_v57 = vsel %vm47_vm0, %v11651_v0, 0 }
0x1977   :  { %27626 = vmatpush3.bf16.msra.mxu1 %v29296_v12  ;;  %v11741_v51 = vand.u32 4294901760, %v11660_v57 }
0x1978   :  { %27628 = vmatprep.subr.bf16.mxu1 %v27627_v60 }
0x1979   :  { %v11742_v13 = vsub.f32 %v11660_v57, %v11741_v51 }
0x197a   :  { %26575 = vmatmul.mubr.f32.vlgmr.msra.gmra.mrb[66].mxu1 %v12297_v61 }
0x197b   :  { %27630 = vmatpush3.bf16.msra.mxu1 %v27627_v60  ;;  %v11743_v55 = vand.u32 4294901760, %v11742_v13  ;;  %26585 = vmatprep.mubr.f32.mxu1 %v29250_v20 }
0x197c   :  { %27632 = vmatprep.subr.bf16.mxu1 %v27631_v54 }
0x197d   :  { %v11744_v7 = vsub.f32 %v11742_v13, %v11743_v55 }
0x197f   :  { %27634 = vmatpush3.bf16.msra.mxu1 %v27631_v54  ;;  %v11745_v33 = vand.u32 4294901760, %v11744_v7 }
0x1980   :  { %27636 = vmatprep.subr.bf16.mxu1 %v29291_v53 }
0x1981   :  { %26476 = vmatmul.mubr.f32.vlgmr.msra.gmra.mrb[64].mxu0 %v11745_v33 }
0x1982   :  { %27558 = vmatpush3.bf16.msra.mxu0 %v29259_v37  ;;  %26486 = vmatprep.mubr.f32.mxu0 %v29238_v17 }
0x1983   :  { %26586 = vmatmul.mubr.f32.vlgmr.msra.gmra.mrb[66].mxu1 %v12295_v42  ;;  %27560 = vmatprep.subr.bf16.mxu0 %v29262_v43 }
0x1984   :  { %27638 = vmatpush3.bf16.msra.mxu1 %v29291_v53  ;;  %26596 = vmatprep.mubr.f32.mxu1 %v29250_v20  ;;  %v12298_v20 = vsub.f32 %v29293_v3, %v12297_v61 }
0x1985   :  { %27640 = vmatprep.subr.bf16.mxu1 %v29296_v12 }
0x1986   :  { %27562 = vmatpush3.bf16.msra.mxu0 %v29262_v43 }
0x1987   :  { %27564 = vmatprep.subr.bf16.mxu0 %v29264_v46 }
0x1988   :  { %27642 = vmatpush3.bf16.msra.mxu1 %v29296_v12 }
0x1989   :  { %26487 = vmatmul.mubr.f32.vlgmr.msra.gmra.mrb[64].mxu0 %v11741_v51  ;;  %26629 = vmatprep.subr.mxu1 %v28321_v32 }
0x198a   :  { %27566 = vmatpush3.bf16.msra.mxu0 %v29264_v46  ;;  %26497 = vmatprep.mubr.f32.mxu0 %v29244_v10  ;;  %v12289_v10 = vand.u32 4294901760, %v12288_v23 }
0x198b   :  { %27568 = vmatprep.subr.bf16.mxu0 %v29266_v44  ;;  %26597 = vmatmul.mubr.f32.vlgmr.msra.gmra.mrb[66].mxu1 %v12295_v42 }
0x198c   :  { %26631 = vmatprep.mubr.msk.f32.mxu1 %vm28322_vm5, %v28321_v32 }
0x198e   :  { %27570 = vmatpush3.bf16.msra.mxu0 %v29266_v44 }
0x198f   :  { %27572 = vmatprep.subr.bf16.mxu0 %v29202_v48 }
0x1991   :  { %26498 = vmatmul.mubr.f32.vlgmr.msra.gmra.mrb[64].mxu0 %v11742_v13 }
0x1992   :  { %27574 = vmatpush3.bf16.msra.mxu0 %v29202_v48  ;;  %26508 = vmatprep.mubr.f32.mxu0 %v11733_v34  ;;  %v11655_v34 = vrot.slane %v29117_v14, %v97_v2 }
0x1993   :  { %27576 = vmatprep.subr.bf16.mxu0 %v29209_v50 }
0x1996   :  { %27578 = vmatpush3.bf16.msra.mxu0 %v29209_v50 }
0x1997   :  { %27580 = vmatprep.subr.bf16.mxu0 %v29268_v45 }
0x1999   :  { %26509 = vmatmul.mubr.f32.vlgmr.msra.gmra.mrb[64].mxu0 %v11743_v55 }
0x199a   :  { %27582 = vmatpush3.bf16.msra.mxu0 %v29268_v45  ;;  %26519 = vmatprep.mubr.f32.mxu0 %v29238_v17 }
0x199b   :  { %27584 = vmatprep.subr.bf16.mxu0 %v29270_v47 }
0x199e   :  { %27586 = vmatpush3.bf16.msra.mxu0 %v29270_v47 }
0x199f   :  { %27588 = vmatprep.subr.bf16.mxu0 %v29202_v48 }
0x19a1   :  { %26520 = vmatmul.mubr.f32.vlgmr.msra.gmra.mrb[64].mxu0 %v11741_v51 }
0x19a2   :  { %27590 = vmatpush3.bf16.msra.mxu0 %v29202_v48  ;;  %26530 = vmatprep.mubr.f32.mxu0 %v29238_v17  ;;  %v12299_v48 = vand.u32 4294901760, %v12298_v20 }
0x19a3   :  { %27592 = vmatprep.subr.bf16.mxu0 %v29209_v50 }
0x19a6   :  { %27594 = vmatpush3.bf16.msra.mxu0 %v29209_v50 }
0x19a7   :  { %27596 = vmatprep.subr.bf16.mxu0 %v29291_v53 }
0x19a9   :  { %26531 = vmatmul.mubr.f32.vlgmr.msra.gmra.mrb[64].mxu0 %v11741_v51 }
0x19aa   :  { %27598 = vmatpush3.bf16.msra.mxu0 %v29291_v53  ;;  %26541 = vmatprep.mubr.f32.mxu0 %v12289_v10 }
0x19ab   :  { %27600 = vmatprep.subr.bf16.mxu0 %v29296_v12 }
0x19ae   :  { %27602 = vmatpush3.bf16.msra.mxu0 %v29296_v12  ;;  %v12744_v12 = vld [vmem:[%s30257_s3] sm:$0xff] }
0x19af   :  { %26599 = vmatprep.subr.mxu0 %v28321_v32  ;;  %vm12746_vm13 = vcmp.eq.f32.partialorder %v12744_v12, 0.0 }
0x19b0   :  { %v29415_v19 = vsel %vm12746_vm13, -1e+09, %v28321_v32 }
0x19b1   :  { %26542 = vmatmul.mubr.f32.vlgmr.msra.gmra.mrb[66].mxu0 %v12299_v48 }
0x19b2   :  { %26601 = vmatprep.mubr.msk.f32.mxu0 %vm28322_vm5, %v28321_v32 }
0x1a5e   :  { %v26598_v50 = vpop.f32.mrb[66].mxu1 }
0x1a5f   :  { %v12734_v17 = vpop.f32.mrb[67].mxu1 }
0x1a7c   :  { %v26532_v37 = vpop.f32.mrb[64].mxu0 }
0x1a7d   :  { %v29354_v43 = vadd.f32 %v26532_v37, %v11655_v34  ;;  %v12180_v46 = vpop.f32.mrb[65].mxu0 }
0x1a7e   :  { %v29356_v44 = vadd.f32 %v12180_v46, %v11655_v34 }
0x1a80   :  { %v12749_v45 = vsel %vm646_vm6, %v29356_v44, 0  ;;  %13663 = vrot.lane.b32.xlu0 %v29356_v44, %s28323_s9 }
0x1a81   :  { %v12820_v47 = vand.u32 4294901760, %v12749_v45 }
0x1a83   :  { %v12821_v9 = vsub.f32 %v12749_v45, %v12820_v47 }
0x1a84   :  { %v26543_v56 = vpop.f32.mrb[66].mxu0 }
0x1a85   :  { %v12302_v2 = vadd.f32 %v26543_v56, %v12193_v8  ;;  %v12291_v18 = vpop.f32.mrb[67].mxu0  ;;  %v12822_v58 = vand.u32 4294901760, %v12821_v9 }
0x1a86   :  { %v12292_v31 = vadd.f32 %v12291_v18, %v12193_v8 }
0x1a87   :  { %v29365_v26 = vadd.f32 %v26598_v50, %v12302_v2  ;;  %v12823_v25 = vsub.f32 %v12821_v9, %v12822_v58 }
0x1a88   :  { %v29367_v24 = vadd.f32 %v12734_v17, %v12292_v31 }
0x1a89   :  { %v12824_v38 = vand.u32 4294901760, %v12823_v25 }
0x1a8a   :  { %13665 = vrot.lane.b32.xlu1 %v29367_v24, %s28323_s9  ;;  %v12752_v59 = vsel %vm646_vm6, %v29367_v24, 0 }
0x1a8b   :  { %v12755_v27 = vand.u32 4294901760, %v12752_v59 }
0x1a8d   :  { %26600 = vmatpush3.xpose.msra.mxu0 %v12755_v27  ;;  %v12832_v14 = vsub.f32 %v12752_v59, %v12755_v27 }
0x1a8e   :  { %26604 = vmatprep.subr.mxu0 %v28321_v32 }
0x1a8f   :  { %v12833_v6 = vand.u32 4294901760, %v12832_v14 }
0x1a90   :  { %26602 = vmatmul.mubr.f32.vlgmr.msra.gmra.mrb[68].mxu0 %v12824_v38 }
0x1a91   :  { %v12834_v22 = vsub.f32 %v12832_v14, %v12833_v6  ;;  %26606 = vmatprep.mubr.msk.f32.mxu0 %vm28322_vm5, %v28321_v32 }
0x1a93   :  { %v12835_v4 = vand.u32 4294901760, %v12834_v22 }
0x1a95   :  { %26605 = vmatpush3.xpose.msra.mxu0 %v12835_v4 }
0x1a96   :  { %26609 = vmatprep.subr.mxu0 %v28321_v32 }
0x1a98   :  { %26607 = vmatmul.mubr.f32.vlgmr.msra.gmra.mrb[68].mxu0 %v12820_v47 }
0x1a99   :  { %26610 = vmatpush3.xpose.msra.mxu0 %v12832_v14  ;;  %26611 = vmatprep.mubr.msk.f32.mxu0 %vm28322_vm5, %v28321_v32 }
0x1a9a   :  { %26614 = vmatprep.subr.mxu0 %v28321_v32 }
0x1aa0   :  { %26612 = vmatmul.mubr.f32.vlgmr.msra.gmra.mrb[68].mxu0 %v12821_v9 }
0x1aa1   :  { %26615 = vmatpush3.xpose.msra.mxu0 %v12755_v27  ;;  %26616 = vmatprep.mubr.msk.f32.mxu0 %vm28322_vm5, %v28321_v32 }
0x1aa2   :  { %26619 = vmatprep.subr.mxu0 %v28321_v32 }
0x1aa8   :  { %26617 = vmatmul.mubr.f32.vlgmr.msra.gmra.mrb[68].mxu0 %v12822_v58 }
0x1aa9   :  { %26620 = vmatpush3.xpose.msra.mxu0 %v12833_v6  ;;  %26621 = vmatprep.mubr.msk.f32.mxu0 %vm28322_vm5, %v28321_v32 }
0x1aaa   :  { %26624 = vmatprep.subr.mxu0 %v28321_v32 }
0x1ab0   :  { %26622 = vmatmul.mubr.f32.vlgmr.msra.gmra.mrb[68].mxu0 %v12820_v47 }
0x1ab1   :  { %26625 = vmatpush3.xpose.msra.mxu0 %v12755_v27  ;;  %26626 = vmatprep.mubr.msk.f32.mxu0 %vm28322_vm5, %v28321_v32 }
0x1ab2   :  { %26659 = vmatprep.subr.mxu0 %v28321_v32 }
0x1ab8   :  { %26627 = vmatmul.mubr.f32.vlgmr.msra.gmra.mrb[68].mxu0 %v12820_v47 }
0x1ab9   :  { %26661 = vmatprep.mubr.msk.f32.mxu0 %vm28322_vm5, %v28321_v32 }
0x1af2   :  { %v13664_v35 = vpop.permute.xlu0 %13663 }
0x1af3   :  { %v13667_v28 = vsel %vm646_vm6, %v13664_v35, 0 }
0x1af4   :  { %v13737_v5 = vand.u32 4294901760, %v13667_v28 }
0x1af6   :  { %v13738_v36 = vsub.f32 %v13667_v28, %v13737_v5 }
0x1af8   :  { %v13739_v39 = vand.u32 4294901760, %v13738_v36 }
0x1afa   :  { %v13740_v16 = vsub.f32 %v13738_v36, %v13739_v39 }
0x1afc   :  { %v13666_v40 = vpop.permute.xlu1 %13665  ;;  %v13741_v53 = vand.u32 4294901760, %v13740_v16 }
0x1afd   :  { %v13669_v42 = vsel %vm646_vm6, %v13666_v40, 0 }
0x1afe   :  { %v13672_v49 = vand.u32 4294901760, %v13669_v42 }
0x1b00   :  { %v13749_v52 = vsub.f32 %v13669_v42, %v13672_v49  ;;  %26660 = vmatpush3.xpose.msra.mxu0 %v13672_v49 }
0x1b01   :  { %26664 = vmatprep.subr.mxu0 %v28321_v32 }
0x1b02   :  { %v13750_v3 = vand.u32 4294901760, %v13749_v52 }
0x1b03   :  { %26662 = vmatmul.mubr.f32.vlgmr.msra.gmra.mrb[70].mxu0 %v13741_v53 }
0x1b04   :  { %v13751_v63 = vsub.f32 %v13749_v52, %v13750_v3  ;;  %26666 = vmatprep.mubr.msk.f32.mxu0 %vm28322_vm5, %v28321_v32 }
0x1b06   :  { %v13752_v1 = vand.u32 4294901760, %v13751_v63 }
0x1b08   :  { %26665 = vmatpush3.xpose.msra.mxu0 %v13752_v1 }
0x1b09   :  { %26669 = vmatprep.subr.mxu0 %v28321_v32 }
0x1b0b   :  { %26667 = vmatmul.mubr.f32.vlgmr.msra.gmra.mrb[70].mxu0 %v13737_v5 }
0x1b0c   :  { %26670 = vmatpush3.xpose.msra.mxu0 %v13749_v52  ;;  %26671 = vmatprep.mubr.msk.f32.mxu0 %vm28322_vm5, %v28321_v32 }
0x1b0d   :  { %26674 = vmatprep.subr.mxu0 %v28321_v32 }
0x1b13   :  { %26672 = vmatmul.mubr.f32.vlgmr.msra.gmra.mrb[70].mxu0 %v13738_v36 }
0x1b14   :  { %26675 = vmatpush3.xpose.msra.mxu0 %v13672_v49  ;;  %26676 = vmatprep.mubr.msk.f32.mxu0 %vm28322_vm5, %v28321_v32 }
0x1b15   :  { %26679 = vmatprep.subr.mxu0 %v28321_v32 }
0x1b1b   :  { %26677 = vmatmul.mubr.f32.vlgmr.msra.gmra.mrb[70].mxu0 %v13739_v39 }
0x1b1c   :  { %26680 = vmatpush3.xpose.msra.mxu0 %v13750_v3  ;;  %26681 = vmatprep.mubr.msk.f32.mxu0 %vm28322_vm5, %v28321_v32 }
0x1b1d   :  { %26684 = vmatprep.subr.mxu0 %v28321_v32 }
0x1b23   :  { %26682 = vmatmul.mubr.f32.vlgmr.msra.gmra.mrb[70].mxu0 %v13737_v5 }
0x1b24   :  { %26685 = vmatpush3.xpose.msra.mxu0 %v13672_v49  ;;  %26686 = vmatprep.mubr.msk.f32.mxu0 %vm28322_vm5, %v28321_v32 }
0x1b25   :  { %26719 = vmatprep.subr.mxu0 %v28321_v32 }
0x1b2b   :  { %26687 = vmatmul.mubr.f32.vlgmr.msra.gmra.mrb[70].mxu0 %v13737_v5 }
0x1b2c   :  { %26721 = vmatprep.mubr.msk.f32.mxu0 %vm28322_vm5, %v28321_v32 }
0x1b8b   :  { %v13196_v29 = vpop.f32.mrb[68].mxu0 }
0x1b8c   :  { %v27803_v60 = vadd.f32 %v13196_v29, %v29415_v19  ;;  %v26628_v0 = vpop.f32.mrb[69].mxu0 }
0x1b8e   :  { %v13200_v61 = vsel %vm646_vm6, %v27803_v60, -inf }
0x1b8f   :  { %13201 = vmax.xlane.f32.xlu0 %v13200_v61 }
0x1bfe   :  { %v14113_v57 = vpop.f32.mrb[70].mxu0 }
0x1bff   :  { %v27804_v51 = vadd.f32 %v14113_v57, %v29415_v19  ;;  %v26688_v54 = vpop.f32.mrb[71].mxu0 }
0x1c01   :  { %v14117_v13 = vsel %vm646_vm6, %v27804_v51, -inf }
0x1c02   :  { %14118 = vmax.xlane.f32.xlu1 %v14117_v13 }
0x1c1c   :  { %v13202_v55 = vpop.xlane.xlu0 %13201 }
0x1c1d   :  { %v13203_v7 = vsub.f32 %v27803_v60, %v13202_v55 }
0x1c1f   :  { %v13204_v33 = vmul.f32 1.442695, %v13203_v7 }
0x1c21   :  { %28248 = vpow2.f32 %v13204_v33 }
0x1c2b   :  { %v28249_v23 = vpop.eup %28248 }
0x1c2c   :  { %v13206_v10 = vsel %vm646_vm6, %v28249_v23, 0.0 }
0x1c2d   :  { %13207 = vadd.xlane.f32.xlu0 %v13206_v10 }
0x1c43   :  { %13211 = vrot.lane.b32.xlu0 %v29367_v24, %s28324_s10 }
0x1c47   :  { %14580 = vrot.lane.b32.xlu0 %v29188_v30, %s28328_s16 }
0x1c4b   :  { %15484 = vrot.lane.b32.xlu0 %v29356_v44, %s28329_s17 }
0x1c8f   :  { %v14119_v20 = vpop.xlane.xlu1 %14118 }
0x1c90   :  { %v14120_v48 = vsub.f32 %v27804_v51, %v14119_v20 }
0x1c92   :  { %v14121_v50 = vmul.f32 1.442695, %v14120_v48 }
0x1c94   :  { %28250 = vpow2.f32 %v14121_v50 }
0x1c9e   :  { %v28251_v17 = vpop.eup %28250 }
0x1c9f   :  { %v14123_v34 = vsel %vm646_vm6, %v28251_v17, 0.0 }
0x1ca0   :  { %14124 = vadd.xlane.f32.xlu1 %v14123_v34 }
0x1cb1   :  { %14128 = vrot.lane.b32.xlu1 %v29367_v24, %s28325_s11 }
0x1cb5   :  { %15032 = vrot.lane.b32.xlu1 %v29193_v11, %s28328_s16 }
0x1cb9   :  { %15486 = vrot.lane.b32.xlu1 %v29367_v24, %s28329_s17 }
0x1cba   :  { %v13208_v30 = vpop.xlane.xlu0 %13207 }
0x1cbb   :  { %28252 = vrcp.f32 %v13208_v30 }
0x1cbe   :  { %v13212_v37 = vpop.permute.xlu0 %13211 }
0x1cbf   :  { %v13218_v46 = vand.u32 4294901760, %v13212_v37 }
0x1cc1   :  { %26630 = vmatpush3.msra.mxu1 %v13218_v46  ;;  %v13295_v11 = vsub.f32 %v13212_v37, %v13218_v46 }
0x1cc2   :  { %v29435_v45 = vpop.permute.xlu0 %14580  ;;  %26634 = vmatprep.subr.mxu1 %v28321_v32 }
0x1cc3   :  { %v29439_v47 = vand.u32 4294901760, %v29435_v45  ;;  %v13296_v18 = vand.u32 4294901760, %v13295_v11 }
0x1cc5   :  { %v28253_v8 = vpop.eup %28252  ;;  %26720 = vmatpush3.msra.mxu0 %v29439_v47  ;;  %v13297_v59 = vsub.f32 %v13295_v11, %v13296_v18  ;;  %v29482_v3 = vsub.f32 %v29435_v45, %v29439_v47 }
0x1cc6   :  { %v13210_v9 = vmul.f32 %v28253_v8, %v28249_v23  ;;  %26729 = vmatprep.subr.mxu0 %v28321_v32 }
0x1cc7   :  { %v13298_v14 = vand.u32 4294901760, %v13297_v59  ;;  %v29485_v63 = vand.u32 4294901760, %v29482_v3 }
0x1cc8   :  { %v13215_v56 = vsel %vm646_vm6, %v13210_v9, 0 }
0x1cc9   :  { %v13283_v2 = vand.u32 4294901760, %v13215_v56  ;;  %v14666_v1 = vsub.f32 %v29482_v3, %v29485_v63 }
0x1ccb   :  { %v13284_v31 = vsub.f32 %v13215_v56, %v13283_v2  ;;  %v29489_v12 = vand.u32 4294901760, %v14666_v1 }
0x1ccd   :  { %v13285_v58 = vand.u32 4294901760, %v13284_v31 }
0x1ccf   :  { %v13286_v25 = vsub.f32 %v13284_v31, %v13285_v58 }
0x1cd1   :  { %v13287_v27 = vand.u32 4294901760, %v13286_v25 }
0x1cd3   :  { %26632 = vmatmul.mubr.f32.vlgmr.msra.gmra.mrb[68].mxu1 %v13287_v27 }
0x1cd4   :  { %26635 = vmatpush3.msra.mxu1 %v13298_v14  ;;  %26636 = vmatprep.mubr.msk.f32.mxu1 %vm28322_vm5, %v28321_v32 }
0x1cd5   :  { %26639 = vmatprep.subr.mxu1 %v28321_v32 }
0x1cdb   :  { %26637 = vmatmul.mubr.f32.vlgmr.msra.gmra.mrb[68].mxu1 %v13283_v2 }
0x1cdc   :  { %26640 = vmatpush3.msra.mxu1 %v13295_v11  ;;  %26641 = vmatprep.mubr.msk.f32.mxu1 %vm28322_vm5, %v28321_v32 }
0x1cdd   :  { %26644 = vmatprep.subr.mxu1 %v28321_v32 }
0x1ce3   :  { %26642 = vmatmul.mubr.f32.vlgmr.msra.gmra.mrb[68].mxu1 %v13284_v31 }
0x1ce4   :  { %26645 = vmatpush3.msra.mxu1 %v13218_v46  ;;  %26646 = vmatprep.mubr.msk.f32.mxu1 %vm28322_vm5, %v28321_v32 }
0x1ce5   :  { %26649 = vmatprep.subr.mxu1 %v28321_v32 }
0x1ceb   :  { %26647 = vmatmul.mubr.f32.vlgmr.msra.gmra.mrb[68].mxu1 %v13285_v58 }
0x1cec   :  { %26650 = vmatpush3.msra.mxu1 %v13296_v18  ;;  %26651 = vmatprep.mubr.msk.f32.mxu1 %vm28322_vm5, %v28321_v32 }
0x1ced   :  { %26654 = vmatprep.subr.mxu1 %v28321_v32 }
0x1cf3   :  { %26652 = vmatmul.mubr.f32.vlgmr.msra.gmra.mrb[68].mxu1 %v13283_v2 }
0x1cf4   :  { %26655 = vmatpush3.msra.mxu1 %v13218_v46  ;;  %26656 = vmatprep.mubr.msk.f32.mxu1 %vm28322_vm5, %v28321_v32  ;;  %v15485_v46 = vpop.permute.xlu0 %15484 }
0x1cf5   :  { %26689 = vmatprep.subr.mxu1 %v28321_v32  ;;  %v15488_v8 = vsel %vm646_vm6, %v15485_v46, 0 }
0x1cf6   :  { %v15558_v56 = vand.u32 4294901760, %v15488_v8 }
0x1cf8   :  { %v15559_v31 = vsub.f32 %v15488_v8, %v15558_v56 }
0x1cfa   :  { %v15560_v59 = vand.u32 4294901760, %v15559_v31 }
0x1cfb   :  { %26657 = vmatmul.mubr.f32.vlgmr.msra.gmra.mrb[68].mxu1 %v13283_v2 }
0x1cfc   :  { %26691 = vmatprep.mubr.msk.f32.mxu1 %vm28322_vm5, %v28321_v32  ;;  %v15561_v27 = vsub.f32 %v15559_v31, %v15560_v59 }
0x1d2d   :  { %v14125_v38 = vpop.xlane.xlu1 %14124 }
0x1d2e   :  { %28254 = vrcp.f32 %v14125_v38  ;;  %v15562_v38 = vand.u32 4294901760, %v15561_v27 }
0x1d31   :  { %v14129_v6 = vpop.permute.xlu1 %14128 }
0x1d32   :  { %v14135_v22 = vand.u32 4294901760, %v14129_v6 }
0x1d34   :  { %26690 = vmatpush3.msra.mxu1 %v14135_v22  ;;  %v14212_v28 = vsub.f32 %v14129_v6, %v14135_v22 }
0x1d35   :  { %26694 = vmatprep.subr.mxu1 %v28321_v32  ;;  %v15033_v0 = vpop.permute.xlu1 %15032 }
0x1d36   :  { %v14213_v39 = vand.u32 4294901760, %v14212_v28  ;;  %v29493_v61 = vand.u32 4294901760, %v15033_v0 }
0x1d38   :  { %v28255_v4 = vpop.eup %28254  ;;  %v14214_v42 = vsub.f32 %v14212_v28, %v14213_v39  ;;  %v29496_v57 = vsub.f32 %v15033_v0, %v29493_v61 }
0x1d39   :  { %v14127_v35 = vmul.f32 %v28255_v4, %v28251_v17  ;;  %v15487_v45 = vpop.permute.xlu1 %15486 }
0x1d3a   :  { %v14215_v53 = vand.u32 4294901760, %v14214_v42  ;;  %v29500_v55 = vand.u32 4294901760, %v29496_v57  ;;  %v15490_v11 = vsel %vm646_vm6, %v15487_v45, 0 }
0x1d3b   :  { %v14132_v5 = vsel %vm646_vm6, %v14127_v35, 0  ;;  %v15493_v2 = vand.u32 4294901760, %v15490_v11 }
0x1d3c   :  { %v14200_v36 = vand.u32 4294901760, %v14132_v5  ;;  %v15118_v48 = vsub.f32 %v29496_v57, %v29500_v55 }
0x1d3d   :  { %v15570_v58 = vsub.f32 %v15490_v11, %v15493_v2 }
0x1d3e   :  { %v14201_v40 = vsub.f32 %v14132_v5, %v14200_v36  ;;  %v29513_v30 = vand.u32 4294901760, %v15118_v48 }
0x1d3f   :  { %v15571_v25 = vand.u32 4294901760, %v15570_v58 }
0x1d40   :  { %v14202_v16 = vand.u32 4294901760, %v14201_v40 }
0x1d41   :  { %v15572_v14 = vsub.f32 %v15570_v58, %v15571_v25 }
0x1d42   :  { %v14203_v49 = vsub.f32 %v14201_v40, %v14202_v16 }
0x1d43   :  { %v15573_v6 = vand.u32 4294901760, %v15572_v14 }
0x1d44   :  { %v14204_v52 = vand.u32 4294901760, %v14203_v49 }
0x1d46   :  { %26692 = vmatmul.mubr.f32.vlgmr.msra.gmra.mrb[70].mxu1 %v14204_v52 }
0x1d47   :  { %26695 = vmatpush3.msra.mxu1 %v14215_v53  ;;  %26696 = vmatprep.mubr.msk.f32.mxu1 %vm28322_vm5, %v28321_v32 }
0x1d48   :  { %26699 = vmatprep.subr.mxu1 %v28321_v32 }
0x1d4e   :  { %26697 = vmatmul.mubr.f32.vlgmr.msra.gmra.mrb[70].mxu1 %v14200_v36 }
0x1d4f   :  { %26700 = vmatpush3.msra.mxu1 %v14212_v28  ;;  %26701 = vmatprep.mubr.msk.f32.mxu1 %vm28322_vm5, %v28321_v32 }
0x1d50   :  { %26704 = vmatprep.subr.mxu1 %v28321_v32 }
0x1d56   :  { %26702 = vmatmul.mubr.f32.vlgmr.msra.gmra.mrb[70].mxu1 %v14201_v40 }
0x1d57   :  { %26705 = vmatpush3.msra.mxu1 %v14135_v22  ;;  %26706 = vmatprep.mubr.msk.f32.mxu1 %vm28322_vm5, %v28321_v32 }
0x1d58   :  { %26709 = vmatprep.subr.mxu1 %v28321_v32 }
0x1d5e   :  { %26707 = vmatmul.mubr.f32.vlgmr.msra.gmra.mrb[70].mxu1 %v14202_v16 }
0x1d5f   :  { %26710 = vmatpush3.msra.mxu1 %v14213_v39  ;;  %26711 = vmatprep.mubr.msk.f32.mxu1 %vm28322_vm5, %v28321_v32 }
0x1d60   :  { %26714 = vmatprep.subr.mxu1 %v28321_v32 }
0x1d66   :  { %26712 = vmatmul.mubr.f32.vlgmr.msra.gmra.mrb[70].mxu1 %v14200_v36 }
0x1d67   :  { %26715 = vmatpush3.msra.mxu1 %v14135_v22  ;;  %26716 = vmatprep.mubr.msk.f32.mxu1 %vm28322_vm5, %v28321_v32 }
0x1d68   :  { %26724 = vmatprep.subr.mxu1 %v28321_v32 }
0x1d6e   :  { %26717 = vmatmul.mubr.f32.vlgmr.msra.gmra.mrb[70].mxu1 %v14200_v36 }
0x1d6f   :  { %26726 = vmatprep.mubr.msk.f32.mxu1 %vm28322_vm5, %v28321_v32  ;;  %26725 = vmatpush3.msra.mxu1 %v29489_v12 }
0x1d70   :  { %26734 = vmatprep.subr.mxu1 %v28321_v32 }
0x1dce   :  { %v13659_v29 = vpop.f32.mrb[68].mxu1 }
0x1dcf   :  { %v26658_v60 = vpop.f32.mrb[69].mxu1  ;;  %v15036_v33 = vsel %vm646_vm6, %v13659_v29, 0 }
0x1dd0   :  { %v15104_v10 = vand.u32 4294901760, %v15036_v33 }
0x1dd2   :  { %v15105_v17 = vsub.f32 %v15036_v33, %v15104_v10 }
0x1dd4   :  { %v15106_v37 = vand.u32 4294901760, %v15105_v17 }
0x1dd6   :  { %v15107_v9 = vsub.f32 %v15105_v17, %v15106_v37 }
0x1dd8   :  { %v15108_v18 = vand.u32 4294901760, %v15107_v9 }
0x1e41   :  { %v14576_v51 = vpop.f32.mrb[70].mxu1 }
0x1e42   :  { %v14584_v54 = vsel %vm646_vm6, %v14576_v51, 0  ;;  %v26718_v13 = vpop.f32.mrb[71].mxu1 }
0x1e43   :  { %v14652_v7 = vand.u32 4294901760, %v14584_v54 }
0x1e45   :  { %v14653_v23 = vsub.f32 %v14584_v54, %v14652_v7  ;;  %26727 = vmatmul.mubr.f32.vlgmr.msra.gmra.mrb[72].mxu1 %v14652_v7 }
0x1e46   :  { %26735 = vmatpush3.msra.mxu1 %v29439_v47  ;;  %26736 = vmatprep.mubr.msk.f32.mxu1 %vm28322_vm5, %v28321_v32 }
0x1e47   :  { %v14654_v20 = vand.u32 4294901760, %v14653_v23  ;;  %26744 = vmatprep.subr.mxu1 %v28321_v32 }
0x1e49   :  { %v14655_v50 = vsub.f32 %v14653_v23, %v14654_v20  ;;  %26737 = vmatmul.mubr.f32.vlgmr.msra.gmra.mrb[74].mxu1 %v14654_v20 }
0x1e4a   :  { %26745 = vmatpush3.msra.mxu1 %v29439_v47  ;;  %26746 = vmatprep.mubr.msk.f32.mxu1 %vm28322_vm5, %v28321_v32 }
0x1e4b   :  { %v14656_v34 = vand.u32 4294901760, %v14655_v50  ;;  %26754 = vmatprep.subr.mxu1 %v28321_v32 }
0x1e4d   :  { %26722 = vmatmul.mubr.f32.vlgmr.msra.gmra.mrb[72].mxu0 %v14656_v34  ;;  %26747 = vmatmul.mubr.f32.vlgmr.msra.gmra.mrb[76].mxu1 %v14652_v7 }
0x1e4e   :  { %26730 = vmatpush3.msra.mxu0 %v29482_v3  ;;  %26731 = vmatprep.mubr.msk.f32.mxu0 %vm28322_vm5, %v28321_v32 }
0x1e4f   :  { %26739 = vmatprep.subr.mxu0 %v28321_v32  ;;  %26755 = vmatpush3.msra.mxu1 %v29513_v30 }
0x1e50   :  { %26756 = vmatprep.mubr.msk.f32.mxu1 %vm28322_vm5, %v28321_v32  ;;  %26764 = vmatprep.subr.mxu1 %v28321_v32 }
0x1e51   :  { %26732 = vmatmul.mubr.f32.vlgmr.msra.gmra.mrb[74].mxu0 %v14653_v23  ;;  %26757 = vmatmul.mubr.f32.vlgmr.msra.gmra.mrb[78].mxu1 %v15104_v10 }
0x1e52   :  { %26740 = vmatpush3.msra.mxu0 %v29485_v63  ;;  %26741 = vmatprep.mubr.msk.f32.mxu0 %vm28322_vm5, %v28321_v32 }
0x1e53   :  { %26765 = vmatpush3.msra.mxu1 %v29493_v61  ;;  %26766 = vmatprep.mubr.msk.f32.mxu1 %vm28322_vm5, %v28321_v32 }
0x1e54   :  { %26749 = vmatprep.subr.mxu0 %v28321_v32  ;;  %26774 = vmatprep.subr.mxu1 %v28321_v32 }
0x1e55   :  { %26742 = vmatmul.mubr.f32.vlgmr.msra.gmra.mrb[76].mxu0 %v14652_v7  ;;  %26767 = vmatmul.mubr.f32.vlgmr.msra.gmra.mrb[80].mxu1 %v15106_v37 }
0x1e56   :  { %26750 = vmatpush3.msra.mxu0 %v29493_v61  ;;  %26751 = vmatprep.mubr.msk.f32.mxu0 %vm28322_vm5, %v28321_v32 }
0x1e57   :  { %26775 = vmatpush3.msra.mxu1 %v29493_v61  ;;  %26776 = vmatprep.mubr.msk.f32.mxu1 %vm28322_vm5, %v28321_v32 }
0x1e58   :  { %26759 = vmatprep.subr.mxu0 %v28321_v32  ;;  %26809 = vmatprep.subr.mxu1 %v28321_v32 }
0x1e59   :  { %26752 = vmatmul.mubr.f32.vlgmr.msra.gmra.mrb[78].mxu0 %v15108_v18  ;;  %26777 = vmatmul.mubr.f32.vlgmr.msra.gmra.mrb[82].mxu1 %v15104_v10 }
0x1e5a   :  { %26760 = vmatpush3.msra.mxu0 %v29496_v57  ;;  %26761 = vmatprep.mubr.msk.f32.mxu0 %vm28322_vm5, %v28321_v32 }
0x1e5b   :  { %26769 = vmatprep.subr.mxu0 %v28321_v32  ;;  %26811 = vmatprep.mubr.msk.f32.mxu1 %vm28322_vm5, %v28321_v32 }
0x1e5d   :  { %26762 = vmatmul.mubr.f32.vlgmr.msra.gmra.mrb[80].mxu0 %v15105_v17 }
0x1e5e   :  { %26770 = vmatpush3.msra.mxu0 %v29500_v55  ;;  %26771 = vmatprep.mubr.msk.f32.mxu0 %vm28322_vm5, %v28321_v32 }
0x1e5f   :  { %26779 = vmatprep.subr.mxu0 %v28321_v32 }
0x1e61   :  { %26772 = vmatmul.mubr.f32.vlgmr.msra.gmra.mrb[82].mxu0 %v15104_v10 }
0x1e62   :  { %26781 = vmatprep.mubr.msk.f32.mxu0 %vm28322_vm5, %v28321_v32 }
0x1e65   :  { %26780 = vmatpush3.xpose.msra.mxu0 %v15493_v2 }
0x1e66   :  { %26784 = vmatprep.subr.mxu0 %v28321_v32 }
0x1e68   :  { %26782 = vmatmul.mubr.f32.vlgmr.msra.gmra.mrb[84].mxu0 %v15562_v38 }
0x1e69   :  { %26785 = vmatpush3.xpose.msra.mxu0 %v15573_v6  ;;  %26786 = vmatprep.mubr.msk.f32.mxu0 %vm28322_vm5, %v28321_v32 }
0x1e6a   :  { %26789 = vmatprep.subr.mxu0 %v28321_v32 }
0x1e70   :  { %26787 = vmatmul.mubr.f32.vlgmr.msra.gmra.mrb[84].mxu0 %v15558_v56 }
0x1e71   :  { %26790 = vmatpush3.xpose.msra.mxu0 %v15570_v58  ;;  %26791 = vmatprep.mubr.msk.f32.mxu0 %vm28322_vm5, %v28321_v32 }
0x1e72   :  { %26794 = vmatprep.subr.mxu0 %v28321_v32 }
0x1e78   :  { %26792 = vmatmul.mubr.f32.vlgmr.msra.gmra.mrb[84].mxu0 %v15559_v31 }
0x1e79   :  { %26795 = vmatpush3.xpose.msra.mxu0 %v15493_v2  ;;  %26796 = vmatprep.mubr.msk.f32.mxu0 %vm28322_vm5, %v28321_v32 }
0x1e7a   :  { %26799 = vmatprep.subr.mxu0 %v28321_v32 }
0x1e80   :  { %26797 = vmatmul.mubr.f32.vlgmr.msra.gmra.mrb[84].mxu0 %v15560_v59 }
0x1e81   :  { %26800 = vmatpush3.xpose.msra.mxu0 %v15571_v25  ;;  %26801 = vmatprep.mubr.msk.f32.mxu0 %vm28322_vm5, %v28321_v32 }
0x1e82   :  { %26804 = vmatprep.subr.mxu0 %v28321_v32 }
0x1e88   :  { %26802 = vmatmul.mubr.f32.vlgmr.msra.gmra.mrb[84].mxu0 %v15558_v56 }
0x1e89   :  { %26805 = vmatpush3.xpose.msra.mxu0 %v15493_v2  ;;  %26806 = vmatprep.mubr.msk.f32.mxu0 %vm28322_vm5, %v28321_v32 }
0x1e8a   :  { %26839 = vmatprep.subr.mxu0 %v28321_v32 }
0x1e90   :  { %26807 = vmatmul.mubr.f32.vlgmr.msra.gmra.mrb[84].mxu0 %v15558_v56 }
0x1e91   :  { %26841 = vmatprep.mubr.msk.f32.mxu0 %vm28322_vm5, %v28321_v32 }
0x1f18   :  { %v14734_v22 = vpop.f32.mrb[72].mxu1 }
0x1f19   :  { %v26728_v4 = vpop.f32.mrb[73].mxu1 }
0x1f1c   :  { %v14882_v35 = vpop.f32.mrb[74].mxu1 }
0x1f1d   :  { %v26738_v28 = vpop.f32.mrb[75].mxu1 }
0x1f20   :  { %v14658_v5 = vpop.f32.mrb[72].mxu0  ;;  %v15028_v36 = vpop.f32.mrb[76].mxu1 }
0x1f21   :  { %v14735_v39 = vadd.f32 %v14734_v22, %v14658_v5  ;;  %v26723_v40 = vpop.f32.mrb[73].mxu0  ;;  %v26748_v16 = vpop.f32.mrb[77].mxu1  ;;  %v28293_v22 = vld [vmem:[%s30258_s4 + $0x38] sm:$0xff] }
0x1f24   :  { %v14808_v42 = vpop.f32.mrb[74].mxu0  ;;  %v15186_v49 = vpop.f32.mrb[78].mxu1 }
0x1f25   :  { %v14809_v52 = vadd.f32 %v14808_v42, %v14735_v39  ;;  %v26733_v53 = vpop.f32.mrb[75].mxu0  ;;  %v26758_v1 = vpop.f32.mrb[79].mxu1 }
0x1f27   :  { %v14883_v29 = vadd.f32 %v14882_v35, %v14809_v52 }
0x1f28   :  { %v14956_v60 = vpop.f32.mrb[76].mxu0  ;;  %v15334_v0 = vpop.f32.mrb[80].mxu1 }
0x1f29   :  { %v14957_v51 = vadd.f32 %v14956_v60, %v14883_v29  ;;  %v26743_v54 = vpop.f32.mrb[77].mxu0  ;;  %v26768_v13 = vpop.f32.mrb[81].mxu1 }
0x1f2b   :  { %v15029_v7 = vadd.f32 %v15028_v36, %v14957_v51 }
0x1f2c   :  { %v15110_v33 = vpop.f32.mrb[78].mxu0  ;;  %v15480_v23 = vpop.f32.mrb[82].mxu1 }
0x1f2d   :  { %v15111_v10 = vadd.f32 %v15110_v33, %v15029_v7  ;;  %v26753_v20 = vpop.f32.mrb[79].mxu0  ;;  %v26778_v48 = vpop.f32.mrb[83].mxu1 }
0x1f2f   :  { %v15187_v50 = vadd.f32 %v15186_v49, %v15111_v10 }
0x1f30   :  { %v15260_v17 = vpop.f32.mrb[80].mxu0 }
0x1f31   :  { %v15261_v34 = vadd.f32 %v15260_v17, %v15187_v50  ;;  %v26763_v37 = vpop.f32.mrb[81].mxu0 }
0x1f33   :  { %v15335_v46 = vadd.f32 %v15334_v0, %v15261_v34 }
0x1f34   :  { %v15408_v45 = vpop.f32.mrb[82].mxu0 }
0x1f35   :  { %v15409_v8 = vadd.f32 %v15408_v45, %v15335_v46  ;;  %v26773_v9 = vpop.f32.mrb[83].mxu0 }
0x1f37   :  { %v29571_v11 = vadd.f32 %v15480_v23, %v15409_v8 }
0x1f63   :  { %v15934_v56 = vpop.f32.mrb[84].mxu0 }
0x1f64   :  { %v27805_v2 = vadd.f32 %v15934_v56, %v29415_v19  ;;  %v26808_v18 = vpop.f32.mrb[85].mxu0 }
0x1f66   :  { %v15938_v31 = vsel %vm646_vm6, %v27805_v2, -inf }
0x1f67   :  { %15939 = vmax.xlane.f32.xlu0 %v15938_v31 }
0x1f7d   :  { %15949 = vrot.lane.b32.xlu0 %v29367_v24, %s28330_s18 }
0x1f81   :  { %16854 = vrot.lane.b32.xlu0 %v29356_v44, %s28331_s19 }
0x1ff4   :  { %v15940_v58 = vpop.xlane.xlu0 %15939 }
0x1ff5   :  { %v15941_v59 = vsub.f32 %v27805_v2, %v15940_v58 }
0x1ff7   :  { %v15942_v25 = vmul.f32 1.442695, %v15941_v59 }
0x1ff8   :  { %v15950_v27 = vpop.permute.xlu0 %15949 }
0x1ff9   :  { %28256 = vpow2.f32 %v15942_v25  ;;  %v15956_v14 = vand.u32 4294901760, %v15950_v27 }
0x1ffb   :  { %26810 = vmatpush3.msra.mxu1 %v15956_v14  ;;  %v16033_v5 = vsub.f32 %v15950_v27, %v15956_v14 }
0x1ffc   :  { %26814 = vmatprep.subr.mxu1 %v28321_v32  ;;  %v16855_v10 = vpop.permute.xlu0 %16854 }
0x1ffd   :  { %v16034_v16 = vand.u32 4294901760, %v16033_v5  ;;  %v16858_v50 = vsel %vm646_vm6, %v16855_v10, 0 }
0x1ffe   :  { %v16928_v46 = vand.u32 4294901760, %v16858_v50 }
0x1fff   :  { %v16035_v52 = vsub.f32 %v16033_v5, %v16034_v16 }
0x2000   :  { %v16929_v9 = vsub.f32 %v16858_v50, %v16928_v46 }
0x2001   :  { %v16036_v29 = vand.u32 4294901760, %v16035_v52 }
0x2002   :  { %v16930_v2 = vand.u32 4294901760, %v16929_v9 }
0x2003   :  { %v28257_v38 = vpop.eup %28256 }
0x2004   :  { %v15944_v6 = vsel %vm646_vm6, %v28257_v38, 0.0  ;;  %v16931_v31 = vsub.f32 %v16929_v9, %v16930_v2 }
0x2005   :  { %15945 = vadd.xlane.f32.xlu1 %v15944_v6 }
0x2006   :  { %v16932_v59 = vand.u32 4294901760, %v16931_v31 }
0x2016   :  { %16401 = vrot.lane.b32.xlu1 %v28293_v22, %s28328_s16 }
0x201a   :  { %16856 = vrot.lane.b32.xlu1 %v29367_v24, %s28331_s19 }
0x2092   :  { %v15946_v44 = vpop.xlane.xlu1 %15945 }
0x2093   :  { %28258 = vrcp.f32 %v15946_v44 }
0x2096   :  { %v16402_v4 = vpop.permute.xlu1 %16401 }
0x2097   :  { %v29587_v35 = vand.u32 4294901760, %v16402_v4 }
0x2099   :  { %26840 = vmatpush3.msra.mxu0 %v29587_v35  ;;  %v29610_v60 = vsub.f32 %v16402_v4, %v29587_v35 }
0x209a   :  { %26849 = vmatprep.subr.mxu0 %v28321_v32  ;;  %v16857_v20 = vpop.permute.xlu1 %16856 }
0x209b   :  { %v29613_v0 = vand.u32 4294901760, %v29610_v60  ;;  %v16860_v34 = vsel %vm646_vm6, %v16857_v20, 0 }
0x209c   :  { %v16863_v45 = vand.u32 4294901760, %v16860_v34 }
0x209d   :  { %v28259_v28 = vpop.eup %28258  ;;  %v16487_v51 = vsub.f32 %v29610_v60, %v29613_v0 }
0x209e   :  { %v15948_v36 = vmul.f32 %v28259_v28, %v28257_v38  ;;  %v16940_v56 = vsub.f32 %v16860_v34, %v16863_v45 }
0x209f   :  { %v29617_v54 = vand.u32 4294901760, %v16487_v51 }
0x20a0   :  { %v15953_v39 = vsel %vm646_vm6, %v15948_v36, 0  ;;  %v16941_v18 = vand.u32 4294901760, %v16940_v56 }
0x20a1   :  { %v16021_v40 = vand.u32 4294901760, %v15953_v39 }
0x20a2   :  { %v16942_v58 = vsub.f32 %v16940_v56, %v16941_v18 }
0x20a3   :  { %v16022_v42 = vsub.f32 %v15953_v39, %v16021_v40 }
0x20a4   :  { %v16943_v25 = vand.u32 4294901760, %v16942_v58 }
0x20a5   :  { %v16023_v49 = vand.u32 4294901760, %v16022_v42 }
0x20a7   :  { %v16024_v53 = vsub.f32 %v16022_v42, %v16023_v49 }
0x20a9   :  { %v16025_v1 = vand.u32 4294901760, %v16024_v53 }
0x20ab   :  { %26812 = vmatmul.mubr.f32.vlgmr.msra.gmra.mrb[84].mxu1 %v16025_v1 }
0x20ac   :  { %26815 = vmatpush3.msra.mxu1 %v16036_v29  ;;  %26816 = vmatprep.mubr.msk.f32.mxu1 %vm28322_vm5, %v28321_v32 }
0x20ad   :  { %26819 = vmatprep.subr.mxu1 %v28321_v32 }
0x20b3   :  { %26817 = vmatmul.mubr.f32.vlgmr.msra.gmra.mrb[84].mxu1 %v16021_v40 }
0x20b4   :  { %26820 = vmatpush3.msra.mxu1 %v16033_v5  ;;  %26821 = vmatprep.mubr.msk.f32.mxu1 %vm28322_vm5, %v28321_v32 }
0x20b5   :  { %26824 = vmatprep.subr.mxu1 %v28321_v32 }
0x20bb   :  { %26822 = vmatmul.mubr.f32.vlgmr.msra.gmra.mrb[84].mxu1 %v16022_v42 }
0x20bc   :  { %26825 = vmatpush3.msra.mxu1 %v15956_v14  ;;  %26826 = vmatprep.mubr.msk.f32.mxu1 %vm28322_vm5, %v28321_v32 }
0x20bd   :  { %26829 = vmatprep.subr.mxu1 %v28321_v32 }
0x20c3   :  { %26827 = vmatmul.mubr.f32.vlgmr.msra.gmra.mrb[84].mxu1 %v16023_v49 }
0x20c4   :  { %26830 = vmatpush3.msra.mxu1 %v16034_v16  ;;  %26831 = vmatprep.mubr.msk.f32.mxu1 %vm28322_vm5, %v28321_v32 }
0x20c5   :  { %26834 = vmatprep.subr.mxu1 %v28321_v32 }
0x20cb   :  { %26832 = vmatmul.mubr.f32.vlgmr.msra.gmra.mrb[84].mxu1 %v16021_v40 }
0x20cc   :  { %26835 = vmatpush3.msra.mxu1 %v15956_v14  ;;  %26836 = vmatprep.mubr.msk.f32.mxu1 %vm28322_vm5, %v28321_v32 }
0x20cd   :  { %26844 = vmatprep.subr.mxu1 %v28321_v32 }
0x20d3   :  { %26837 = vmatmul.mubr.f32.vlgmr.msra.gmra.mrb[84].mxu1 %v16021_v40 }
0x20d4   :  { %26846 = vmatprep.mubr.msk.f32.mxu1 %vm28322_vm5, %v28321_v32  ;;  %26845 = vmatpush3.msra.mxu1 %v29617_v54 }
0x20d5   :  { %26854 = vmatprep.subr.mxu1 %v28321_v32 }
0x21a6   :  { %v16397_v13 = vpop.f32.mrb[84].mxu1 }
0x21a7   :  { %v16405_v7 = vsel %vm646_vm6, %v16397_v13, 0  ;;  %v26838_v33 = vpop.f32.mrb[85].mxu1 }
0x21a8   :  { %v16473_v23 = vand.u32 4294901760, %v16405_v7 }
0x21aa   :  { %v16474_v48 = vsub.f32 %v16405_v7, %v16473_v23  ;;  %26847 = vmatmul.mubr.f32.vlgmr.msra.gmra.mrb[86].mxu1 %v16473_v23 }
0x21ab   :  { %26855 = vmatpush3.msra.mxu1 %v29587_v35  ;;  %26856 = vmatprep.mubr.msk.f32.mxu1 %vm28322_vm5, %v28321_v32 }
0x21ac   :  { %v16475_v17 = vand.u32 4294901760, %v16474_v48  ;;  %26864 = vmatprep.subr.mxu1 %v28321_v32 }
0x21ae   :  { %v16476_v37 = vsub.f32 %v16474_v48, %v16475_v17  ;;  %26857 = vmatmul.mubr.f32.vlgmr.msra.gmra.mrb[88].mxu1 %v16475_v17 }
0x21af   :  { %26865 = vmatpush3.msra.mxu1 %v29587_v35  ;;  %26866 = vmatprep.mubr.msk.f32.mxu1 %vm28322_vm5, %v28321_v32 }
0x21b0   :  { %v16477_v8 = vand.u32 4294901760, %v16476_v37  ;;  %26899 = vmatprep.subr.mxu1 %v28321_v32 }
0x21b2   :  { %26842 = vmatmul.mubr.f32.vlgmr.msra.gmra.mrb[86].mxu0 %v16477_v8  ;;  %26867 = vmatmul.mubr.f32.vlgmr.msra.gmra.mrb[90].mxu1 %v16473_v23 }
0x21b3   :  { %26850 = vmatpush3.msra.mxu0 %v29610_v60  ;;  %26851 = vmatprep.mubr.msk.f32.mxu0 %vm28322_vm5, %v28321_v32 }
0x21b4   :  { %26859 = vmatprep.subr.mxu0 %v28321_v32  ;;  %26901 = vmatprep.mubr.msk.f32.mxu1 %vm28322_vm5, %v28321_v32 }
0x21b6   :  { %26852 = vmatmul.mubr.f32.vlgmr.msra.gmra.mrb[88].mxu0 %v16474_v48 }
0x21b7   :  { %26860 = vmatpush3.msra.mxu0 %v29613_v0  ;;  %26861 = vmatprep.mubr.msk.f32.mxu0 %vm28322_vm5, %v28321_v32 }
0x21b8   :  { %26869 = vmatprep.subr.mxu0 %v28321_v32 }
0x21ba   :  { %26862 = vmatmul.mubr.f32.vlgmr.msra.gmra.mrb[90].mxu0 %v16473_v23 }
0x21bb   :  { %26871 = vmatprep.mubr.msk.f32.mxu0 %vm28322_vm5, %v28321_v32 }
0x21be   :  { %26870 = vmatpush3.xpose.msra.mxu0 %v16863_v45 }
0x21bf   :  { %26874 = vmatprep.subr.mxu0 %v28321_v32 }
0x21c1   :  { %26872 = vmatmul.mubr.f32.vlgmr.msra.gmra.mrb[92].mxu0 %v16932_v59 }
0x21c2   :  { %26875 = vmatpush3.xpose.msra.mxu0 %v16943_v25  ;;  %26876 = vmatprep.mubr.msk.f32.mxu0 %vm28322_vm5, %v28321_v32 }
0x21c3   :  { %26879 = vmatprep.subr.mxu0 %v28321_v32 }
0x21c9   :  { %26877 = vmatmul.mubr.f32.vlgmr.msra.gmra.mrb[92].mxu0 %v16928_v46 }
0x21ca   :  { %26880 = vmatpush3.xpose.msra.mxu0 %v16940_v56  ;;  %26881 = vmatprep.mubr.msk.f32.mxu0 %vm28322_vm5, %v28321_v32 }
0x21cb   :  { %26884 = vmatprep.subr.mxu0 %v28321_v32 }
0x21d1   :  { %26882 = vmatmul.mubr.f32.vlgmr.msra.gmra.mrb[92].mxu0 %v16929_v9 }
0x21d2   :  { %26885 = vmatpush3.xpose.msra.mxu0 %v16863_v45  ;;  %26886 = vmatprep.mubr.msk.f32.mxu0 %vm28322_vm5, %v28321_v32 }
0x21d3   :  { %26889 = vmatprep.subr.mxu0 %v28321_v32 }
0x21d9   :  { %26887 = vmatmul.mubr.f32.vlgmr.msra.gmra.mrb[92].mxu0 %v16930_v2 }
0x21da   :  { %26890 = vmatpush3.xpose.msra.mxu0 %v16941_v18  ;;  %26891 = vmatprep.mubr.msk.f32.mxu0 %vm28322_vm5, %v28321_v32 }
0x21db   :  { %26894 = vmatprep.subr.mxu0 %v28321_v32 }
0x21e1   :  { %26892 = vmatmul.mubr.f32.vlgmr.msra.gmra.mrb[92].mxu0 %v16928_v46 }
0x21e2   :  { %26895 = vmatpush3.xpose.msra.mxu0 %v16863_v45  ;;  %26896 = vmatprep.mubr.msk.f32.mxu0 %vm28322_vm5, %v28321_v32 }
0x21e3   :  { %26929 = vmatprep.subr.mxu0 %v28321_v32 }
0x21e9   :  { %26897 = vmatmul.mubr.f32.vlgmr.msra.gmra.mrb[92].mxu0 %v16928_v46 }
0x21ea   :  { %26931 = vmatprep.mubr.msk.f32.mxu0 %vm28322_vm5, %v28321_v32 }
0x227d   :  { %v16555_v27 = vpop.f32.mrb[86].mxu1 }
0x227e   :  { %v26848_v14 = vpop.f32.mrb[87].mxu1 }
0x2281   :  { %v16703_v38 = vpop.f32.mrb[88].mxu1 }
0x2282   :  { %v26858_v6 = vpop.f32.mrb[89].mxu1 }
0x2285   :  { %v16479_v22 = vpop.f32.mrb[86].mxu0  ;;  %v16849_v44 = vpop.f32.mrb[90].mxu1 }
0x2286   :  { %v16556_v4 = vadd.f32 %v16555_v27, %v16479_v22  ;;  %v26843_v28 = vpop.f32.mrb[87].mxu0  ;;  %v26868_v5 = vpop.f32.mrb[91].mxu1 }
0x2289   :  { %v16629_v36 = vpop.f32.mrb[88].mxu0 }
0x228a   :  { %v16630_v39 = vadd.f32 %v16629_v36, %v16556_v4  ;;  %v26853_v40 = vpop.f32.mrb[89].mxu0  ;;  %v18227_v36 = vsel %vm646_vm6, %v29354_v43, 0 }
0x228b   :  { %v18230_v40 = vsel %vm646_vm6, %v29365_v26, 0 }
0x228c   :  { %v16704_v16 = vadd.f32 %v16703_v38, %v16630_v39 }
0x228d   :  { %v16777_v42 = vpop.f32.mrb[90].mxu0 }
0x228e   :  { %v16778_v49 = vadd.f32 %v16777_v42, %v16704_v16  ;;  %v26863_v52 = vpop.f32.mrb[91].mxu0  ;;  %v18298_v42 = vand.u32 4294901760, %v18227_v36 }
0x228f   :  { %v18233_v52 = vand.u32 4294901760, %v18230_v40 }
0x2290   :  { %v16850_v53 = vadd.f32 %v16849_v44, %v16778_v49 }
0x2292   :  { %v29663_v1 = vadd.f32 %v16850_v53, %v29571_v11  ;;  %v18299_v53 = vsub.f32 %v18227_v36, %v18298_v42 }
0x22bc   :  { %v17304_v29 = vpop.f32.mrb[92].mxu0 }
0x22bd   :  { %v27806_v51 = vadd.f32 %v17304_v29, %v29415_v19  ;;  %v26898_v13 = vpop.f32.mrb[93].mxu0  ;;  %v18310_v29 = vsub.f32 %v18230_v40, %v18233_v52 }
0x22bf   :  { %v17308_v7 = vsel %vm646_vm6, %v27806_v51, -inf  ;;  %v18311_v13 = vand.u32 4294901760, %v18310_v29 }
0x22c0   :  { %17309 = vmax.xlane.f32.xlu0 %v17308_v7 }
0x22d6   :  { %17319 = vrot.lane.b32.xlu0 %v29367_v24, %s28333_s21  ;;  %v28294_v24 = vld [vmem:[%s30258_s4 + $0x50] sm:$0xff] }
0x22da   :  { %19141 = vrot.lane.b32.xlu0 %v29354_v43, %s28323_s9 }
0x234d   :  { %v17310_v33 = vpop.xlane.xlu0 %17309 }
0x234e   :  { %v17311_v23 = vsub.f32 %v27806_v51, %v17310_v33  ;;  %v18300_v51 = vand.u32 4294901760, %v18299_v53  ;;  %v18312_v33 = vsub.f32 %v18310_v29, %v18311_v13 }
0x2350   :  { %v17312_v10 = vmul.f32 1.442695, %v17311_v23  ;;  %v18301_v7 = vsub.f32 %v18299_v53, %v18300_v51 }
0x2351   :  { %v17320_v20 = vpop.permute.xlu0 %17319 }
0x2352   :  { %28260 = vpow2.f32 %v17312_v10  ;;  %v17326_v11 = vand.u32 4294901760, %v17320_v20  ;;  %v18302_v23 = vand.u32 4294901760, %v18301_v7  ;;  %v18313_v10 = vand.u32 4294901760, %v18312_v33 }
0x2354   :  { %26900 = vmatpush3.msra.mxu1 %v17326_v11  ;;  %v17403_v46 = vsub.f32 %v17320_v20, %v17326_v11 }
0x2355   :  { %26904 = vmatprep.subr.mxu1 %v28321_v32  ;;  %v19142_v20 = vpop.permute.xlu0 %19141 }
0x2356   :  { %v17404_v56 = vand.u32 4294901760, %v17403_v46 }
0x2358   :  { %v17405_v31 = vsub.f32 %v17403_v46, %v17404_v56 }
0x235a   :  { %v17406_v25 = vand.u32 4294901760, %v17405_v31 }
0x235c   :  { %v28261_v19 = vpop.eup %28260 }
0x235d   :  { %v17314_v48 = vsel %vm646_vm6, %v28261_v19, 0.0 }
0x235e   :  { %17315 = vadd.xlane.f32.xlu1 %v17314_v48 }
0x236f   :  { %17771 = vrot.lane.b32.xlu1 %v28294_v24, %s28328_s16 }
0x2373   :  { %19143 = vrot.lane.b32.xlu1 %v29365_v26, %s28323_s9 }
0x23eb   :  { %v17316_v50 = vpop.xlane.xlu1 %17315 }
0x23ec   :  { %28262 = vrcp.f32 %v17316_v50 }
0x23ef   :  { %v17772_v17 = vpop.permute.xlu1 %17771 }
0x23f0   :  { %v29679_v34 = vand.u32 4294901760, %v17772_v17 }
0x23f2   :  { %26930 = vmatpush3.msra.mxu0 %v29679_v34  ;;  %v29702_v27 = vsub.f32 %v17772_v17, %v29679_v34 }
0x23f3   :  { %26939 = vmatprep.subr.mxu0 %v28321_v32 }
0x23f4   :  { %v29705_v14 = vand.u32 4294901760, %v29702_v27 }
0x23f6   :  { %v28263_v37 = vpop.eup %28262  ;;  %v17857_v38 = vsub.f32 %v29702_v27, %v29705_v14 }
0x23f7   :  { %v17318_v45 = vmul.f32 %v28263_v37, %v28261_v19  ;;  %v19145_v19 = vsel %vm646_vm6, %v19142_v20, 0 }
0x23f8   :  { %v29709_v6 = vand.u32 4294901760, %v17857_v38  ;;  %v19215_v24 = vand.u32 4294901760, %v19145_v19 }
0x23f9   :  { %v17323_v8 = vsel %vm646_vm6, %v17318_v45, 0 }
0x23fa   :  { %v17391_v9 = vand.u32 4294901760, %v17323_v8  ;;  %v19216_v17 = vsub.f32 %v19145_v19, %v19215_v24 }
0x23fc   :  { %v17392_v2 = vsub.f32 %v17323_v8, %v17391_v9 }
0x23fe   :  { %v17393_v18 = vand.u32 4294901760, %v17392_v2 }
0x2400   :  { %v17394_v58 = vsub.f32 %v17392_v2, %v17393_v18 }
0x2402   :  { %v17395_v59 = vand.u32 4294901760, %v17394_v58 }
0x2404   :  { %26902 = vmatmul.mubr.f32.vlgmr.msra.gmra.mrb[92].mxu1 %v17395_v59 }
0x2405   :  { %26905 = vmatpush3.msra.mxu1 %v17406_v25  ;;  %26906 = vmatprep.mubr.msk.f32.mxu1 %vm28322_vm5, %v28321_v32 }
0x2406   :  { %26909 = vmatprep.subr.mxu1 %v28321_v32 }
0x240c   :  { %26907 = vmatmul.mubr.f32.vlgmr.msra.gmra.mrb[92].mxu1 %v17391_v9 }
0x240d   :  { %26910 = vmatpush3.msra.mxu1 %v17403_v46  ;;  %26911 = vmatprep.mubr.msk.f32.mxu1 %vm28322_vm5, %v28321_v32  ;;  %v19217_v46 = vand.u32 4294901760, %v19216_v17 }
0x240e   :  { %26914 = vmatprep.subr.mxu1 %v28321_v32 }
0x240f   :  { %v19218_v8 = vsub.f32 %v19216_v17, %v19217_v46 }
0x2414   :  { %26912 = vmatmul.mubr.f32.vlgmr.msra.gmra.mrb[92].mxu1 %v17392_v2 }
0x2415   :  { %26915 = vmatpush3.msra.mxu1 %v17326_v11  ;;  %26916 = vmatprep.mubr.msk.f32.mxu1 %vm28322_vm5, %v28321_v32 }
0x2416   :  { %26919 = vmatprep.subr.mxu1 %v28321_v32 }
0x241c   :  { %26917 = vmatmul.mubr.f32.vlgmr.msra.gmra.mrb[92].mxu1 %v17393_v18 }
0x241d   :  { %26920 = vmatpush3.msra.mxu1 %v17404_v56  ;;  %26921 = vmatprep.mubr.msk.f32.mxu1 %vm28322_vm5, %v28321_v32  ;;  %v19219_v56 = vand.u32 4294901760, %v19218_v8 }
0x241e   :  { %26924 = vmatprep.subr.mxu1 %v28321_v32 }
0x2424   :  { %26922 = vmatmul.mubr.f32.vlgmr.msra.gmra.mrb[92].mxu1 %v17391_v9 }
0x2425   :  { %26925 = vmatpush3.msra.mxu1 %v17326_v11  ;;  %26926 = vmatprep.mubr.msk.f32.mxu1 %vm28322_vm5, %v28321_v32  ;;  %v19144_v11 = vpop.permute.xlu1 %19143 }
0x2426   :  { %26934 = vmatprep.subr.mxu1 %v28321_v32  ;;  %v19147_v48 = vsel %vm646_vm6, %v19144_v11, 0 }
0x2427   :  { %v19150_v50 = vand.u32 4294901760, %v19147_v48 }
0x2429   :  { %v19227_v37 = vsub.f32 %v19147_v48, %v19150_v50 }
0x242b   :  { %v19228_v45 = vand.u32 4294901760, %v19227_v37 }
0x242c   :  { %26927 = vmatmul.mubr.f32.vlgmr.msra.gmra.mrb[92].mxu1 %v17391_v9 }
0x242d   :  { %26936 = vmatprep.mubr.msk.f32.mxu1 %vm28322_vm5, %v28321_v32  ;;  %26935 = vmatpush3.msra.mxu1 %v29709_v6  ;;  %v19229_v9 = vsub.f32 %v19227_v37, %v19228_v45 }
0x242e   :  { %26944 = vmatprep.subr.mxu1 %v28321_v32 }
0x242f   :  { %v19230_v2 = vand.u32 4294901760, %v19229_v9 }
0x24ff   :  { %v17767_v22 = vpop.f32.mrb[92].mxu1 }
0x2500   :  { %v17775_v44 = vsel %vm646_vm6, %v17767_v22, 0  ;;  %v26928_v4 = vpop.f32.mrb[93].mxu1 }
0x2501   :  { %v17843_v28 = vand.u32 4294901760, %v17775_v44 }
0x2503   :  { %v17844_v5 = vsub.f32 %v17775_v44, %v17843_v28  ;;  %26937 = vmatmul.mubr.f32.vlgmr.msra.gmra.mrb[94].mxu1 %v17843_v28 }
0x2504   :  { %26945 = vmatpush3.msra.mxu1 %v29679_v34  ;;  %26946 = vmatprep.mubr.msk.f32.mxu1 %vm28322_vm5, %v28321_v32 }
0x2505   :  { %v17845_v39 = vand.u32 4294901760, %v17844_v5  ;;  %26954 = vmatprep.subr.mxu1 %v28321_v32 }
0x2507   :  { %v17846_v16 = vsub.f32 %v17844_v5, %v17845_v39  ;;  %26947 = vmatmul.mubr.f32.vlgmr.msra.gmra.mrb[96].mxu1 %v17845_v39 }
0x2508   :  { %26955 = vmatpush3.msra.mxu1 %v29679_v34  ;;  %26956 = vmatprep.mubr.msk.f32.mxu1 %vm28322_vm5, %v28321_v32 }
0x2509   :  { %v17847_v49 = vand.u32 4294901760, %v17846_v16  ;;  %26989 = vmatprep.subr.mxu1 %v28321_v32 }
0x250b   :  { %26932 = vmatmul.mubr.f32.vlgmr.msra.gmra.mrb[94].mxu0 %v17847_v49  ;;  %26957 = vmatmul.mubr.f32.vlgmr.msra.gmra.mrb[98].mxu1 %v17843_v28 }
0x250c   :  { %26940 = vmatpush3.msra.mxu0 %v29702_v27  ;;  %26941 = vmatprep.mubr.msk.f32.mxu0 %vm28322_vm5, %v28321_v32 }
0x250d   :  { %26949 = vmatprep.subr.mxu0 %v28321_v32  ;;  %26991 = vmatprep.mubr.msk.f32.mxu1 %vm28322_vm5, %v28321_v32 }
0x250f   :  { %26942 = vmatmul.mubr.f32.vlgmr.msra.gmra.mrb[96].mxu0 %v17844_v5 }
0x2510   :  { %26950 = vmatpush3.msra.mxu0 %v29705_v14  ;;  %26951 = vmatprep.mubr.msk.f32.mxu0 %vm28322_vm5, %v28321_v32 }
0x2511   :  { %26959 = vmatprep.subr.mxu0 %v28321_v32 }
0x2513   :  { %26952 = vmatmul.mubr.f32.vlgmr.msra.gmra.mrb[98].mxu0 %v17843_v28 }
0x2514   :  { %26961 = vmatprep.mubr.msk.f32.mxu0 %vm28322_vm5, %v28321_v32 }
0x2517   :  { %26960 = vmatpush3.xpose.msra.mxu0 %v18233_v52 }
0x2518   :  { %26964 = vmatprep.subr.mxu0 %v28321_v32 }
0x251a   :  { %26962 = vmatmul.mubr.f32.vlgmr.msra.gmra.mrb[100].mxu0 %v18302_v23 }
0x251b   :  { %26965 = vmatpush3.xpose.msra.mxu0 %v18313_v10  ;;  %26966 = vmatprep.mubr.msk.f32.mxu0 %vm28322_vm5, %v28321_v32 }
0x251c   :  { %26969 = vmatprep.subr.mxu0 %v28321_v32 }
0x2522   :  { %26967 = vmatmul.mubr.f32.vlgmr.msra.gmra.mrb[100].mxu0 %v18298_v42 }
0x2523   :  { %26970 = vmatpush3.xpose.msra.mxu0 %v18310_v29  ;;  %26971 = vmatprep.mubr.msk.f32.mxu0 %vm28322_vm5, %v28321_v32 }
0x2524   :  { %26974 = vmatprep.subr.mxu0 %v28321_v32 }
0x252a   :  { %26972 = vmatmul.mubr.f32.vlgmr.msra.gmra.mrb[100].mxu0 %v18299_v53  ;;  %v12745_v53 = vld [vmem:[%s30257_s3 + $0x8] sm:$0xff] }
0x252b   :  { %26975 = vmatpush3.xpose.msra.mxu0 %v18233_v52  ;;  %26976 = vmatprep.mubr.msk.f32.mxu0 %vm28322_vm5, %v28321_v32  ;;  %vm18224_vm14 = vcmp.eq.f32.partialorder %v12745_v53, 0.0 }
0x252c   :  { %26979 = vmatprep.subr.mxu0 %v28321_v32  ;;  %v29785_v29 = vsel %vm18224_vm14, -1e+09, %v28321_v32 }
0x2532   :  { %26977 = vmatmul.mubr.f32.vlgmr.msra.gmra.mrb[100].mxu0 %v18300_v51 }
0x2533   :  { %26980 = vmatpush3.xpose.msra.mxu0 %v18311_v13  ;;  %26981 = vmatprep.mubr.msk.f32.mxu0 %vm28322_vm5, %v28321_v32 }
0x2534   :  { %26984 = vmatprep.subr.mxu0 %v28321_v32 }
0x253a   :  { %26982 = vmatmul.mubr.f32.vlgmr.msra.gmra.mrb[100].mxu0 %v18298_v42 }
0x253b   :  { %26985 = vmatpush3.xpose.msra.mxu0 %v18233_v52  ;;  %26986 = vmatprep.mubr.msk.f32.mxu0 %vm28322_vm5, %v28321_v32 }
0x253c   :  { %27019 = vmatprep.subr.mxu0 %v28321_v32 }
0x2542   :  { %26987 = vmatmul.mubr.f32.vlgmr.msra.gmra.mrb[100].mxu0 %v18298_v42 }
0x2543   :  { %27020 = vmatpush3.xpose.msra.mxu0 %v19150_v50  ;;  %27021 = vmatprep.mubr.msk.f32.mxu0 %vm28322_vm5, %v28321_v32 }
0x2544   :  { %27024 = vmatprep.subr.mxu0 %v28321_v32 }
0x2546   :  { %27022 = vmatmul.mubr.f32.vlgmr.msra.gmra.mrb[102].mxu0 %v19219_v56 }
0x2547   :  { %27025 = vmatpush3.xpose.msra.mxu0 %v19230_v2  ;;  %27026 = vmatprep.mubr.msk.f32.mxu0 %vm28322_vm5, %v28321_v32 }
0x2548   :  { %27029 = vmatprep.subr.mxu0 %v28321_v32 }
0x254e   :  { %27027 = vmatmul.mubr.f32.vlgmr.msra.gmra.mrb[102].mxu0 %v19215_v24 }
0x254f   :  { %27030 = vmatpush3.xpose.msra.mxu0 %v19227_v37  ;;  %27031 = vmatprep.mubr.msk.f32.mxu0 %vm28322_vm5, %v28321_v32 }
0x2550   :  { %27034 = vmatprep.subr.mxu0 %v28321_v32 }
0x2556   :  { %27032 = vmatmul.mubr.f32.vlgmr.msra.gmra.mrb[102].mxu0 %v19216_v17 }
0x2557   :  { %27035 = vmatpush3.xpose.msra.mxu0 %v19150_v50  ;;  %27036 = vmatprep.mubr.msk.f32.mxu0 %vm28322_vm5, %v28321_v32 }
0x2558   :  { %27039 = vmatprep.subr.mxu0 %v28321_v32 }
0x255e   :  { %27037 = vmatmul.mubr.f32.vlgmr.msra.gmra.mrb[102].mxu0 %v19217_v46 }
0x255f   :  { %27040 = vmatpush3.xpose.msra.mxu0 %v19228_v45  ;;  %27041 = vmatprep.mubr.msk.f32.mxu0 %vm28322_vm5, %v28321_v32 }
0x2560   :  { %27044 = vmatprep.subr.mxu0 %v28321_v32 }
0x2566   :  { %27042 = vmatmul.mubr.f32.vlgmr.msra.gmra.mrb[102].mxu0 %v19215_v24 }
0x2567   :  { %27045 = vmatpush3.xpose.msra.mxu0 %v19150_v50  ;;  %27046 = vmatprep.mubr.msk.f32.mxu0 %vm28322_vm5, %v28321_v32 }
0x2568   :  { %27079 = vmatprep.subr.mxu0 %v28321_v32 }
0x256e   :  { %27047 = vmatmul.mubr.f32.vlgmr.msra.gmra.mrb[102].mxu0 %v19215_v24 }
0x256f   :  { %27080 = vmatpush3.msra.mxu0 %v29439_v47  ;;  %27081 = vmatprep.mubr.msk.f32.mxu0 %vm28322_vm5, %v28321_v32 }
0x2570   :  { %27089 = vmatprep.subr.mxu0 %v28321_v32 }
0x25d6   :  { %v17925_v18 = vpop.f32.mrb[94].mxu1 }
0x25d7   :  { %v26938_v31 = vpop.f32.mrb[95].mxu1 }
0x25da   :  { %v18073_v58 = vpop.f32.mrb[96].mxu1 }
0x25db   :  { %v26948_v59 = vpop.f32.mrb[97].mxu1 }
0x25de   :  { %v17849_v25 = vpop.f32.mrb[94].mxu0  ;;  %v18219_v38 = vpop.f32.mrb[98].mxu1 }
0x25df   :  { %v17926_v22 = vadd.f32 %v17925_v18, %v17849_v25  ;;  %v26933_v44 = vpop.f32.mrb[95].mxu0  ;;  %v26958_v4 = vpop.f32.mrb[99].mxu1 }
0x25e2   :  { %v17999_v28 = vpop.f32.mrb[96].mxu0 }
0x25e3   :  { %v18000_v5 = vadd.f32 %v17999_v28, %v17926_v22  ;;  %v26943_v36 = vpop.f32.mrb[97].mxu0 }
0x25e5   :  { %v18074_v39 = vadd.f32 %v18073_v58, %v18000_v5 }
0x25e6   :  { %v18147_v40 = vpop.f32.mrb[98].mxu0 }
0x25e7   :  { %v18148_v16 = vadd.f32 %v18147_v40, %v18074_v39  ;;  %v26953_v42 = vpop.f32.mrb[99].mxu0 }
0x25e9   :  { %v18220_v49 = vadd.f32 %v18219_v38, %v18148_v16 }
0x25eb   :  { %v29779_v52 = vadd.f32 %v18220_v49, %v29663_v1 }
0x2615   :  { %v18674_v51 = vpop.f32.mrb[100].mxu0 }
0x2616   :  { %v27807_v13 = vadd.f32 %v18674_v51, %v29785_v29  ;;  %v26988_v7 = vpop.f32.mrb[101].mxu0 }
0x2618   :  { %v18678_v33 = vsel %vm646_vm6, %v27807_v13, -inf }
0x2619   :  { %18679 = vmax.xlane.f32.xlu0 %v18678_v33 }
0x2641   :  { %v19591_v23 = vpop.f32.mrb[102].mxu0 }
0x2642   :  { %v27808_v10 = vadd.f32 %v19591_v23, %v29785_v29  ;;  %v27048_v1 = vpop.f32.mrb[103].mxu0 }
0x2644   :  { %v19595_v20 = vsel %vm646_vm6, %v27808_v10, -inf }
0x2645   :  { %19596 = vmax.xlane.f32.xlu1 %v19595_v20 }
0x26a6   :  { %v18680_v11 = vpop.xlane.xlu0 %18679 }
0x26a7   :  { %v18681_v19 = vsub.f32 %v27807_v13, %v18680_v11 }
0x26a9   :  { %v18682_v48 = vmul.f32 1.442695, %v18681_v19 }
0x26ab   :  { %28264 = vpow2.f32 %v18682_v48 }
0x26b5   :  { %v28265_v24 = vpop.eup %28264 }
0x26b6   :  { %v18684_v50 = vsel %vm646_vm6, %v28265_v24, 0.0 }
0x26b7   :  { %18685 = vadd.xlane.f32.xlu0 %v18684_v50 }
0x26cd   :  { %18689 = vrot.lane.b32.xlu0 %v29365_v26, %s28324_s10 }
0x26d1   :  { %20956 = vrot.lane.b32.xlu0 %v29354_v43, %s28329_s17 }
0x26d2   :  { %v19597_v17 = vpop.xlane.xlu1 %19596 }
0x26d3   :  { %v19598_v37 = vsub.f32 %v27808_v10, %v19597_v17 }
0x26d5   :  { %v19599_v46 = vmul.f32 1.442695, %v19598_v37 }
0x26d7   :  { %28266 = vpow2.f32 %v19599_v46 }
0x26e1   :  { %v28267_v45 = vpop.eup %28266 }
0x26e2   :  { %v19601_v8 = vsel %vm646_vm6, %v28267_v45, 0.0 }
0x26e3   :  { %19602 = vadd.xlane.f32.xlu1 %v19601_v8 }
0x26f4   :  { %19606 = vrot.lane.b32.xlu1 %v29365_v26, %s28325_s11 }
0x26f8   :  { %20958 = vrot.lane.b32.xlu1 %v29365_v26, %s28329_s17 }
0x2744   :  { %v18686_v9 = vpop.xlane.xlu0 %18685 }
0x2745   :  { %28268 = vrcp.f32 %v18686_v9 }
0x2748   :  { %v18690_v56 = vpop.permute.xlu0 %18689 }
0x2749   :  { %v18696_v2 = vand.u32 4294901760, %v18690_v56 }
0x274b   :  { %26990 = vmatpush3.msra.mxu1 %v18696_v2  ;;  %v18773_v58 = vsub.f32 %v18690_v56, %v18696_v2 }
0x274c   :  { %26994 = vmatprep.subr.mxu1 %v28321_v32 }
0x274d   :  { %v18774_v38 = vand.u32 4294901760, %v18773_v58 }
0x274f   :  { %v28269_v18 = vpop.eup %28268  ;;  %v18775_v4 = vsub.f32 %v18773_v58, %v18774_v38 }
0x2750   :  { %v18688_v31 = vmul.f32 %v28269_v18, %v28265_v24 }
0x2751   :  { %v18776_v36 = vand.u32 4294901760, %v18775_v4 }
0x2752   :  { %v18693_v59 = vsel %vm646_vm6, %v18688_v31, 0 }
0x2753   :  { %v18761_v25 = vand.u32 4294901760, %v18693_v59 }
0x2755   :  { %v18762_v22 = vsub.f32 %v18693_v59, %v18761_v25 }
0x2757   :  { %v18763_v44 = vand.u32 4294901760, %v18762_v22 }
0x2759   :  { %v18764_v28 = vsub.f32 %v18762_v22, %v18763_v44 }
0x275b   :  { %v18765_v5 = vand.u32 4294901760, %v18764_v28 }
0x275d   :  { %26992 = vmatmul.mubr.f32.vlgmr.msra.gmra.mrb[100].mxu1 %v18765_v5 }
0x275e   :  { %26995 = vmatpush3.msra.mxu1 %v18776_v36  ;;  %26996 = vmatprep.mubr.msk.f32.mxu1 %vm28322_vm5, %v28321_v32 }
0x275f   :  { %26999 = vmatprep.subr.mxu1 %v28321_v32 }
0x2765   :  { %26997 = vmatmul.mubr.f32.vlgmr.msra.gmra.mrb[100].mxu1 %v18761_v25 }
0x2766   :  { %27000 = vmatpush3.msra.mxu1 %v18773_v58  ;;  %27001 = vmatprep.mubr.msk.f32.mxu1 %vm28322_vm5, %v28321_v32 }
0x2767   :  { %27004 = vmatprep.subr.mxu1 %v28321_v32 }
0x276d   :  { %27002 = vmatmul.mubr.f32.vlgmr.msra.gmra.mrb[100].mxu1 %v18762_v22 }
0x276e   :  { %27005 = vmatpush3.msra.mxu1 %v18696_v2  ;;  %27006 = vmatprep.mubr.msk.f32.mxu1 %vm28322_vm5, %v28321_v32 }
0x276f   :  { %27009 = vmatprep.subr.mxu1 %v28321_v32 }
0x2770   :  { %v19603_v39 = vpop.xlane.xlu1 %19602 }
0x2771   :  { %28270 = vrcp.f32 %v19603_v39 }
0x2774   :  { %v19607_v40 = vpop.permute.xlu1 %19606 }
0x2775   :  { %27007 = vmatmul.mubr.f32.vlgmr.msra.gmra.mrb[100].mxu1 %v18763_v44  ;;  %v19613_v16 = vand.u32 4294901760, %v19607_v40 }
0x2776   :  { %27010 = vmatpush3.msra.mxu1 %v18774_v38  ;;  %27011 = vmatprep.mubr.msk.f32.mxu1 %vm28322_vm5, %v28321_v32 }
0x2777   :  { %27014 = vmatprep.subr.mxu1 %v28321_v32  ;;  %v19690_v53 = vsub.f32 %v19607_v40, %v19613_v16 }
0x2778   :  { %v20959_v31 = vpop.permute.xlu1 %20958 }
0x2779   :  { %v19691_v7 = vand.u32 4294901760, %v19690_v53  ;;  %v20962_v58 = vsel %vm646_vm6, %v20959_v31, 0 }
0x277a   :  { %v20965_v59 = vand.u32 4294901760, %v20962_v58 }
0x277b   :  { %v28271_v42 = vpop.eup %28270  ;;  %v19692_v10 = vsub.f32 %v19690_v53, %v19691_v7 }
0x277c   :  { %v19605_v49 = vmul.f32 %v28271_v42, %v28267_v45 }
0x277d   :  { %27012 = vmatmul.mubr.f32.vlgmr.msra.gmra.mrb[100].mxu1 %v18761_v25  ;;  %v19693_v11 = vand.u32 4294901760, %v19692_v10 }
0x277e   :  { %27015 = vmatpush3.msra.mxu1 %v18696_v2  ;;  %27016 = vmatprep.mubr.msk.f32.mxu1 %vm28322_vm5, %v28321_v32  ;;  %v19610_v51 = vsel %vm646_vm6, %v19605_v49, 0 }
0x277f   :  { %27049 = vmatprep.subr.mxu1 %v28321_v32  ;;  %v19678_v13 = vand.u32 4294901760, %v19610_v51 }
0x2781   :  { %v19679_v33 = vsub.f32 %v19610_v51, %v19678_v13 }
0x2783   :  { %v19680_v23 = vand.u32 4294901760, %v19679_v33 }
0x2785   :  { %27017 = vmatmul.mubr.f32.vlgmr.msra.gmra.mrb[100].mxu1 %v18761_v25  ;;  %v19681_v1 = vsub.f32 %v19679_v33, %v19680_v23 }
0x2786   :  { %27050 = vmatpush3.msra.mxu1 %v19613_v16  ;;  %27051 = vmatprep.mubr.msk.f32.mxu1 %vm28322_vm5, %v28321_v32 }
0x2787   :  { %27054 = vmatprep.subr.mxu1 %v28321_v32  ;;  %v19682_v20 = vand.u32 4294901760, %v19681_v1 }
0x2789   :  { %27052 = vmatmul.mubr.f32.vlgmr.msra.gmra.mrb[102].mxu1 %v19682_v20 }
0x278a   :  { %27055 = vmatpush3.msra.mxu1 %v19693_v11  ;;  %27056 = vmatprep.mubr.msk.f32.mxu1 %vm28322_vm5, %v28321_v32 }
0x278b   :  { %27059 = vmatprep.subr.mxu1 %v28321_v32 }
0x2791   :  { %27057 = vmatmul.mubr.f32.vlgmr.msra.gmra.mrb[102].mxu1 %v19678_v13 }
0x2792   :  { %27060 = vmatpush3.msra.mxu1 %v19690_v53  ;;  %27061 = vmatprep.mubr.msk.f32.mxu1 %vm28322_vm5, %v28321_v32 }
0x2793   :  { %27064 = vmatprep.subr.mxu1 %v28321_v32 }
0x2799   :  { %27062 = vmatmul.mubr.f32.vlgmr.msra.gmra.mrb[102].mxu1 %v19679_v33 }
0x279a   :  { %27065 = vmatpush3.msra.mxu1 %v19613_v16  ;;  %27066 = vmatprep.mubr.msk.f32.mxu1 %vm28322_vm5, %v28321_v32 }
0x279b   :  { %27069 = vmatprep.subr.mxu1 %v28321_v32 }
0x27a1   :  { %27067 = vmatmul.mubr.f32.vlgmr.msra.gmra.mrb[102].mxu1 %v19680_v23 }
0x27a2   :  { %27070 = vmatpush3.msra.mxu1 %v19691_v7  ;;  %27071 = vmatprep.mubr.msk.f32.mxu1 %vm28322_vm5, %v28321_v32 }
0x27a3   :  { %27074 = vmatprep.subr.mxu1 %v28321_v32 }
0x27a9   :  { %27072 = vmatmul.mubr.f32.vlgmr.msra.gmra.mrb[102].mxu1 %v19678_v13 }
0x27aa   :  { %27075 = vmatpush3.msra.mxu1 %v19613_v16  ;;  %27076 = vmatprep.mubr.msk.f32.mxu1 %vm28322_vm5, %v28321_v32 }
0x27ab   :  { %27084 = vmatprep.subr.mxu1 %v28321_v32 }
0x27b1   :  { %27077 = vmatmul.mubr.f32.vlgmr.msra.gmra.mrb[102].mxu1 %v19678_v13 }
0x27b2   :  { %27085 = vmatpush3.msra.mxu1 %v29489_v12  ;;  %27086 = vmatprep.mubr.msk.f32.mxu1 %vm28322_vm5, %v28321_v32 }
0x27b3   :  { %27094 = vmatprep.subr.mxu1 %v28321_v32 }
0x2858   :  { %v19137_v19 = vpop.f32.mrb[100].mxu1 }
0x2859   :  { %v27018_v48 = vpop.f32.mrb[101].mxu1  ;;  %v20508_v46 = vsel %vm646_vm6, %v19137_v19, 0 }
0x285a   :  { %v20576_v12 = vand.u32 4294901760, %v20508_v46 }
0x285c   :  { %v20577_v56 = vsub.f32 %v20508_v46, %v20576_v12 }
0x285e   :  { %v20578_v18 = vand.u32 4294901760, %v20577_v56 }
0x2884   :  { %v20054_v24 = vpop.f32.mrb[102].mxu1 }
0x2885   :  { %v20059_v50 = vsel %vm646_vm6, %v20054_v24, 0  ;;  %v27078_v17 = vpop.f32.mrb[103].mxu1 }
0x2886   :  { %v20127_v37 = vand.u32 4294901760, %v20059_v50 }
0x2888   :  { %v20128_v45 = vsub.f32 %v20059_v50, %v20127_v37  ;;  %27087 = vmatmul.mubr.f32.vlgmr.msra.gmra.mrb[104].mxu1 %v20127_v37 }
0x2889   :  { %27095 = vmatpush3.msra.mxu1 %v29439_v47  ;;  %27096 = vmatprep.mubr.msk.f32.mxu1 %vm28322_vm5, %v28321_v32 }
0x288a   :  { %v20129_v8 = vand.u32 4294901760, %v20128_v45  ;;  %27104 = vmatprep.subr.mxu1 %v28321_v32 }
0x288c   :  { %v20130_v9 = vsub.f32 %v20128_v45, %v20129_v8  ;;  %27097 = vmatmul.mubr.f32.vlgmr.msra.gmra.mrb[106].mxu1 %v20129_v8 }
0x288d   :  { %27105 = vmatpush3.msra.mxu1 %v29439_v47  ;;  %27106 = vmatprep.mubr.msk.f32.mxu1 %vm28322_vm5, %v28321_v32  ;;  %v20957_v47 = vpop.permute.xlu0 %20956 }
0x288e   :  { %v20131_v2 = vand.u32 4294901760, %v20130_v9  ;;  %27114 = vmatprep.subr.mxu1 %v28321_v32 }
0x2890   :  { %27082 = vmatmul.mubr.f32.vlgmr.msra.gmra.mrb[104].mxu0 %v20131_v2  ;;  %27107 = vmatmul.mubr.f32.vlgmr.msra.gmra.mrb[108].mxu1 %v20127_v37 }
0x2891   :  { %27090 = vmatpush3.msra.mxu0 %v29482_v3  ;;  %27115 = vmatpush3.msra.mxu1 %v29513_v30  ;;  %v20960_v3 = vsel %vm646_vm6, %v20957_v47, 0  ;;  %v20579_v30 = vsub.f32 %v20577_v56, %v20578_v18 }
0x2892   :  { %27091 = vmatprep.mubr.msk.f32.mxu0 %vm28322_vm5, %v28321_v32  ;;  %27099 = vmatprep.subr.mxu0 %v28321_v32 }
0x2893   :  { %27116 = vmatprep.mubr.msk.f32.mxu1 %vm28322_vm5, %v28321_v32  ;;  %27124 = vmatprep.subr.mxu1 %v28321_v32  ;;  %v20580_v25 = vand.u32 4294901760, %v20579_v30 }
0x2894   :  { %27092 = vmatmul.mubr.f32.vlgmr.msra.gmra.mrb[106].mxu0 %v20128_v45  ;;  %27117 = vmatmul.mubr.f32.vlgmr.msra.gmra.mrb[110].mxu1 %v20576_v12 }
0x2895   :  { %27100 = vmatpush3.msra.mxu0 %v29485_v63  ;;  %27125 = vmatpush3.msra.mxu1 %v29493_v61  ;;  %v21030_v63 = vand.u32 4294901760, %v20960_v3 }
0x2896   :  { %27101 = vmatprep.mubr.msk.f32.mxu0 %vm28322_vm5, %v28321_v32  ;;  %27109 = vmatprep.subr.mxu0 %v28321_v32 }
0x2897   :  { %27126 = vmatprep.mubr.msk.f32.mxu1 %vm28322_vm5, %v28321_v32  ;;  %27134 = vmatprep.subr.mxu1 %v28321_v32  ;;  %v21031_v38 = vsub.f32 %v20960_v3, %v21030_v63 }
0x2898   :  { %27102 = vmatmul.mubr.f32.vlgmr.msra.gmra.mrb[108].mxu0 %v20127_v37  ;;  %27127 = vmatmul.mubr.f32.vlgmr.msra.gmra.mrb[112].mxu1 %v20578_v18 }
0x2899   :  { %27110 = vmatpush3.msra.mxu0 %v29493_v61  ;;  %27135 = vmatpush3.msra.mxu1 %v29493_v61  ;;  %v21042_v61 = vsub.f32 %v20962_v58, %v20965_v59  ;;  %v21032_v22 = vand.u32 4294901760, %v21031_v38 }
0x289a   :  { %27111 = vmatprep.mubr.msk.f32.mxu0 %vm28322_vm5, %v28321_v32  ;;  %27119 = vmatprep.subr.mxu0 %v28321_v32 }
0x289b   :  { %27136 = vmatprep.mubr.msk.f32.mxu1 %vm28322_vm5, %v28321_v32  ;;  %27169 = vmatprep.subr.mxu1 %v28321_v32  ;;  %v21043_v44 = vand.u32 4294901760, %v21042_v61 }
0x289c   :  { %27112 = vmatmul.mubr.f32.vlgmr.msra.gmra.mrb[110].mxu0 %v20580_v25  ;;  %27137 = vmatmul.mubr.f32.vlgmr.msra.gmra.mrb[114].mxu1 %v20576_v12 }
0x289d   :  { %27120 = vmatpush3.msra.mxu0 %v29496_v57  ;;  %27121 = vmatprep.mubr.msk.f32.mxu0 %vm28322_vm5, %v28321_v32  ;;  %v21033_v57 = vsub.f32 %v21031_v38, %v21032_v22  ;;  %v21044_v4 = vsub.f32 %v21042_v61, %v21043_v44 }
0x289e   :  { %27129 = vmatprep.subr.mxu0 %v28321_v32  ;;  %27171 = vmatprep.mubr.msk.f32.mxu1 %vm28322_vm5, %v28321_v32 }
0x289f   :  { %v21034_v28 = vand.u32 4294901760, %v21033_v57  ;;  %v21045_v5 = vand.u32 4294901760, %v21044_v4 }
0x28a0   :  { %27122 = vmatmul.mubr.f32.vlgmr.msra.gmra.mrb[112].mxu0 %v20577_v56 }
0x28a1   :  { %27130 = vmatpush3.msra.mxu0 %v29500_v55  ;;  %27131 = vmatprep.mubr.msk.f32.mxu0 %vm28322_vm5, %v28321_v32 }
0x28a2   :  { %27139 = vmatprep.subr.mxu0 %v28321_v32 }
0x28a4   :  { %27132 = vmatmul.mubr.f32.vlgmr.msra.gmra.mrb[114].mxu0 %v20576_v12 }
0x28a5   :  { %27141 = vmatprep.mubr.msk.f32.mxu0 %vm28322_vm5, %v28321_v32 }
0x28a8   :  { %27140 = vmatpush3.xpose.msra.mxu0 %v20965_v59 }
0x28a9   :  { %27144 = vmatprep.subr.mxu0 %v28321_v32 }
0x28ab   :  { %27142 = vmatmul.mubr.f32.vlgmr.msra.gmra.mrb[116].mxu0 %v21034_v28 }
0x28ac   :  { %27145 = vmatpush3.xpose.msra.mxu0 %v21045_v5  ;;  %27146 = vmatprep.mubr.msk.f32.mxu0 %vm28322_vm5, %v28321_v32 }
0x28ad   :  { %27149 = vmatprep.subr.mxu0 %v28321_v32 }
0x28b3   :  { %27147 = vmatmul.mubr.f32.vlgmr.msra.gmra.mrb[116].mxu0 %v21030_v63 }
0x28b4   :  { %27150 = vmatpush3.xpose.msra.mxu0 %v21042_v61  ;;  %27151 = vmatprep.mubr.msk.f32.mxu0 %vm28322_vm5, %v28321_v32 }
0x28b5   :  { %27154 = vmatprep.subr.mxu0 %v28321_v32 }
0x28bb   :  { %27152 = vmatmul.mubr.f32.vlgmr.msra.gmra.mrb[116].mxu0 %v21031_v38 }
0x28bc   :  { %27155 = vmatpush3.xpose.msra.mxu0 %v20965_v59  ;;  %27156 = vmatprep.mubr.msk.f32.mxu0 %vm28322_vm5, %v28321_v32 }
0x28bd   :  { %27159 = vmatprep.subr.mxu0 %v28321_v32 }
0x28c3   :  { %27157 = vmatmul.mubr.f32.vlgmr.msra.gmra.mrb[116].mxu0 %v21032_v22 }
0x28c4   :  { %27160 = vmatpush3.xpose.msra.mxu0 %v21043_v44  ;;  %27161 = vmatprep.mubr.msk.f32.mxu0 %vm28322_vm5, %v28321_v32 }
0x28c5   :  { %27164 = vmatprep.subr.mxu0 %v28321_v32 }
0x28cb   :  { %27162 = vmatmul.mubr.f32.vlgmr.msra.gmra.mrb[116].mxu0 %v21030_v63 }
0x28cc   :  { %27165 = vmatpush3.xpose.msra.mxu0 %v20965_v59  ;;  %27166 = vmatprep.mubr.msk.f32.mxu0 %vm28322_vm5, %v28321_v32 }
0x28cd   :  { %27199 = vmatprep.subr.mxu0 %v28321_v32 }
0x28d3   :  { %27167 = vmatmul.mubr.f32.vlgmr.msra.gmra.mrb[116].mxu0 %v21030_v63 }
0x28d4   :  { %27200 = vmatpush3.msra.mxu0 %v29587_v35  ;;  %27201 = vmatprep.mubr.msk.f32.mxu0 %vm28322_vm5, %v28321_v32 }
0x28d5   :  { %27209 = vmatprep.subr.mxu0 %v28321_v32 }
0x295b   :  { %v20209_v55 = vpop.f32.mrb[104].mxu1 }
0x295c   :  { %v27088_v36 = vpop.f32.mrb[105].mxu1 }
0x295f   :  { %v20357_v39 = vpop.f32.mrb[106].mxu1 }
0x2960   :  { %v27098_v40 = vpop.f32.mrb[107].mxu1 }
0x2963   :  { %v20133_v16 = vpop.f32.mrb[104].mxu0  ;;  %v20503_v42 = vpop.f32.mrb[108].mxu1 }
0x2964   :  { %v20210_v49 = vadd.f32 %v20209_v55, %v20133_v16  ;;  %v27083_v53 = vpop.f32.mrb[105].mxu0  ;;  %v27108_v51 = vpop.f32.mrb[109].mxu1 }
0x2967   :  { %v20283_v13 = vpop.f32.mrb[106].mxu0  ;;  %v20658_v7 = vpop.f32.mrb[110].mxu1 }
0x2968   :  { %v20284_v33 = vadd.f32 %v20283_v13, %v20210_v49  ;;  %v27093_v23 = vpop.f32.mrb[107].mxu0  ;;  %v27118_v10 = vpop.f32.mrb[111].mxu1 }
0x296a   :  { %v20358_v1 = vadd.f32 %v20357_v39, %v20284_v33 }
0x296b   :  { %v20431_v20 = vpop.f32.mrb[108].mxu0  ;;  %v20806_v11 = vpop.f32.mrb[112].mxu1 }
0x296c   :  { %v20432_v19 = vadd.f32 %v20431_v20, %v20358_v1  ;;  %v27103_v48 = vpop.f32.mrb[109].mxu0  ;;  %v27128_v24 = vpop.f32.mrb[113].mxu1 }
0x296e   :  { %v20504_v50 = vadd.f32 %v20503_v42, %v20432_v19 }
0x296f   :  { %v20582_v17 = vpop.f32.mrb[110].mxu0  ;;  %v20952_v37 = vpop.f32.mrb[114].mxu1 }
0x2970   :  { %v20583_v46 = vadd.f32 %v20582_v17, %v20504_v50  ;;  %v27113_v45 = vpop.f32.mrb[111].mxu0  ;;  %v27138_v12 = vpop.f32.mrb[115].mxu1 }
0x2972   :  { %v20659_v8 = vadd.f32 %v20658_v7, %v20583_v46 }
0x2973   :  { %v20732_v9 = vpop.f32.mrb[112].mxu0 }
0x2974   :  { %v20733_v56 = vadd.f32 %v20732_v9, %v20659_v8  ;;  %v27123_v2 = vpop.f32.mrb[113].mxu0 }
0x2976   :  { %v20807_v18 = vadd.f32 %v20806_v11, %v20733_v56 }
0x2977   :  { %v20880_v47 = vpop.f32.mrb[114].mxu0 }
0x2978   :  { %v20881_v31 = vadd.f32 %v20880_v47, %v20807_v18  ;;  %v27133_v3 = vpop.f32.mrb[115].mxu0 }
0x297a   :  { %v29909_v30 = vadd.f32 %v20952_v37, %v20881_v31 }
0x29a6   :  { %v21406_v58 = vpop.f32.mrb[116].mxu0 }
0x29a7   :  { %v27809_v63 = vadd.f32 %v21406_v58, %v29785_v29  ;;  %v27168_v59 = vpop.f32.mrb[117].mxu0 }
0x29a9   :  { %v21410_v25 = vsel %vm646_vm6, %v27809_v63, -inf }
0x29aa   :  { %21411 = vmax.xlane.f32.xlu0 %v21410_v25 }
0x29c0   :  { %21421 = vrot.lane.b32.xlu0 %v29365_v26, %s28330_s18 }
0x29c4   :  { %22325 = vrot.lane.b32.xlu0 %v29365_v26, %s28331_s19 }
0x2a37   :  { %v21412_v38 = vpop.xlane.xlu0 %21411 }
0x2a38   :  { %v21413_v61 = vsub.f32 %v27809_v63, %v21412_v38 }
0x2a3a   :  { %v21414_v22 = vmul.f32 1.442695, %v21413_v61 }
0x2a3b   :  { %v21422_v44 = vpop.permute.xlu0 %21421 }
0x2a3c   :  { %28272 = vpow2.f32 %v21414_v22  ;;  %v21428_v57 = vand.u32 4294901760, %v21422_v44 }
0x2a3e   :  { %27170 = vmatpush3.msra.mxu1 %v21428_v57  ;;  %v21505_v36 = vsub.f32 %v21422_v44, %v21428_v57 }
0x2a3f   :  { %27174 = vmatprep.subr.mxu1 %v28321_v32  ;;  %v22326_v11 = vpop.permute.xlu0 %22325 }
0x2a40   :  { %v21506_v42 = vand.u32 4294901760, %v21505_v36  ;;  %v22329_v24 = vsel %vm646_vm6, %v22326_v11, 0 }
0x2a41   :  { %v22332_v37 = vand.u32 4294901760, %v22329_v24 }
0x2a42   :  { %v21507_v51 = vsub.f32 %v21505_v36, %v21506_v42 }
0x2a43   :  { %v22409_v12 = vsub.f32 %v22329_v24, %v22332_v37 }
0x2a44   :  { %v21508_v33 = vand.u32 4294901760, %v21507_v51 }
0x2a45   :  { %v22410_v8 = vand.u32 4294901760, %v22409_v12 }
0x2a46   :  { %v28273_v4 = vpop.eup %28272 }
0x2a47   :  { %v21416_v28 = vsel %vm646_vm6, %v28273_v4, 0.0  ;;  %v22411_v9 = vsub.f32 %v22409_v12, %v22410_v8 }
0x2a48   :  { %21417 = vadd.xlane.f32.xlu1 %v21416_v28 }
0x2a49   :  { %v22412_v2 = vand.u32 4294901760, %v22411_v9 }
0x2a59   :  { %22323 = vrot.lane.b32.xlu1 %v29354_v43, %s28331_s19 }
0x2ad5   :  { %v21418_v5 = vpop.xlane.xlu1 %21417 }
0x2ad6   :  { %28274 = vrcp.f32 %v21418_v5 }
0x2ad9   :  { %v22324_v20 = vpop.permute.xlu1 %22323 }
0x2ae0   :  { %v28275_v55 = vpop.eup %28274 }
0x2ae1   :  { %v21420_v39 = vmul.f32 %v28275_v55, %v28273_v4 }
0x2ae3   :  { %v21425_v40 = vsel %vm646_vm6, %v21420_v39, 0  ;;  %v29991_v39 = vld [vmem:[%s30258_s4 + $0x120] sm:$0xff] }
0x2ae4   :  { %v21493_v16 = vand.u32 4294901760, %v21425_v40 }
0x2ae6   :  { %v21494_v49 = vsub.f32 %v21425_v40, %v21493_v16 }
0x2ae8   :  { %v21495_v53 = vand.u32 4294901760, %v21494_v49 }
0x2aea   :  { %v21496_v13 = vsub.f32 %v21494_v49, %v21495_v53 }
0x2aec   :  { %v21497_v7 = vand.u32 4294901760, %v21496_v13 }
0x2aee   :  { %27172 = vmatmul.mubr.f32.vlgmr.msra.gmra.mrb[116].mxu1 %v21497_v7 }
0x2aef   :  { %27175 = vmatpush3.msra.mxu1 %v21508_v33  ;;  %27176 = vmatprep.mubr.msk.f32.mxu1 %vm28322_vm5, %v28321_v32 }
0x2af0   :  { %27179 = vmatprep.subr.mxu1 %v28321_v32 }
0x2af6   :  { %27177 = vmatmul.mubr.f32.vlgmr.msra.gmra.mrb[116].mxu1 %v21493_v16 }
0x2af7   :  { %27180 = vmatpush3.msra.mxu1 %v21505_v36  ;;  %27181 = vmatprep.mubr.msk.f32.mxu1 %vm28322_vm5, %v28321_v32  ;;  %v23692_v36 = vsub.s32 4, %v28429_v62 }
0x2af8   :  { %27184 = vmatprep.subr.mxu1 %v28321_v32 }
0x2af9   :  { %v29996_v40 = vrot.slane %v29991_v39, %v23692_v36 }
0x2afe   :  { %27182 = vmatmul.mubr.f32.vlgmr.msra.gmra.mrb[116].mxu1 %v21494_v49 }
0x2aff   :  { %27185 = vmatpush3.msra.mxu1 %v21428_v57  ;;  %27186 = vmatprep.mubr.msk.f32.mxu1 %vm28322_vm5, %v28321_v32 }
0x2b00   :  { %27189 = vmatprep.subr.mxu1 %v28321_v32 }
0x2b06   :  { %27187 = vmatmul.mubr.f32.vlgmr.msra.gmra.mrb[116].mxu1 %v21495_v53 }
0x2b07   :  { %27190 = vmatpush3.msra.mxu1 %v21506_v42  ;;  %27191 = vmatprep.mubr.msk.f32.mxu1 %vm28322_vm5, %v28321_v32 }
0x2b08   :  { %27194 = vmatprep.subr.mxu1 %v28321_v32 }
0x2b0e   :  { %27192 = vmatmul.mubr.f32.vlgmr.msra.gmra.mrb[116].mxu1 %v21493_v16 }
0x2b0f   :  { %27195 = vmatpush3.msra.mxu1 %v21428_v57  ;;  %27196 = vmatprep.mubr.msk.f32.mxu1 %vm28322_vm5, %v28321_v32 }
0x2b10   :  { %27204 = vmatprep.subr.mxu1 %v28321_v32 }
0x2b16   :  { %27197 = vmatmul.mubr.f32.vlgmr.msra.gmra.mrb[116].mxu1 %v21493_v16  ;;  %v23694_v16 = vadd.f32 %v29996_v40, %v29779_v52 }
0x2b17   :  { %27205 = vmatpush3.msra.mxu1 %v29617_v54  ;;  %27206 = vmatprep.mubr.msk.f32.mxu1 %vm28322_vm5, %v28321_v32  ;;  %v22327_v54 = vsel %vm646_vm6, %v22324_v20, 0 }
0x2b18   :  { %27214 = vmatprep.subr.mxu1 %v28321_v32  ;;  %v22397_v17 = vand.u32 4294901760, %v22327_v54  ;;  %v30003_v51 = vadd.f32 %v23694_v16, %v29131_v41 }
0x2b1a   :  { %v22398_v45 = vsub.f32 %v22327_v54, %v22397_v17  ;;  %v23698_v13 = vsel %vm47_vm0, %v30003_v51, 0.0 }
0x2be9   :  { %v21869_v43 = vpop.f32.mrb[116].mxu1 }
0x2bea   :  { %v21874_v23 = vsel %vm646_vm6, %v21869_v43, 0  ;;  %v27198_v10 = vpop.f32.mrb[117].mxu1 }
0x2beb   :  { %v21942_v1 = vand.u32 4294901760, %v21874_v23 }
0x2bed   :  { %v21943_v19 = vsub.f32 %v21874_v23, %v21942_v1  ;;  %27207 = vmatmul.mubr.f32.vlgmr.msra.gmra.mrb[118].mxu1 %v21942_v1 }
0x2bee   :  { %27215 = vmatpush3.msra.mxu1 %v29587_v35  ;;  %27216 = vmatprep.mubr.msk.f32.mxu1 %vm28322_vm5, %v28321_v32 }
0x2bef   :  { %v21944_v48 = vand.u32 4294901760, %v21943_v19  ;;  %27224 = vmatprep.subr.mxu1 %v28321_v32 }
0x2bf1   :  { %v21945_v50 = vsub.f32 %v21943_v19, %v21944_v48  ;;  %27217 = vmatmul.mubr.f32.vlgmr.msra.gmra.mrb[120].mxu1 %v21944_v48 }
0x2bf2   :  { %27225 = vmatpush3.msra.mxu1 %v29587_v35  ;;  %27226 = vmatprep.mubr.msk.f32.mxu1 %vm28322_vm5, %v28321_v32  ;;  %v22399_v35 = vand.u32 4294901760, %v22398_v45 }
0x2bf3   :  { %v21946_v46 = vand.u32 4294901760, %v21945_v50  ;;  %27259 = vmatprep.subr.mxu1 %v28321_v32 }
0x2bf5   :  { %27202 = vmatmul.mubr.f32.vlgmr.msra.gmra.mrb[118].mxu0 %v21946_v46  ;;  %27227 = vmatmul.mubr.f32.vlgmr.msra.gmra.mrb[122].mxu1 %v21942_v1 }
0x2bf6   :  { %27210 = vmatpush3.msra.mxu0 %v29610_v60  ;;  %27211 = vmatprep.mubr.msk.f32.mxu0 %vm28322_vm5, %v28321_v32  ;;  %v22400_v60 = vsub.f32 %v22398_v45, %v22399_v35 }
0x2bf7   :  { %27219 = vmatprep.subr.mxu0 %v28321_v32  ;;  %27261 = vmatprep.mubr.msk.f32.mxu1 %vm28322_vm5, %v28321_v32 }
0x2bf8   :  { %v22401_v56 = vand.u32 4294901760, %v22400_v60 }
0x2bf9   :  { %27212 = vmatmul.mubr.f32.vlgmr.msra.gmra.mrb[120].mxu0 %v21943_v19 }
0x2bfa   :  { %27220 = vmatpush3.msra.mxu0 %v29613_v0  ;;  %27221 = vmatprep.mubr.msk.f32.mxu0 %vm28322_vm5, %v28321_v32 }
0x2bfb   :  { %27229 = vmatprep.subr.mxu0 %v28321_v32 }
0x2bfd   :  { %27222 = vmatmul.mubr.f32.vlgmr.msra.gmra.mrb[122].mxu0 %v21942_v1 }
0x2bfe   :  { %27231 = vmatprep.mubr.msk.f32.mxu0 %vm28322_vm5, %v28321_v32 }
0x2c01   :  { %27230 = vmatpush3.xpose.msra.mxu0 %v22332_v37 }
0x2c02   :  { %27234 = vmatprep.subr.mxu0 %v28321_v32 }
0x2c04   :  { %27232 = vmatmul.mubr.f32.vlgmr.msra.gmra.mrb[124].mxu0 %v22401_v56 }
0x2c05   :  { %27235 = vmatpush3.xpose.msra.mxu0 %v22412_v2  ;;  %27236 = vmatprep.mubr.msk.f32.mxu0 %vm28322_vm5, %v28321_v32 }
0x2c06   :  { %27239 = vmatprep.subr.mxu0 %v28321_v32 }
0x2c0c   :  { %27237 = vmatmul.mubr.f32.vlgmr.msra.gmra.mrb[124].mxu0 %v22397_v17 }
0x2c0d   :  { %27240 = vmatpush3.xpose.msra.mxu0 %v22409_v12  ;;  %27241 = vmatprep.mubr.msk.f32.mxu0 %vm28322_vm5, %v28321_v32 }
0x2c0e   :  { %27244 = vmatprep.subr.mxu0 %v28321_v32 }
0x2c14   :  { %27242 = vmatmul.mubr.f32.vlgmr.msra.gmra.mrb[124].mxu0 %v22398_v45 }
0x2c15   :  { %27245 = vmatpush3.xpose.msra.mxu0 %v22332_v37  ;;  %27246 = vmatprep.mubr.msk.f32.mxu0 %vm28322_vm5, %v28321_v32 }
0x2c16   :  { %27249 = vmatprep.subr.mxu0 %v28321_v32 }
0x2c1c   :  { %27247 = vmatmul.mubr.f32.vlgmr.msra.gmra.mrb[124].mxu0 %v22399_v35 }
0x2c1d   :  { %27250 = vmatpush3.xpose.msra.mxu0 %v22410_v8  ;;  %27251 = vmatprep.mubr.msk.f32.mxu0 %vm28322_vm5, %v28321_v32 }
0x2c1e   :  { %27254 = vmatprep.subr.mxu0 %v28321_v32 }
0x2c24   :  { %27252 = vmatmul.mubr.f32.vlgmr.msra.gmra.mrb[124].mxu0 %v22397_v17 }
0x2c25   :  { %27255 = vmatpush3.xpose.msra.mxu0 %v22332_v37  ;;  %27256 = vmatprep.mubr.msk.f32.mxu0 %vm28322_vm5, %v28321_v32 }
0x2c26   :  { %27289 = vmatprep.subr.mxu0 %v28321_v32 }
0x2c2c   :  { %27257 = vmatmul.mubr.f32.vlgmr.msra.gmra.mrb[124].mxu0 %v22397_v17 }
0x2c2d   :  { %27290 = vmatpush3.msra.mxu0 %v29679_v34  ;;  %27291 = vmatprep.mubr.msk.f32.mxu0 %vm28322_vm5, %v28321_v32 }
0x2c2e   :  { %27299 = vmatprep.subr.mxu0 %v28321_v32 }
0x2cc0   :  { %v22024_v0 = vpop.f32.mrb[118].mxu1 }
0x2cc1   :  { %v27208_v18 = vpop.f32.mrb[119].mxu1 }
0x2cc4   :  { %v22172_v47 = vpop.f32.mrb[120].mxu1 }
0x2cc5   :  { %v27218_v31 = vpop.f32.mrb[121].mxu1 }
0x2cc8   :  { %v21948_v3 = vpop.f32.mrb[118].mxu0  ;;  %v22318_v58 = vpop.f32.mrb[122].mxu1 }
0x2cc9   :  { %v22025_v63 = vadd.f32 %v22024_v0, %v21948_v3  ;;  %v27203_v59 = vpop.f32.mrb[119].mxu0  ;;  %v27228_v25 = vpop.f32.mrb[123].mxu1 }
0x2ccc   :  { %v22098_v38 = vpop.f32.mrb[120].mxu0 }
0x2ccd   :  { %v22099_v61 = vadd.f32 %v22098_v38, %v22025_v63  ;;  %v27213_v22 = vpop.f32.mrb[121].mxu0 }
0x2ccf   :  { %v22173_v44 = vadd.f32 %v22172_v47, %v22099_v61 }
0x2cd0   :  { %v22246_v57 = vpop.f32.mrb[122].mxu0 }
0x2cd1   :  { %v22247_v4 = vadd.f32 %v22246_v57, %v22173_v44  ;;  %v27223_v28 = vpop.f32.mrb[123].mxu0 }
0x2cd3   :  { %v22319_v5 = vadd.f32 %v22318_v58, %v22247_v4 }
0x2cd5   :  { %v29985_v55 = vadd.f32 %v22319_v5, %v29909_v30 }
0x2cff   :  { %v22773_v42 = vpop.f32.mrb[124].mxu0 }
0x2d00   :  { %v27810_v49 = vadd.f32 %v22773_v42, %v29785_v29  ;;  %v27258_v30 = vpop.f32.mrb[125].mxu0 }
0x2d02   :  { %v22777_v53 = vsel %vm646_vm6, %v27810_v49, -inf }
0x2d03   :  { %22778 = vmax.xlane.f32.xlu1 %v22777_v53 }
0x2d07   :  { %23699 = vadd.xlane.f32.xlu1 %v23698_v13 }
0x2d90   :  { %v22779_v7 = vpop.xlane.xlu1 %22778 }
0x2d91   :  { %v22780_v33 = vsub.f32 %v27810_v49, %v22779_v7 }
0x2d93   :  { %v22781_v43 = vmul.f32 1.442695, %v22780_v33 }
0x2d94   :  { %v23700_v61 = vpop.xlane.xlu1 %23699 }
0x2d95   :  { %28276 = vpow2.f32 %v22781_v43  ;;  %v23704_v57 = vmul.f32 0.03125, %v23700_v61 }
0x2d97   :  { %v23706_v28 = vsub.f32 %v30003_v51, %v23704_v57 }
0x2d99   :  { %v23708_v49 = vmul.f32 %v23706_v28, %v23706_v28 }
0x2d9b   :  { %v23710_v30 = vsel %vm47_vm0, %v23708_v49, 0.0  ;;  %v37_v49 = vld [vmem:[%s30258_s4 + $0x60] sm:$0xff] }
0x2d9f   :  { %v28277_v23 = vpop.eup %28276 }
0x2da0   :  { %v22783_v52 = vsel %vm646_vm6, %v28277_v23, 0.0 }
0x2da1   :  { %22784 = vadd.xlane.f32.xlu0 %v22783_v52 }
0x2db7   :  { %22788 = vrot.lane.b32.xlu0 %v29365_v26, %s28333_s21 }
0x2e2e   :  { %v22785_v29 = vpop.xlane.xlu0 %22784 }
0x2e2f   :  { %28278 = vrcp.f32 %v22785_v29 }
0x2e32   :  { %v22789_v41 = vpop.permute.xlu0 %22788 }
0x2e33   :  { %v22795_v10 = vand.u32 4294901760, %v22789_v41 }
0x2e35   :  { %27260 = vmatpush3.msra.mxu1 %v22795_v10  ;;  %v22872_v11 = vsub.f32 %v22789_v41, %v22795_v10 }
0x2e36   :  { %27264 = vmatprep.subr.mxu1 %v28321_v32 }
0x2e37   :  { %v22873_v48 = vand.u32 4294901760, %v22872_v11 }
0x2e39   :  { %v28279_v1 = vpop.eup %28278  ;;  %v22874_v17 = vsub.f32 %v22872_v11, %v22873_v48 }
0x2e3a   :  { %v22787_v20 = vmul.f32 %v28279_v1, %v28277_v23  ;;  %v28296_v1 = vld [vmem:[%s30258_s4 + $0x138] sm:$0x1f] }
0x2e3b   :  { %v22875_v26 = vand.u32 4294901760, %v22874_v17 }
0x2e3c   :  { %v22792_v19 = vsel %vm646_vm6, %v22787_v20, 0  ;;  %v30066_v20 = vrot.slane %v28296_v1, %v11594_v15  ;;  %v30_v15 = vld [vmem:[%s30258_s4 + $0x28] sm:$0xff] }
0x2e3d   :  { %v22860_v54 = vand.u32 4294901760, %v22792_v19 }
0x2e3f   :  { %v22861_v24 = vsub.f32 %v22792_v19, %v22860_v54  ;;  %v30070_v19 = vrot.slane %v28296_v1, %v23692_v36  ;;  %v33_v36 = vld [vmem:[%s30258_s4 + $0x40] sm:$0xff] }
0x2e41   :  { %v22862_v50 = vand.u32 4294901760, %v22861_v24 }
0x2e43   :  { %v22863_v37 = vsub.f32 %v22861_v24, %v22862_v50 }
0x2e45   :  { %v22864_v46 = vand.u32 4294901760, %v22863_v37  ;;  %v27_v37 = vld [vmem:[%s30258_s4 + $0x10] sm:$0xff] }
0x2e47   :  { %27262 = vmatmul.mubr.f32.vlgmr.msra.gmra.mrb[124].mxu1 %v22864_v46  ;;  %v23761_v46 = vand.u32 4294901760, %v27_v37 }
0x2e48   :  { %27265 = vmatpush3.msra.mxu1 %v22875_v26  ;;  %27266 = vmatprep.mubr.msk.f32.mxu1 %vm28322_vm5, %v28321_v32  ;;  %v23764_v26 = vand.u32 4294901760, %v30_v15 }
0x2e49   :  { %27269 = vmatprep.subr.mxu1 %v28321_v32 }
0x2e4f   :  { %27267 = vmatmul.mubr.f32.vlgmr.msra.gmra.mrb[124].mxu1 %v22860_v54 }
0x2e50   :  { %27270 = vmatpush3.msra.mxu1 %v22872_v11  ;;  %27271 = vmatprep.mubr.msk.f32.mxu1 %vm28322_vm5, %v28321_v32 }
0x2e51   :  { %27274 = vmatprep.subr.mxu1 %v28321_v32 }
0x2e57   :  { %27272 = vmatmul.mubr.f32.vlgmr.msra.gmra.mrb[124].mxu1 %v22861_v24 }
0x2e58   :  { %27275 = vmatpush3.msra.mxu1 %v22795_v10  ;;  %27276 = vmatprep.mubr.msk.f32.mxu1 %vm28322_vm5, %v28321_v32 }
0x2e59   :  { %27279 = vmatprep.subr.mxu1 %v28321_v32 }
0x2e5f   :  { %27277 = vmatmul.mubr.f32.vlgmr.msra.gmra.mrb[124].mxu1 %v22862_v50 }
0x2e60   :  { %27280 = vmatpush3.msra.mxu1 %v22873_v48  ;;  %27281 = vmatprep.mubr.msk.f32.mxu1 %vm28322_vm5, %v28321_v32 }
0x2e61   :  { %27284 = vmatprep.subr.mxu1 %v28321_v32 }
0x2e67   :  { %27282 = vmatmul.mubr.f32.vlgmr.msra.gmra.mrb[124].mxu1 %v22860_v54 }
0x2e68   :  { %27285 = vmatpush3.msra.mxu1 %v22795_v10  ;;  %27286 = vmatprep.mubr.msk.f32.mxu1 %vm28322_vm5, %v28321_v32 }
0x2e69   :  { %27294 = vmatprep.subr.mxu1 %v28321_v32 }
0x2e6f   :  { %27287 = vmatmul.mubr.f32.vlgmr.msra.gmra.mrb[124].mxu1 %v22860_v54 }
0x2e70   :  { %27295 = vmatpush3.msra.mxu1 %v29709_v6  ;;  %27296 = vmatprep.mubr.msk.f32.mxu1 %vm28322_vm5, %v28321_v32 }
0x2e71   :  { %27304 = vmatprep.subr.mxu1 %v28321_v32 }
0x2f42   :  { %v23236_v45 = vpop.f32.mrb[124].mxu1 }
0x2f43   :  { %v23241_v12 = vsel %vm646_vm6, %v23236_v45, 0  ;;  %v27288_v35 = vpop.f32.mrb[125].mxu1  ;;  %v36_v45 = vld [vmem:[%s30258_s4 + $0x58] sm:$0xff] }
0x2f44   :  { %v23309_v8 = vand.u32 4294901760, %v23241_v12 }
0x2f46   :  { %v23310_v60 = vsub.f32 %v23241_v12, %v23309_v8  ;;  %27297 = vmatmul.mubr.f32.vlgmr.msra.gmra.mrb[126].mxu1 %v23309_v8  ;;  %v23767_v12 = vand.u32 4294901760, %v33_v36 }
0x2f47   :  { %27305 = vmatpush3.msra.mxu1 %v29679_v34  ;;  %27306 = vmatprep.mubr.msk.f32.mxu1 %vm28322_vm5, %v28321_v32 }
0x2f48   :  { %v23311_v9 = vand.u32 4294901760, %v23310_v60  ;;  %27314 = vmatprep.subr.mxu1 %v28321_v32 }
0x2f4a   :  { %v23312_v6 = vsub.f32 %v23310_v60, %v23311_v9  ;;  %27307 = vmatmul.mubr.f32.vlgmr.msra.gmra.mrb[128].mxu1 %v23311_v9 }
0x2f4b   :  { %27315 = vmatpush3.msra.mxu1 %v29679_v34  ;;  %27316 = vmatprep.mubr.msk.f32.mxu1 %vm28322_vm5, %v28321_v32 }
0x2f4c   :  { %v23313_v56 = vand.u32 4294901760, %v23312_v6 }
0x2f4e   :  { %27292 = vmatmul.mubr.f32.vlgmr.msra.gmra.mrb[126].mxu0 %v23313_v56  ;;  %27317 = vmatmul.mubr.f32.vlgmr.msra.gmra.mrb[130].mxu1 %v23309_v8 }
0x2f4f   :  { %27300 = vmatpush3.msra.mxu0 %v29702_v27  ;;  %27301 = vmatprep.mubr.msk.f32.mxu0 %vm28322_vm5, %v28321_v32 }
0x2f50   :  { %27309 = vmatprep.subr.mxu0 %v28321_v32 }
0x2f52   :  { %27302 = vmatmul.mubr.f32.vlgmr.msra.gmra.mrb[128].mxu0 %v23310_v60  ;;  %v30092_v60 = vpack.c.bf16 %v23764_v26, %v23761_v46 }
0x2f53   :  { %27310 = vmatpush3.msra.mxu0 %v29705_v14  ;;  %27311 = vmatprep.mubr.msk.f32.mxu0 %vm28322_vm5, %v28321_v32 }
0x2f54   :  { %27644 = vmatprep.subr.bf16.mxu0 %v30092_v60 }
0x2f56   :  { %27312 = vmatmul.mubr.f32.vlgmr.msra.gmra.mrb[130].mxu0 %v23309_v8  ;;  %v23770_v8 = vand.u32 4294901760, %v36_v45 }
0x2f57   :  { %27646 = vmatpush3.bf16.msra.mxu0 %v30092_v60 }
0x2f58   :  { %v30095_v6 = vpack.c.bf16 %v23770_v8, %v23767_v12 }
0x2f5a   :  { %27648 = vmatprep.subr.bf16.mxu0 %v30095_v6 }
0x2f5b   :  { %27650 = vmatpush3.bf16.msra.mxu0 %v30095_v6 }
0x3019   :  { %v23391_v34 = vpop.f32.mrb[126].mxu1 }
0x301a   :  { %v27298_v2 = vpop.f32.mrb[127].mxu1 }
0x301b   :  { %v23851_v2 = vsub.f32 %v27_v37, %v23761_v46 }
0x301d   :  { %v23539_v0 = vpop.f32.mrb[128].mxu1 }
0x301e   :  { %v27308_v18 = vpop.f32.mrb[129].mxu1 }
0x301f   :  { %v23852_v18 = vand.u32 4294901760, %v23851_v2 }
0x3021   :  { %v23315_v47 = vpop.f32.mrb[126].mxu0  ;;  %v23685_v31 = vpop.f32.mrb[130].mxu1 }
0x3022   :  { %v23392_v3 = vadd.f32 %v23391_v34, %v23315_v47  ;;  %v27293_v27 = vpop.f32.mrb[127].mxu0  ;;  %v27318_v58 = vpop.f32.mrb[131].mxu1 }
0x3023   :  { %v23865_v27 = vsub.f32 %v33_v36, %v23767_v12  ;;  %v23872_v58 = vsub.f32 %v36_v45, %v23770_v8 }
0x3025   :  { %v23465_v63 = vpop.f32.mrb[128].mxu0 }
0x3026   :  { %v23466_v59 = vadd.f32 %v23465_v63, %v23392_v3  ;;  %v27303_v25 = vpop.f32.mrb[129].mxu0 }
0x3027   :  { %v23866_v25 = vand.u32 4294901760, %v23865_v27 }
0x3028   :  { %v23540_v38 = vadd.f32 %v23539_v0, %v23466_v59  ;;  %v23858_v0 = vsub.f32 %v30_v15, %v23764_v26 }
0x3029   :  { %v23613_v22 = vpop.f32.mrb[130].mxu0 }
0x302a   :  { %v23614_v14 = vadd.f32 %v23613_v22, %v23540_v38  ;;  %v27313_v44 = vpop.f32.mrb[131].mxu0  ;;  %v23859_v47 = vand.u32 4294901760, %v23858_v0  ;;  %v23873_v38 = vand.u32 4294901760, %v23872_v58  ;;  %v23867_v22 = vsub.f32 %v23865_v27, %v23866_v25 }
0x302c   :  { %v23686_v32 = vadd.f32 %v23685_v31, %v23614_v14  ;;  %v23853_v31 = vsub.f32 %v23851_v2, %v23852_v18  ;;  %v23860_v3 = vsub.f32 %v23858_v0, %v23859_v47  ;;  %v23874_v14 = vsub.f32 %v23872_v58, %v23873_v38 }
0x302d   :  { %v23868_v44 = vand.u32 4294901760, %v23867_v22 }
0x302e   :  { %v23689_v4 = vadd.f32 %v23686_v32, %v29985_v55  ;;  %v23854_v63 = vand.u32 4294901760, %v23853_v31  ;;  %v23861_v59 = vand.u32 4294901760, %v23860_v3  ;;  %v23875_v57 = vand.u32 4294901760, %v23874_v14 }
0x3030   :  { %v23695_v5 = vadd.f32 %v29996_v40, %v23689_v4  ;;  %v30104_v61 = vpack.c.bf16 %v23861_v59, %v23854_v63  ;;  %v27655_v32 = vpack.c.bf16 %v23875_v57, %v23868_v44  ;;  %v30107_v4 = vpack.c.bf16 %v23858_v0, %v23851_v2 }
0x3032   :  { %v30050_v16 = vadd.f32 %v23695_v5, %v29180_v21  ;;  %27652 = vmatprep.subr.bf16.mxu0 %v30104_v61  ;;  %v30111_v5 = vpack.c.bf16 %v23859_v47, %v23852_v18 }
0x3034   :  { %v23701_v42 = vsel %vm47_vm0, %v30050_v16, 0.0 }
0x3035   :  { %23702 = vadd.xlane.f32.xlu1 %v23701_v42  ;;  %v30113_v42 = vpack.c.bf16 %v23873_v38, %v23866_v25 }
0x3039   :  { %23711 = vadd.xlane.f32.xlu1 %v23710_v30  ;;  %v38_v30 = vld [vmem:[%s30258_s4 + $0x78] sm:$0xff] }
0x30c2   :  { %v23703_v53 = vpop.xlane.xlu1 %23702 }
0x30c3   :  { %v23705_v13 = vmul.f32 0.03125, %v23703_v53  ;;  %v39_v53 = vld [vmem:[%s30258_s4 + $0x90] sm:$0xff] }
0x30c5   :  { %v30056_v7 = vsub.f32 %v30050_v16, %v23705_v13  ;;  %v24302_v13 = vand.u32 4294901760, %v37_v49 }
0x30c6   :  { %v23712_v55 = vpop.xlane.xlu1 %23711 }
0x30c7   :  { %v23716_v33 = vmul.f32 0.032258064, %v23712_v55  ;;  %v23709_v40 = vmul.f32 %v30056_v7, %v30056_v7  ;;  %v24305_v55 = vand.u32 4294901760, %v38_v30 }
0x30c9   :  { %28280 = vrsqrt.f32 %v23716_v33  ;;  %v23713_v21 = vsel %vm47_vm0, %v23709_v40, 0.0  ;;  %vm23720_vm15 = vcmp.eq.f32.partialorder %v23716_v33, inf  ;;  %v23723_v52 = vand.u32 2147483648, %v23716_v33 }
0x30ca   :  { %23714 = vadd.xlane.f32.xlu1 %v23713_v21  ;;  %vm23722_vm1 = vcmp.eq.f32.partialorder %v23716_v33, 0.0  ;;  %v24308_v40 = vand.u32 4294901760, %v39_v53 }
0x30d3   :  { %v28281_v43 = vpop.eup %28280 }
0x30d4   :  { %v23719_v23 = vmul.f32 %v28281_v43, %v23716_v33  ;;  %v30127_v43 = vpack.c.bf16 %v24305_v55, %v24302_v13 }
0x30d6   :  { %v23721_v29 = vsel %vm23720_vm15, %v23716_v33, %v23719_v23  ;;  %v40_v33 = vld [vmem:[%s30258_s4 + $0xa8] sm:$0xff]  ;;  %v30129_v23 = vsub.f32 %v37_v49, %v24302_v13 }
0x30d7   :  { %v23724_v41 = vsel %vm23722_vm1, %v23723_v52, %v23721_v29  ;;  %v24311_v21 = vand.u32 4294901760, %v40_v33  ;;  %v30131_v52 = vsub.f32 %v38_v30, %v24305_v55  ;;  %v30133_v29 = vsub.f32 %v39_v53, %v24308_v40 }
0x30d8   :  { %v23732_v10 = vadd.f32 1e-06, %v23724_v41  ;;  %v24397_v1 = vand.u32 4294901760, %v30129_v23 }
0x30d9   :  { %v30135_v41 = vpack.c.bf16 %v24311_v21, %v24308_v40 }
0x30da   :  { %28282 = vrcp.f32 %v23732_v10  ;;  %v30137_v10 = vsub.f32 %v40_v33, %v24311_v21 }
0x30e4   :  { %v28283_v11 = vpop.eup %28282 }
0x30e5   :  { %v23735_v54 = vmul.f32 %v28283_v11, %v23706_v28  ;;  %v30109_v28 = vpack.c.bf16 %v23872_v58, %v23865_v27  ;;  %v24404_v11 = vand.u32 4294901760, %v30131_v52 }
0x30e7   :  { %v23742_v48 = vmul.f32 %v30066_v20, %v23735_v54  ;;  %v24411_v54 = vand.u32 4294901760, %v30133_v29 }
0x30e9   :  { %v23748_v24 = vadd.f32 %v30070_v19, %v23742_v48  ;;  %v24418_v48 = vand.u32 4294901760, %v30137_v10  ;;  %v24412_v37 = vsub.f32 %v30133_v29, %v24411_v54 }
0x30eb   :  { %v23755_v50 = vsel %vm47_vm0, %v23748_v24, 0  ;;  %v24398_v24 = vsub.f32 %v30129_v23, %v24397_v1  ;;  %v24419_v15 = vsub.f32 %v30137_v10, %v24418_v48  ;;  %v24413_v26 = vand.u32 4294901760, %v24412_v37 }
0x30ec   :  { %v30075_v17 = vand.u32 4294901760, %v23755_v50 }
0x30ed   :  { %v24399_v36 = vand.u32 4294901760, %v24398_v24  ;;  %v24420_v45 = vand.u32 4294901760, %v24419_v15 }
0x30ee   :  { %v30090_v35 = vsub.f32 %v23755_v50, %v30075_v17  ;;  %v24405_v50 = vsub.f32 %v30131_v52, %v24404_v11 }
0x30ef   :  { %v27711_v8 = vpack.c.bf16 %v24420_v45, %v24413_v26 }
0x30f0   :  { %v23831_v9 = vand.u32 4294901760, %v30090_v35  ;;  %v24406_v46 = vand.u32 4294901760, %v24405_v50 }
0x30f2   :  { %v23832_v56 = vsub.f32 %v30090_v35, %v23831_v9  ;;  %v27707_v12 = vpack.c.bf16 %v24406_v46, %v24399_v36  ;;  %v27723_v36 = vpack.c.bf16 %v30131_v52, %v30129_v23 }
0x30f4   :  { %v23833_v34 = vand.u32 4294901760, %v23832_v56  ;;  %27708 = vmatprep.subr.bf16.mxu1 %v27707_v12 }
0x30f5   :  { %27710 = vmatpush3.bf16.msra.mxu1 %v27707_v12 }
0x30f6   :  { %27327 = vmatprep.mubr.f32.mxu0 %v23833_v34  ;;  %27712 = vmatprep.subr.bf16.mxu1 %v27711_v8 }
0x30f9   :  { %27714 = vmatpush3.bf16.msra.mxu1 %v27711_v8 }
0x3157   :  { %v23715_v56 = vpop.xlane.xlu1 %23714 }
0x3158   :  { %v23717_v34 = vmul.f32 0.032258064, %v23715_v56 }
0x315a   :  { %28284 = vrsqrt.f32 %v23717_v34  ;;  %vm23727_vm2 = vcmp.eq.f32.partialorder %v23717_v34, inf  ;;  %v23730_v18 = vand.u32 2147483648, %v23717_v34  ;;  %vm23729_vm3 = vcmp.eq.f32.partialorder %v23717_v34, 0.0 }
0x3164   :  { %v28285_v2 = vpop.eup %28284 }
0x3165   :  { %v23726_v0 = vmul.f32 %v28285_v2, %v23717_v34 }
0x3167   :  { %v23728_v47 = vsel %vm23727_vm2, %v23717_v34, %v23726_v0  ;;  %v23752_v34 = vsub.s32 5, %v28429_v62 }
0x3168   :  { %v23731_v31 = vsel %vm23729_vm3, %v23730_v18, %v23728_v47 }
0x3169   :  { %v23733_v3 = vadd.f32 1e-06, %v23731_v31  ;;  %v23753_v2 = vrot.slane %v29991_v39, %v23752_v34 }
0x316b   :  { %28286 = vrcp.f32 %v23733_v3 }
0x3175   :  { %v28287_v27 = vpop.eup %28286 }
0x3176   :  { %v23737_v58 = vmul.f32 %v28287_v27, %v30056_v7  ;;  %v41_v7 = vld [vmem:[%s30258_s4 + $0xc0] sm:$0xff] }
0x3178   :  { %v23743_v63 = vmul.f32 %v30066_v20, %v23737_v58  ;;  %v42_v20 = vld [vmem:[%s30258_s4 + $0xd8] sm:$0xff] }
0x317a   :  { %v23749_v59 = vadd.f32 %v30070_v19, %v23743_v63  ;;  %v24314_v19 = vand.u32 4294901760, %v41_v7 }
0x317c   :  { %v23758_v25 = vsel %vm47_vm0, %v23749_v59, 0 }
0x317d   :  { %v23839_v38 = vand.u32 4294901760, %v23758_v25 }
0x317f   :  { %v23840_v22 = vsub.f32 %v23758_v25, %v23839_v38 }
0x3181   :  { %v23841_v14 = vand.u32 4294901760, %v23840_v22 }
0x3183   :  { %v23842_v44 = vsub.f32 %v23840_v22, %v23841_v14 }
0x3185   :  { %v23843_v57 = vand.u32 4294901760, %v23842_v44 }
0x3187   :  { %27328 = vmatmul.mubr.f32.vlgmr.msra.gmra.mrb[132].mxu0 %v23843_v57 }
0x3188   :  { %27654 = vmatpush3.bf16.msra.mxu0 %v30104_v61  ;;  %27338 = vmatprep.mubr.f32.mxu0 %v30075_v17 }
0x3189   :  { %27656 = vmatprep.subr.bf16.mxu0 %v27655_v32 }
0x318c   :  { %27658 = vmatpush3.bf16.msra.mxu0 %v27655_v32 }
0x318d   :  { %27660 = vmatprep.subr.bf16.mxu0 %v30107_v4 }
0x318f   :  { %27339 = vmatmul.mubr.f32.vlgmr.msra.gmra.mrb[132].mxu0 %v23839_v38 }
0x3190   :  { %27662 = vmatpush3.bf16.msra.mxu0 %v30107_v4  ;;  %27349 = vmatprep.mubr.f32.mxu0 %v30090_v35  ;;  %v24424_v35 = vsub.f32 %v41_v7, %v24314_v19 }
0x3191   :  { %27664 = vmatprep.subr.bf16.mxu0 %v30109_v28 }
0x3192   :  { %v24425_v61 = vand.u32 4294901760, %v24424_v35 }
0x3194   :  { %27666 = vmatpush3.bf16.msra.mxu0 %v30109_v28 }
0x3195   :  { %27668 = vmatprep.subr.bf16.mxu0 %v30092_v60 }
0x3197   :  { %27350 = vmatmul.mubr.f32.vlgmr.msra.gmra.mrb[132].mxu0 %v23840_v22  ;;  %v27727_v22 = vpack.c.bf16 %v30137_v10, %v30133_v29  ;;  %v24292_v29 = vsub.s32 6, %v28429_v62 }
0x3198   :  { %27670 = vmatpush3.bf16.msra.mxu0 %v30092_v60  ;;  %27360 = vmatprep.mubr.f32.mxu0 %v23831_v9  ;;  %v43_v9 = vld [vmem:[%s30258_s4 + $0xf0] sm:$0xff] }
0x3199   :  { %27672 = vmatprep.subr.bf16.mxu0 %v30095_v6  ;;  %v24320_v4 = vand.u32 4294901760, %v43_v9 }
0x319b   :  { %v24438_v49 = vsub.f32 %v43_v9, %v24320_v4 }
0x319c   :  { %27674 = vmatpush3.bf16.msra.mxu0 %v30095_v6 }
0x319d   :  { %27676 = vmatprep.subr.bf16.mxu0 %v30111_v5  ;;  %v24439_v55 = vand.u32 4294901760, %v24438_v49 }
0x319f   :  { %27361 = vmatmul.mubr.f32.vlgmr.msra.gmra.mrb[132].mxu0 %v23841_v14  ;;  %v24440_v21 = vsub.f32 %v24438_v49, %v24439_v55 }
0x31a0   :  { %27678 = vmatpush3.bf16.msra.mxu0 %v30111_v5  ;;  %27371 = vmatprep.mubr.f32.mxu0 %v30075_v17  ;;  %v24426_v5 = vsub.f32 %v24424_v35, %v24425_v61 }
0x31a1   :  { %27680 = vmatprep.subr.bf16.mxu0 %v30113_v42  ;;  %v24441_v50 = vand.u32 4294901760, %v24440_v21 }
0x31a2   :  { %v24427_v53 = vand.u32 4294901760, %v24426_v5 }
0x31a4   :  { %27682 = vmatpush3.bf16.msra.mxu0 %v30113_v42 }
0x31a5   :  { %27684 = vmatprep.subr.bf16.mxu0 %v30092_v60 }
0x31a7   :  { %27372 = vmatmul.mubr.f32.vlgmr.msra.gmra.mrb[132].mxu0 %v23839_v38 }
0x31a8   :  { %27686 = vmatpush3.bf16.msra.mxu0 %v30092_v60  ;;  %27382 = vmatprep.mubr.f32.mxu0 %v30075_v17  ;;  %v24317_v17 = vand.u32 4294901760, %v42_v20 }
0x31a9   :  { %27688 = vmatprep.subr.bf16.mxu0 %v30095_v6 }
0x31aa   :  { %v24431_v60 = vsub.f32 %v42_v20, %v24317_v17  ;;  %v30200_v46 = vpack.c.bf16 %v24317_v17, %v24314_v19 }
0x31ac   :  { %27690 = vmatpush3.bf16.msra.mxu0 %v30095_v6  ;;  %v44_v6 = vld [vmem:[%s30258_s4 + $0x108] sm:$0xff]  ;;  %v24432_v32 = vand.u32 4294901760, %v24431_v60  ;;  %v27731_v45 = vpack.c.bf16 %v24431_v60, %v24424_v35  ;;  %v27755_v35 = vpack.c.bf16 %v24404_v11, %v24397_v1  ;;  %s28335_s4 = smov [#allocation2]  }
0x31ad   :  { %27692 = vmatprep.subr.bf16.mxu0 %v30127_v43  ;;  %v24323_v28 = vand.u32 4294901760, %v44_v6  ;;  %s24890_s16 = sshll.u32 %s28335_s4, 4  ;;  %s24891_s16 = int_to_ptr.vmem [resolvable:$true] %s24890_s16 }
0x31ae   :  { %v24433_v42 = vsub.f32 %v24431_v60, %v24432_v32  ;;  %v27763_v8 = vpack.c.bf16 %v24432_v32, %v24425_v61  ;;  %v27759_v60 = vpack.c.bf16 %v24418_v48, %v24411_v54  ;;  %s28297_s3 = scalar_lea.vmem %s24891_s16, 256  ;;  %p28302_p1 = scmp.lt.s32.totalorder %s24891_s16, %s24891_s16 }
0x31af   :  { %27383 = vmatmul.mubr.f32.vlgmr.msra.gmra.mrb[132].mxu0 %v23839_v38  ;;  %v24445_v30 = vsub.f32 %v44_v6, %v24323_v28  ;;  %v30202_v26 = vpack.c.bf16 %v24323_v28, %v24320_v4  ;;  %p28298_p0 = scmp.ne.s32.totalorder %s24891_s16, %s28297_s3  ;;  %p28303_p2 = scmp.lt.s32.totalorder %s28297_s3, %s28297_s3 }
0x31b0   :  { %27694 = vmatpush3.bf16.msra.mxu0 %v30127_v43  ;;  %v24434_v13 = vand.u32 4294901760, %v24433_v42 }
0x31b1   :  { %27696 = vmatprep.subr.bf16.mxu0 %v30135_v41  ;;  %v24446_v33 = vand.u32 4294901760, %v24445_v30  ;;  %v27735_v12 = vpack.c.bf16 %v24445_v30, %v24438_v49  ;;  %p28304_p3 = por %p28303_p2, %p28302_p1 }
0x31b2   :  { %v27715_v40 = vpack.c.bf16 %v24434_v13, %v24427_v53 }
0x31b3   :  { %v24447_v24 = vsub.f32 %v24445_v30, %v24446_v33  ;;  %v27767_v56 = vpack.c.bf16 %v24446_v33, %v24439_v55  ;;  %p28305_p4 = pnand %p28304_p3, %p28298_p0 }
0x31b4   :  { %27698 = vmatpush3.bf16.msra.mxu0 %v30135_v41  ;;  %27716 = vmatprep.subr.bf16.mxu1 %v27715_v40 }
0x31b5   :  { %v24448_v37 = vand.u32 4294901760, %v24447_v24  ;;  %27718 = vmatpush3.bf16.msra.mxu1 %v27715_v40  ;;  %27700 = vmatprep.subr.bf16.mxu0 %v30200_v46 }
0x31b7   :  { %v27719_v15 = vpack.c.bf16 %v24448_v37, %v24441_v50 }
0x31b8   :  { %27702 = vmatpush3.bf16.msra.mxu0 %v30200_v46 }
0x31b9   :  { %27720 = vmatprep.subr.bf16.mxu1 %v27719_v15  ;;  %27704 = vmatprep.subr.bf16.mxu0 %v30202_v26 }
0x31ba   :  { %27722 = vmatpush3.bf16.msra.mxu1 %v27719_v15 }
0x31bb   :  { %27724 = vmatprep.subr.bf16.mxu1 %v27723_v36 }
0x31bc   :  { %27706 = vmatpush3.bf16.msra.mxu0 %v30202_v26 }
0x3282   :  { %v27384_v0 = vpop.f32.mrb[132].mxu0 }
0x3283   :  { %v27811_v18 = vadd.f32 %v27384_v0, %v23753_v2  ;;  %v24278_v47 = vpop.f32.mrb[133].mxu0 }
0x3284   :  { %v27812_v31 = vadd.f32 %v24278_v47, %v23753_v2 }
0x3285   :  { %v24289_v3 = vmax.f32 %v27811_v18, 0.0 }
0x3286   :  { %v24288_v27 = vmax.f32 %v27812_v31, 0.0 }
0x3287   :  { %v24299_v58 = vsel %vm24294_vm4, %v24289_v3, 0 }
0x3288   :  { %v24384_v63 = vand.u32 4294901760, %v24299_v58  ;;  %v24296_v59 = vsel %vm24294_vm4, %v24288_v27, 0 }
0x3289   :  { %v24374_v25 = vand.u32 4294901760, %v24296_v59 }
0x328a   :  { %v24385_v38 = vsub.f32 %v24299_v58, %v24384_v63 }
0x328b   :  { %27420 = vmatprep.mubr.f32.mxu1 %v24374_v25  ;;  %v24375_v14 = vsub.f32 %v24296_v59, %v24374_v25 }
0x328c   :  { %v24386_v44 = vand.u32 4294901760, %v24385_v38  ;;  %27421 = vmatmul.mubr.f32.vlgmr.msra.gmra.mrb[132].mxu1 %v24384_v63 }
0x328d   :  { %27726 = vmatpush3.bf16.msra.mxu1 %v27723_v36  ;;  %27439 = vmatprep.mubr.f32.mxu1 %v24375_v14  ;;  %v24376_v57 = vand.u32 4294901760, %v24375_v14 }
0x328e   :  { %27728 = vmatprep.subr.bf16.mxu1 %v27727_v22  ;;  %v24387_v7 = vsub.f32 %v24385_v38, %v24386_v44 }
0x328f   :  { %v24377_v20 = vsub.f32 %v24375_v14, %v24376_v57 }
0x3290   :  { %v24388_v17 = vand.u32 4294901760, %v24387_v7 }
0x3291   :  { %27730 = vmatpush3.bf16.msra.mxu1 %v27727_v22  ;;  %v24378_v19 = vand.u32 4294901760, %v24377_v20 }
0x3292   :  { %27732 = vmatprep.subr.bf16.mxu1 %v27731_v45 }
0x3293   :  { %27401 = vmatprep.mubr.f32.mxu0 %v24378_v19 }
0x3294   :  { %27402 = vmatmul.mubr.f32.vlgmr.msra.gmra.mrb[134].mxu0 %v24388_v17 }
0x3295   :  { %27734 = vmatpush3.bf16.msra.mxu1 %v27731_v45 }
0x3296   :  { %27736 = vmatprep.subr.bf16.mxu1 %v27735_v12 }
0x3299   :  { %27738 = vmatpush3.bf16.msra.mxu1 %v27735_v12 }
0x329a   :  { %27740 = vmatprep.subr.bf16.mxu1 %v30127_v43 }
0x329c   :  { %27440 = vmatmul.mubr.f32.vlgmr.msra.gmra.mrb[132].mxu1 %v24385_v38 }
0x329d   :  { %27742 = vmatpush3.bf16.msra.mxu1 %v30127_v43  ;;  %27458 = vmatprep.mubr.f32.mxu1 %v24376_v57 }
0x329e   :  { %27744 = vmatprep.subr.bf16.mxu1 %v30135_v41 }
0x32a1   :  { %27746 = vmatpush3.bf16.msra.mxu1 %v30135_v41 }
0x32a2   :  { %27748 = vmatprep.subr.bf16.mxu1 %v30200_v46 }
0x32a5   :  { %27750 = vmatpush3.bf16.msra.mxu1 %v30200_v46 }
0x32a6   :  { %27752 = vmatprep.subr.bf16.mxu1 %v30202_v26 }
0x32a9   :  { %27754 = vmatpush3.bf16.msra.mxu1 %v30202_v26 }
0x32aa   :  { %27756 = vmatprep.subr.bf16.mxu1 %v27755_v35 }
0x32ac   :  { %27459 = vmatmul.mubr.f32.vlgmr.msra.gmra.mrb[132].mxu1 %v24386_v44 }
0x32ad   :  { %27758 = vmatpush3.bf16.msra.mxu1 %v27755_v35  ;;  %27477 = vmatprep.mubr.f32.mxu1 %v24374_v25 }
0x32ae   :  { %27760 = vmatprep.subr.bf16.mxu1 %v27759_v60 }
0x32b1   :  { %27762 = vmatpush3.bf16.msra.mxu1 %v27759_v60 }
0x32b2   :  { %27764 = vmatprep.subr.bf16.mxu1 %v27763_v8 }
0x32b5   :  { %27766 = vmatpush3.bf16.msra.mxu1 %v27763_v8 }
0x32b6   :  { %27768 = vmatprep.subr.bf16.mxu1 %v27767_v56 }
0x32b9   :  { %27770 = vmatpush3.bf16.msra.mxu1 %v27767_v56 }
0x32ba   :  { %27772 = vmatprep.subr.bf16.mxu1 %v30127_v43 }
0x32bc   :  { %27478 = vmatmul.mubr.f32.vlgmr.msra.gmra.mrb[132].mxu1 %v24384_v63 }
0x32bd   :  { %27774 = vmatpush3.bf16.msra.mxu1 %v30127_v43  ;;  %27496 = vmatprep.mubr.f32.mxu1 %v24374_v25  ;;  %v24293_v43 = vrot.slane %v29991_v39, %v24292_v29 }
0x32be   :  { %27776 = vmatprep.subr.bf16.mxu1 %v30135_v41 }
0x32c1   :  { %27778 = vmatpush3.bf16.msra.mxu1 %v30135_v41 }
0x32c2   :  { %27780 = vmatprep.subr.bf16.mxu1 %v30200_v46 }
0x32c5   :  { %27782 = vmatpush3.bf16.msra.mxu1 %v30200_v46 }
0x32c6   :  { %27784 = vmatprep.subr.bf16.mxu1 %v30202_v26 }
0x32c9   :  { %27786 = vmatpush3.bf16.msra.mxu1 %v30202_v26 }
0x32cc   :  { %27497 = vmatmul.mubr.f32.vlgmr.msra.gmra.mrb[132].mxu1 %v24384_v63 }
0x3367   :  { %v27403_v23 = vpop.f32.mrb[134].mxu0 }
0x3368   :  { %v24380_v52 = vpop.f32.mrb[135].mxu0  ;;  %v24391_v10 = vadd.f32 %v27403_v23, %v24293_v43 }
0x3369   :  { %v24381_v1 = vadd.f32 %v24380_v52, %v24293_v43 }
0x339f   :  { %v27498_v11 = vpop.f32.mrb[132].mxu1 }
0x33a0   :  { %v27814_v41 = vadd.f32 %v27498_v11, %v24391_v10  ;;  %v24871_v54 = vpop.f32.mrb[133].mxu1 }
0x33a1   :  { %v27816_v48 = vadd.f32 %v24871_v54, %v24381_v1 }
0x33a2   :  { %v24882_v9 = vadd.f32 %v27814_v41, %v30050_v16 }
0x33a3   :  { %v24881_v6 = vadd.f32 %v27816_v48, %v30003_v51 }
0x33a4   :  { %24884 = vst.msk [vmem:[#allocation2 + $0x8] sm:$0xff] %vm47_vm0, %v24882_v9 }
0x33a5   :  { %24883 = vst.msk [vmem:[#allocation2] sm:$0xff] %vm47_vm0, %v24881_v6 }
0x33a6   :  { %28308 = shalt.err (!%p28305_p4)
}
0x33a7   :  { %s28309_s17 = scalar_lea.hbm %s30259_s5, 256 }
0x33a8   :  { %p28310_p5 = scmp.ne.s32.totalorder %s30259_s5, %s28309_s17  ;;  %p28313_p6 = scmp.lt.u32.totalorder %s28309_s17, %s30259_s5 }
0x33aa   :  { %p28315_p7 = pnand %p28313_p6, %p28310_p5 }
0x33ac   :  { %28318 = shalt.err (!%p28315_p7)
}
0x33ad   :  { %s28336_s8 = smov 128   ;;  %s28337_s12 = smov 8  }
0x33ae   :  { %24896 = dma.vmem_to_hbm [thread:$0]  %s24891_s16, 256, %s30259_s5, [#allocation3], %s28336_s8, %s28336_s8, %s28337_s12  }
0x33af   :  { %28319 = dma.done.wait [#allocation3], 256  }
0x33b0   :  { %28320 = vsyncadd [#allocation3], 4294967040 }
0x33b1   :  { %24900 = vsyncpa [#allocation3], 1 }

</bundles_post_ra>
